<compile_context>
chip_gen: v7x
topology: tpu7x:2x2x1
jax: 0.10.0
libtpu: 0.0.40
codegen_flags: <defaults>
</compile_context>

<pallas_src>
import functools

import numpy as np
import jax
import jax.numpy as jnp
from jax import lax
from jax.experimental import pallas as pl
from jax.experimental.pallas import tpu as pltpu


BATCH_BLOCK_MAX = 32            # images per grid step (kept a multiple of 16)


# ----------------------------------------------------------------------------
# One-time parameter repacking (hoisted out of the per-call path)
# ----------------------------------------------------------------------------
def _conv_row_weights(w, in_w, out_w):
    """w: (Cout, Cin, KH, KW) -> (KH, Cin*in_w, Cout*out_w) banded matrices M
    with M[dy, ci*in_w + ox + dx, co*out_w + ox] = w[co, ci, dy, dx]."""
    cout, cin, kh, kw = w.shape
    m = np.zeros((kh, cin, in_w, cout, out_w), np.float32)
    for dy in range(kh):
        for dx in range(kw):
            for ox in range(out_w):
                m[dy, :, ox + dx, :, ox] = w[:, :, dy, dx].T
    return m.reshape(kh, cin * in_w, cout * out_w)


def _col_pool_selectors(channels, width):
    """(2, channels*width, channels*width//2) 0/1 matrices: even/odd column
    picks for 2x2 pooling on a lane layout of channel*width."""
    half = width // 2
    sel = np.zeros((2, channels * width, channels * half), np.float32)
    for par in range(2):
        for c in range(channels):
            for px in range(half):
                sel[par, c * width + 2 * px + par, c * half + px] = 1.0
    return sel


def prepare_params(params):
    """Repack PyTorch-layout params into kernel-ready bf16 / padded layout."""
    (w1, b1, w2, b2, fw1, fb1, fw2, fb2, fw3, fb3) = [
        np.asarray(p, np.float32) for p in params]

    w1m = _conv_row_weights(w1, 28, 24)                 # (5, 28, 144)
    w2m = _conv_row_weights(w2, 12, 8)                  # (5, 72, 128)
    cs1 = _col_pool_selectors(6, 24)                    # (2, 144, 72)
    cs2 = _col_pool_selectors(16, 8)                    # (2, 128, 64)

    # fc1: fold PyTorch flatten order (co*16 + py*4 + px) into the weight.
    # Kernel p2 block for a given py has lanes co*4 + px.
    fw1r = fw1.reshape(120, 16, 4, 4)                   # [j, co, py, px]
    fw1p = np.transpose(fw1r, (2, 1, 3, 0)).reshape(4, 64, 120)
    fw1p = np.pad(fw1p, ((0, 0), (0, 0), (0, 8)))       # (4, 64, 128)

    fw2p = np.zeros((128, 128), np.float32)
    fw2p[:120, :84] = fw2.T
    fw3p = np.zeros((128, 128), np.float32)
    fw3p[:84, :10] = fw3.T

    biases = np.zeros((5, 144), np.float32)             # single bias operand
    biases[0, :144] = np.repeat(b1, 24)                 # conv1: lanes co*24+ox
    biases[1, :128] = np.repeat(b2, 8)                  # conv2: lanes co*8+ox
    biases[2, :120] = fb1
    biases[3, :84] = fb2
    biases[4, :10] = fb3

    bf = lambda a: jnp.asarray(a, jnp.bfloat16)
    return (bf(w1m), bf(w2m), bf(cs1), bf(cs2), bf(fw1p), bf(fw2p), bf(fw3p),
            jnp.asarray(biases, jnp.float32))


# ----------------------------------------------------------------------------
# Kernel
# ----------------------------------------------------------------------------
def _mm(a, b):
    # bf16 x bf16 -> f32 : single MXU pass on every TPU generation.
    return jnp.dot(a, b, preferred_element_type=jnp.float32)


def _row_pool(x, n_pairs, B):
    """Row half of 2x2 max-pool on a (2*n_pairs*B, L) tile whose rows are
    interleaved as oy*B + b.  Pure VPU max of B-aligned row blocks."""
    parts = [jnp.maximum(x[(2 * i) * B:(2 * i + 1) * B, :],
                         x[(2 * i + 1) * B:(2 * i + 2) * B, :])
             for i in range(n_pairs)]
    return parts[0] if n_pairs == 1 else jnp.concatenate(parts, axis=0)


def _col_pool(x, sel_ref):
    """Column half of 2x2 max-pool via precomputed 0/1 selection matmuls."""
    xb = x.astype(jnp.bfloat16)
    return jnp.maximum(_mm(xb, sel_ref[0]), _mm(xb, sel_ref[1]))


def _net_kernel(x_ref, w1m_ref, w2m_ref, cs1_ref, cs2_ref,
                fw1p_ref, fw2p_ref, fw3p_ref, bias_ref, o_ref, *, B):
    x = x_ref[0]                                   # (28*B, 28) f32, row = y*B+b
    bias = bias_ref[...]                           # (5, 144) f32

    # conv1 (1->6, 5x5): 5 accumulated banded matmuls; lanes = co*24 + ox.
    acc1 = None
    for dy in range(5):
        lhs = x[dy * B:(dy + 24) * B, :].astype(jnp.bfloat16)   # (24B, 28)
        t = _mm(lhs, w1m_ref[dy])
        acc1 = t if acc1 is None else acc1 + t
    c1 = jnp.maximum(acc1 + bias[0:1, :], 0.0)     # (24B, 144)

    # pool1 -> (12B, 72), lanes = ci*12 + px
    p1 = _col_pool(_row_pool(c1, 12, B), cs1_ref).astype(jnp.bfloat16)

    # conv2 (6->16, 5x5); lanes = co*8 + ox (exactly 128 -> lane dense).
    acc2 = None
    for dy in range(5):
        t = _mm(p1[dy * B:(dy + 8) * B, :], w2m_ref[dy])
        acc2 = t if acc2 is None else acc2 + t
    c2 = jnp.maximum(acc2 + bias[1:2, 0:128], 0.0)  # (8B, 128)

    # pool2 -> (4B, 64), lanes = co*4 + px
    p2 = _col_pool(_row_pool(c2, 4, B), cs2_ref)

    # fc1: PyTorch flatten order folded into fw1p; 4 accumulated (B,64)@(64,128).
    h = None
    for py in range(4):
        t = _mm(p2[py * B:(py + 1) * B, :].astype(jnp.bfloat16), fw1p_ref[py])
        h = t if h is None else h + t
    h = jnp.maximum(h + bias[2:3, 0:128], 0.0)      # (B, 128); cols >=120 stay 0

    h = jnp.maximum(_mm(h.astype(jnp.bfloat16), fw2p_ref[...])
                    + bias[3:4, 0:128], 0.0)        # cols >= 84 stay 0
    o_ref[...] = _mm(h.astype(jnp.bfloat16), fw3p_ref[...]) + bias[4:5, 0:128]


# ----------------------------------------------------------------------------
# Wrapper
# ----------------------------------------------------------------------------
def _batch_block(n):
    return min(BATCH_BLOCK_MAX, 16 * ((n + 15) // 16))


@jax.jit
def net_forward(x_nchw, kparams):
    """Forward pass matching PyTorch `Net`. x_nchw: (N, 1, 28, 28) float32."""
    (w1m, w2m, cs1, cs2, fw1p, fw2p, fw3p, biases) = kparams
    n = x_nchw.shape[0]
    B = _batch_block(n)
    G = (n + B - 1) // B
    n_pad = G * B

    x = x_nchw.reshape(n, 28, 28).astype(jnp.float32)
    if n_pad != n:
        x = jnp.pad(x, ((0, n_pad - n), (0, 0), (0, 0)))
    # Row-interleaved per-block layout: [g, y*B + b, w] = x[g*B + b, y, w].
    xt = x.reshape(G, B, 28, 28).transpose(0, 2, 1, 3).reshape(G, 28 * B, 28)

    per_image_flops = 2 * (5 * 24 * 28 * 144 + 2 * 12 * 144 * 72
                           + 5 * 8 * 72 * 128 + 2 * 4 * 128 * 64
                           + 4 * 64 * 128 + 2 * 128 * 128)
    weight_bytes = 2 * (5 * 28 * 144 + 5 * 72 * 128 + 2 * 144 * 72
                        + 2 * 128 * 64 + 4 * 64 * 128 + 2 * 128 * 128) + 4 * 5 * 144
    cost = pl.CostEstimate(flops=per_image_flops * n_pad, transcendentals=0,
                           bytes_accessed=weight_bytes + n_pad * 4 * (28 * 28 + 128))

    out = pl.pallas_call(
        functools.partial(_net_kernel, B=B),
        out_shape=jax.ShapeDtypeStruct((n_pad, 128), jnp.float32),
        grid=(G,),
        in_specs=[
            pl.BlockSpec((1, 28 * B, 28), lambda g: (g, 0, 0)),   # x block
            pl.BlockSpec((5, 28, 144), lambda g: (0, 0, 0)),      # w1m (resident)
            pl.BlockSpec((5, 72, 128), lambda g: (0, 0, 0)),      # w2m
            pl.BlockSpec((2, 144, 72), lambda g: (0, 0, 0)),      # pool1 selectors
            pl.BlockSpec((2, 128, 64), lambda g: (0, 0, 0)),      # pool2 selectors
            pl.BlockSpec((4, 64, 128), lambda g: (0, 0, 0)),      # fw1p
            pl.BlockSpec((128, 128), lambda g: (0, 0)),           # fw2p
            pl.BlockSpec((128, 128), lambda g: (0, 0)),           # fw3p
            pl.BlockSpec((5, 144), lambda g: (0, 0)),             # all biases
        ],
        out_specs=pl.BlockSpec((B, 128), lambda g: (g, 0)),
        compiler_params=pltpu.CompilerParams(
            dimension_semantics=("parallel",)),
        cost_estimate=cost,
    )(xt, w1m, w2m, cs1, cs2, fw1p, fw2p, fw3p, biases)

    # lane-dense (N_pad,128) kernel output; the 10 real logits sliced outside.
    return out[:n, :10]


# ----------------------------------------------------------------------------
# Pure-JAX reference (original PyTorch param layout) + deterministic init
# ----------------------------------------------------------------------------
def _ref_forward(x, params):
    (w1, b1, w2, b2, fw1, fb1, fw2, fb2, fw3, fb3) = params
    dn = ('NCHW', 'OIHW', 'NCHW')
    hp = lax.Precision.HIGHEST

    y = lax.conv_general_dilated(x, w1, (1, 1), 'VALID',
                                 dimension_numbers=dn, precision=hp)
    y = jnp.maximum(y + b1[None, :, None, None], 0.0)
    n, c, h, w = y.shape
    y = y.reshape(n, c, h // 2, 2, w // 2, 2).max(axis=(3, 5))
    y = lax.conv_general_dilated(y, w2, (1, 1), 'VALID',
                                 dimension_numbers=dn, precision=hp)
    y = jnp.maximum(y + b2[None, :, None, None], 0.0)
    n, c, h, w = y.shape
    y = y.reshape(n, c, h // 2, 2, w // 2, 2).max(axis=(3, 5))
    y = y.reshape(n, 16 * 4 * 4)
    y = jnp.maximum(jnp.dot(y, fw1.T, precision=hp) + fb1, 0.0)
    y = jnp.maximum(jnp.dot(y, fw2.T, precision=hp) + fb2, 0.0)
    return jnp.dot(y, fw3.T, precision=hp) + fb3


def init_params(key):
    """Deterministic PyTorch-like (uniform +-1/sqrt(fan_in)) initialization."""
    ks = jax.random.split(key, 10)

    def u(k, shape, fan_in):
        bound = 1.0 / np.sqrt(fan_in)
        return jax.random.uniform(k, shape, jnp.float32, -bound, bound)

    w1 = u(ks[0], (6, 1, 5, 5), 1 * 5 * 5)
    b1 = u(ks[1], (6,), 1 * 5 * 5)
    w2 = u(ks[2], (16, 6, 5, 5), 6 * 5 * 5)
    b2 = u(ks[3], (16,), 6 * 5 * 5)
    fw1 = u(ks[4], (120, 256), 256)
    fb1 = u(ks[5], (120,), 256)
    fw2 = u(ks[6], (84, 120), 120)
    fb2 = u(ks[7], (84,), 120)
    fw3 = u(ks[8], (10, 84), 84)
    fb3 = u(ks[9], (10,), 84)
    return (w1, b1, w2, b2, fw1, fb1, fw2, fb2, fw3, fb3)


if __name__ == "__main__":
    key = jax.random.PRNGKey(0)
    pkey, xkey = jax.random.split(key)
    params = init_params(pkey)
    kparams = prepare_params(params)        # one-time, kernel-ready layout

    # Net's fc1 = Linear(16*4*4, ...) implies 28x28 single-channel input.
    x = jax.random.normal(xkey, (2, 1, 28, 28), jnp.float32)
    out = jax.block_until_ready(net_forward(x, kparams))
    assert out.shape == (2, 10) and out.dtype == jnp.float32
    np.testing.assert_allclose(np.asarray(out),
                               np.asarray(_ref_forward(x, params)),
                               rtol=2e-2, atol=2e-2)

    # Also exercise the multi-step grid + batch-padding path (B=32, grid=2).
    x2 = jax.random.normal(jax.random.PRNGKey(1), (40, 1, 28, 28), jnp.float32)
    out2 = jax.block_until_ready(net_forward(x2, kparams))
    np.testing.assert_allclose(np.asarray(out2),
                               np.asarray(_ref_forward(x2, params)),
                               rtol=2e-2, atol=2e-2)

    print("KERNEL_OK")
</pallas_src>

<mosaic_0001>
module attributes {stable_mosaic.version = 11 : i64} {
  func.func @_net_kernel(%arg0: i32, %arg1: memref<1x448x28xf32, #tpu.memory_space<vmem>>, %arg2: memref<5x28x144xbf16, #tpu.memory_space<vmem>>, %arg3: memref<5x72x128xbf16, #tpu.memory_space<vmem>>, %arg4: memref<2x144x72xbf16, #tpu.memory_space<vmem>>, %arg5: memref<2x128x64xbf16, #tpu.memory_space<vmem>>, %arg6: memref<4x64x128xbf16, #tpu.memory_space<vmem>>, %arg7: memref<128x128xbf16, #tpu.memory_space<vmem>>, %arg8: memref<128x128xbf16, #tpu.memory_space<vmem>>, %arg9: memref<5x144xf32, #tpu.memory_space<vmem>>, %arg10: memref<16x128xf32, #tpu.memory_space<vmem>>) attributes {dimension_semantics = [#tpu.dimension_semantics<parallel>], iteration_bounds = array<i64: 1>, scalar_prefetch = 0 : i64, scratch_operands = 0 : i64, tpu.core_type = #tpu.core_type<tc>, window_params = [{transform_indices = @transform_0, window_bounds = array<i64: 1, 448, 28>}, {pipeline_mode = #tpu.pipeline_mode<synchronous>, transform_indices = @transform_1, window_bounds = array<i64: 5, 28, 144>}, {pipeline_mode = #tpu.pipeline_mode<synchronous>, transform_indices = @transform_2, window_bounds = array<i64: 5, 72, 128>}, {pipeline_mode = #tpu.pipeline_mode<synchronous>, transform_indices = @transform_3, window_bounds = array<i64: 2, 144, 72>}, {pipeline_mode = #tpu.pipeline_mode<synchronous>, transform_indices = @transform_4, window_bounds = array<i64: 2, 128, 64>}, {pipeline_mode = #tpu.pipeline_mode<synchronous>, transform_indices = @transform_5, window_bounds = array<i64: 4, 64, 128>}, {pipeline_mode = #tpu.pipeline_mode<synchronous>, transform_indices = @transform_6, window_bounds = array<i64: 128, 128>}, {pipeline_mode = #tpu.pipeline_mode<synchronous>, transform_indices = @transform_7, window_bounds = array<i64: 128, 128>}, {pipeline_mode = #tpu.pipeline_mode<synchronous>, transform_indices = @transform_8, window_bounds = array<i64: 5, 144>}, {transform_indices = @transform_9, window_bounds = array<i64: 16, 128>}]} {
    %c0 = arith.constant 0 : index
    %c0_0 = arith.constant 0 : index
    %c0_1 = arith.constant 0 : index
    %0 = vector.load %arg1[%c0, %c0_0, %c0_1] : memref<1x448x28xf32, #tpu.memory_space<vmem>>, vector<1x448x28xf32>
    %1 = vector.shape_cast %0 : vector<1x448x28xf32> to vector<448x28xf32>
    %c0_2 = arith.constant 0 : index
    %c0_3 = arith.constant 0 : index
    %2 = vector.load %arg9[%c0_2, %c0_3] : memref<5x144xf32, #tpu.memory_space<vmem>>, vector<5x144xf32>
    %3 = vector.extract_strided_slice %1 {offsets = [0, 0], sizes = [384, 28], strides = [1, 1]} : vector<448x28xf32> to vector<384x28xf32>
    %4 = arith.truncf %3 : vector<384x28xf32> to vector<384x28xbf16>
    %c0_4 = arith.constant 0 : index
    %c0_5 = arith.constant 0 : index
    %c0_6 = arith.constant 0 : index
    %5 = vector.load %arg2[%c0_4, %c0_5, %c0_6] : memref<5x28x144xbf16, #tpu.memory_space<vmem>>, vector<1x28x144xbf16>
    %6 = vector.shape_cast %5 : vector<1x28x144xbf16> to vector<28x144xbf16>
    %cst = arith.constant dense<0.000000e+00> : vector<384x144xf32>
    %7 = tpu.matmul %4, %6, %cst {dimension_numbers = #tpu.dot_dimension_numbers<[1], [0], [0], [1], [0, 0, 1, 1], [], []>} : vector<384x28xbf16>, vector<28x144xbf16>, vector<384x144xf32> -> vector<384x144xf32>
    %8 = vector.extract_strided_slice %1 {offsets = [16, 0], sizes = [384, 28], strides = [1, 1]} : vector<448x28xf32> to vector<384x28xf32>
    %9 = arith.truncf %8 : vector<384x28xf32> to vector<384x28xbf16>
    %c1 = arith.constant 1 : index
    %c0_7 = arith.constant 0 : index
    %c0_8 = arith.constant 0 : index
    %10 = vector.load %arg2[%c1, %c0_7, %c0_8] : memref<5x28x144xbf16, #tpu.memory_space<vmem>>, vector<1x28x144xbf16>
    %11 = vector.shape_cast %10 : vector<1x28x144xbf16> to vector<28x144xbf16>
    %cst_9 = arith.constant dense<0.000000e+00> : vector<384x144xf32>
    %12 = tpu.matmul %9, %11, %cst_9 {dimension_numbers = #tpu.dot_dimension_numbers<[1], [0], [0], [1], [0, 0, 1, 1], [], []>} : vector<384x28xbf16>, vector<28x144xbf16>, vector<384x144xf32> -> vector<384x144xf32>
    %13 = arith.addf %7, %12 : vector<384x144xf32>
    %14 = vector.extract_strided_slice %1 {offsets = [32, 0], sizes = [384, 28], strides = [1, 1]} : vector<448x28xf32> to vector<384x28xf32>
    %15 = arith.truncf %14 : vector<384x28xf32> to vector<384x28xbf16>
    %c2 = arith.constant 2 : index
    %c0_10 = arith.constant 0 : index
    %c0_11 = arith.constant 0 : index
    %16 = vector.load %arg2[%c2, %c0_10, %c0_11] : memref<5x28x144xbf16, #tpu.memory_space<vmem>>, vector<1x28x144xbf16>
    %17 = vector.shape_cast %16 : vector<1x28x144xbf16> to vector<28x144xbf16>
    %cst_12 = arith.constant dense<0.000000e+00> : vector<384x144xf32>
    %18 = tpu.matmul %15, %17, %cst_12 {dimension_numbers = #tpu.dot_dimension_numbers<[1], [0], [0], [1], [0, 0, 1, 1], [], []>} : vector<384x28xbf16>, vector<28x144xbf16>, vector<384x144xf32> -> vector<384x144xf32>
    %19 = arith.addf %13, %18 : vector<384x144xf32>
    %20 = vector.extract_strided_slice %1 {offsets = [48, 0], sizes = [384, 28], strides = [1, 1]} : vector<448x28xf32> to vector<384x28xf32>
    %21 = arith.truncf %20 : vector<384x28xf32> to vector<384x28xbf16>
    %c3 = arith.constant 3 : index
    %c0_13 = arith.constant 0 : index
    %c0_14 = arith.constant 0 : index
    %22 = vector.load %arg2[%c3, %c0_13, %c0_14] : memref<5x28x144xbf16, #tpu.memory_space<vmem>>, vector<1x28x144xbf16>
    %23 = vector.shape_cast %22 : vector<1x28x144xbf16> to vector<28x144xbf16>
    %cst_15 = arith.constant dense<0.000000e+00> : vector<384x144xf32>
    %24 = tpu.matmul %21, %23, %cst_15 {dimension_numbers = #tpu.dot_dimension_numbers<[1], [0], [0], [1], [0, 0, 1, 1], [], []>} : vector<384x28xbf16>, vector<28x144xbf16>, vector<384x144xf32> -> vector<384x144xf32>
    %25 = arith.addf %19, %24 : vector<384x144xf32>
    %26 = vector.extract_strided_slice %1 {offsets = [64, 0], sizes = [384, 28], strides = [1, 1]} : vector<448x28xf32> to vector<384x28xf32>
    %27 = arith.truncf %26 : vector<384x28xf32> to vector<384x28xbf16>
    %c4 = arith.constant 4 : index
    %c0_16 = arith.constant 0 : index
    %c0_17 = arith.constant 0 : index
    %28 = vector.load %arg2[%c4, %c0_16, %c0_17] : memref<5x28x144xbf16, #tpu.memory_space<vmem>>, vector<1x28x144xbf16>
    %29 = vector.shape_cast %28 : vector<1x28x144xbf16> to vector<28x144xbf16>
    %cst_18 = arith.constant dense<0.000000e+00> : vector<384x144xf32>
    %30 = tpu.matmul %27, %29, %cst_18 {dimension_numbers = #tpu.dot_dimension_numbers<[1], [0], [0], [1], [0, 0, 1, 1], [], []>} : vector<384x28xbf16>, vector<28x144xbf16>, vector<384x144xf32> -> vector<384x144xf32>
    %31 = arith.addf %25, %30 : vector<384x144xf32>
    %32 = vector.extract_strided_slice %2 {offsets = [0, 0], sizes = [1, 144], strides = [1, 1]} : vector<5x144xf32> to vector<1x144xf32>
    %33 = vector.broadcast %32 : vector<1x144xf32> to vector<384x144xf32>
    %34 = arith.addf %31, %33 : vector<384x144xf32>
    %cst_19 = arith.constant 0.000000e+00 : f32
    %35 = vector.broadcast %cst_19 : f32 to vector<384x144xf32>
    %36 = arith.maximumf %34, %35 : vector<384x144xf32>
    %37 = vector.extract_strided_slice %36 {offsets = [0, 0], sizes = [16, 144], strides = [1, 1]} : vector<384x144xf32> to vector<16x144xf32>
    %38 = vector.extract_strided_slice %36 {offsets = [16, 0], sizes = [16, 144], strides = [1, 1]} : vector<384x144xf32> to vector<16x144xf32>
    %39 = arith.maximumf %37, %38 : vector<16x144xf32>
    %40 = vector.extract_strided_slice %36 {offsets = [32, 0], sizes = [16, 144], strides = [1, 1]} : vector<384x144xf32> to vector<16x144xf32>
    %41 = vector.extract_strided_slice %36 {offsets = [48, 0], sizes = [16, 144], strides = [1, 1]} : vector<384x144xf32> to vector<16x144xf32>
    %42 = arith.maximumf %40, %41 : vector<16x144xf32>
    %43 = vector.extract_strided_slice %36 {offsets = [64, 0], sizes = [16, 144], strides = [1, 1]} : vector<384x144xf32> to vector<16x144xf32>
    %44 = vector.extract_strided_slice %36 {offsets = [80, 0], sizes = [16, 144], strides = [1, 1]} : vector<384x144xf32> to vector<16x144xf32>
    %45 = arith.maximumf %43, %44 : vector<16x144xf32>
    %46 = vector.extract_strided_slice %36 {offsets = [96, 0], sizes = [16, 144], strides = [1, 1]} : vector<384x144xf32> to vector<16x144xf32>
    %47 = vector.extract_strided_slice %36 {offsets = [112, 0], sizes = [16, 144], strides = [1, 1]} : vector<384x144xf32> to vector<16x144xf32>
    %48 = arith.maximumf %46, %47 : vector<16x144xf32>
    %49 = vector.extract_strided_slice %36 {offsets = [128, 0], sizes = [16, 144], strides = [1, 1]} : vector<384x144xf32> to vector<16x144xf32>
    %50 = vector.extract_strided_slice %36 {offsets = [144, 0], sizes = [16, 144], strides = [1, 1]} : vector<384x144xf32> to vector<16x144xf32>
    %51 = arith.maximumf %49, %50 : vector<16x144xf32>
    %52 = vector.extract_strided_slice %36 {offsets = [160, 0], sizes = [16, 144], strides = [1, 1]} : vector<384x144xf32> to vector<16x144xf32>
    %53 = vector.extract_strided_slice %36 {offsets = [176, 0], sizes = [16, 144], strides = [1, 1]} : vector<384x144xf32> to vector<16x144xf32>
    %54 = arith.maximumf %52, %53 : vector<16x144xf32>
    %55 = vector.extract_strided_slice %36 {offsets = [192, 0], sizes = [16, 144], strides = [1, 1]} : vector<384x144xf32> to vector<16x144xf32>
    %56 = vector.extract_strided_slice %36 {offsets = [208, 0], sizes = [16, 144], strides = [1, 1]} : vector<384x144xf32> to vector<16x144xf32>
    %57 = arith.maximumf %55, %56 : vector<16x144xf32>
    %58 = vector.extract_strided_slice %36 {offsets = [224, 0], sizes = [16, 144], strides = [1, 1]} : vector<384x144xf32> to vector<16x144xf32>
    %59 = vector.extract_strided_slice %36 {offsets = [240, 0], sizes = [16, 144], strides = [1, 1]} : vector<384x144xf32> to vector<16x144xf32>
    %60 = arith.maximumf %58, %59 : vector<16x144xf32>
    %61 = vector.extract_strided_slice %36 {offsets = [256, 0], sizes = [16, 144], strides = [1, 1]} : vector<384x144xf32> to vector<16x144xf32>
    %62 = vector.extract_strided_slice %36 {offsets = [272, 0], sizes = [16, 144], strides = [1, 1]} : vector<384x144xf32> to vector<16x144xf32>
    %63 = arith.maximumf %61, %62 : vector<16x144xf32>
    %64 = vector.extract_strided_slice %36 {offsets = [288, 0], sizes = [16, 144], strides = [1, 1]} : vector<384x144xf32> to vector<16x144xf32>
    %65 = vector.extract_strided_slice %36 {offsets = [304, 0], sizes = [16, 144], strides = [1, 1]} : vector<384x144xf32> to vector<16x144xf32>
    %66 = arith.maximumf %64, %65 : vector<16x144xf32>
    %67 = vector.extract_strided_slice %36 {offsets = [320, 0], sizes = [16, 144], strides = [1, 1]} : vector<384x144xf32> to vector<16x144xf32>
    %68 = vector.extract_strided_slice %36 {offsets = [336, 0], sizes = [16, 144], strides = [1, 1]} : vector<384x144xf32> to vector<16x144xf32>
    %69 = arith.maximumf %67, %68 : vector<16x144xf32>
    %70 = vector.extract_strided_slice %36 {offsets = [352, 0], sizes = [16, 144], strides = [1, 1]} : vector<384x144xf32> to vector<16x144xf32>
    %71 = vector.extract_strided_slice %36 {offsets = [368, 0], sizes = [16, 144], strides = [1, 1]} : vector<384x144xf32> to vector<16x144xf32>
    %72 = arith.maximumf %70, %71 : vector<16x144xf32>
    %73 = tpu.concatenate %39, %42, %45, %48, %51, %54, %57, %60, %63, %66, %69, %72 in 0 : vector<16x144xf32>, vector<16x144xf32>, vector<16x144xf32>, vector<16x144xf32>, vector<16x144xf32>, vector<16x144xf32>, vector<16x144xf32>, vector<16x144xf32>, vector<16x144xf32>, vector<16x144xf32>, vector<16x144xf32>, vector<16x144xf32> -> vector<192x144xf32>
    %74 = arith.truncf %73 : vector<192x144xf32> to vector<192x144xbf16>
    %c0_20 = arith.constant 0 : index
    %c0_21 = arith.constant 0 : index
    %c0_22 = arith.constant 0 : index
    %75 = vector.load %arg4[%c0_20, %c0_21, %c0_22] : memref<2x144x72xbf16, #tpu.memory_space<vmem>>, vector<1x144x72xbf16>
    %76 = vector.shape_cast %75 : vector<1x144x72xbf16> to vector<144x72xbf16>
    %cst_23 = arith.constant dense<0.000000e+00> : vector<192x72xf32>
    %77 = tpu.matmul %74, %76, %cst_23 {dimension_numbers = #tpu.dot_dimension_numbers<[1], [0], [0], [1], [0, 0, 1, 1], [], []>} : vector<192x144xbf16>, vector<144x72xbf16>, vector<192x72xf32> -> vector<192x72xf32>
    %c1_24 = arith.constant 1 : index
    %c0_25 = arith.constant 0 : index
    %c0_26 = arith.constant 0 : index
    %78 = vector.load %arg4[%c1_24, %c0_25, %c0_26] : memref<2x144x72xbf16, #tpu.memory_space<vmem>>, vector<1x144x72xbf16>
    %79 = vector.shape_cast %78 : vector<1x144x72xbf16> to vector<144x72xbf16>
    %cst_27 = arith.constant dense<0.000000e+00> : vector<192x72xf32>
    %80 = tpu.matmul %74, %79, %cst_27 {dimension_numbers = #tpu.dot_dimension_numbers<[1], [0], [0], [1], [0, 0, 1, 1], [], []>} : vector<192x144xbf16>, vector<144x72xbf16>, vector<192x72xf32> -> vector<192x72xf32>
    %81 = arith.maximumf %77, %80 : vector<192x72xf32>
    %82 = arith.truncf %81 : vector<192x72xf32> to vector<192x72xbf16>
    %83 = vector.extract_strided_slice %82 {offsets = [0, 0], sizes = [128, 72], strides = [1, 1]} : vector<192x72xbf16> to vector<128x72xbf16>
    %c0_28 = arith.constant 0 : index
    %c0_29 = arith.constant 0 : index
    %c0_30 = arith.constant 0 : index
    %84 = vector.load %arg3[%c0_28, %c0_29, %c0_30] : memref<5x72x128xbf16, #tpu.memory_space<vmem>>, vector<1x72x128xbf16>
    %85 = vector.shape_cast %84 : vector<1x72x128xbf16> to vector<72x128xbf16>
    %cst_31 = arith.constant dense<0.000000e+00> : vector<128x128xf32>
    %86 = tpu.matmul %83, %85, %cst_31 {dimension_numbers = #tpu.dot_dimension_numbers<[1], [0], [0], [1], [0, 0, 1, 1], [], []>} : vector<128x72xbf16>, vector<72x128xbf16>, vector<128x128xf32> -> vector<128x128xf32>
    %87 = vector.extract_strided_slice %82 {offsets = [16, 0], sizes = [128, 72], strides = [1, 1]} : vector<192x72xbf16> to vector<128x72xbf16>
    %c1_32 = arith.constant 1 : index
    %c0_33 = arith.constant 0 : index
    %c0_34 = arith.constant 0 : index
    %88 = vector.load %arg3[%c1_32, %c0_33, %c0_34] : memref<5x72x128xbf16, #tpu.memory_space<vmem>>, vector<1x72x128xbf16>
    %89 = vector.shape_cast %88 : vector<1x72x128xbf16> to vector<72x128xbf16>
    %cst_35 = arith.constant dense<0.000000e+00> : vector<128x128xf32>
    %90 = tpu.matmul %87, %89, %cst_35 {dimension_numbers = #tpu.dot_dimension_numbers<[1], [0], [0], [1], [0, 0, 1, 1], [], []>} : vector<128x72xbf16>, vector<72x128xbf16>, vector<128x128xf32> -> vector<128x128xf32>
    %91 = arith.addf %86, %90 : vector<128x128xf32>
    %92 = vector.extract_strided_slice %82 {offsets = [32, 0], sizes = [128, 72], strides = [1, 1]} : vector<192x72xbf16> to vector<128x72xbf16>
    %c2_36 = arith.constant 2 : index
    %c0_37 = arith.constant 0 : index
    %c0_38 = arith.constant 0 : index
    %93 = vector.load %arg3[%c2_36, %c0_37, %c0_38] : memref<5x72x128xbf16, #tpu.memory_space<vmem>>, vector<1x72x128xbf16>
    %94 = vector.shape_cast %93 : vector<1x72x128xbf16> to vector<72x128xbf16>
    %cst_39 = arith.constant dense<0.000000e+00> : vector<128x128xf32>
    %95 = tpu.matmul %92, %94, %cst_39 {dimension_numbers = #tpu.dot_dimension_numbers<[1], [0], [0], [1], [0, 0, 1, 1], [], []>} : vector<128x72xbf16>, vector<72x128xbf16>, vector<128x128xf32> -> vector<128x128xf32>
    %96 = arith.addf %91, %95 : vector<128x128xf32>
    %97 = vector.extract_strided_slice %82 {offsets = [48, 0], sizes = [128, 72], strides = [1, 1]} : vector<192x72xbf16> to vector<128x72xbf16>
    %c3_40 = arith.constant 3 : index
    %c0_41 = arith.constant 0 : index
    %c0_42 = arith.constant 0 : index
    %98 = vector.load %arg3[%c3_40, %c0_41, %c0_42] : memref<5x72x128xbf16, #tpu.memory_space<vmem>>, vector<1x72x128xbf16>
    %99 = vector.shape_cast %98 : vector<1x72x128xbf16> to vector<72x128xbf16>
    %cst_43 = arith.constant dense<0.000000e+00> : vector<128x128xf32>
    %100 = tpu.matmul %97, %99, %cst_43 {dimension_numbers = #tpu.dot_dimension_numbers<[1], [0], [0], [1], [0, 0, 1, 1], [], []>} : vector<128x72xbf16>, vector<72x128xbf16>, vector<128x128xf32> -> vector<128x128xf32>
    %101 = arith.addf %96, %100 : vector<128x128xf32>
    %102 = vector.extract_strided_slice %82 {offsets = [64, 0], sizes = [128, 72], strides = [1, 1]} : vector<192x72xbf16> to vector<128x72xbf16>
    %c4_44 = arith.constant 4 : index
    %c0_45 = arith.constant 0 : index
    %c0_46 = arith.constant 0 : index
    %103 = vector.load %arg3[%c4_44, %c0_45, %c0_46] : memref<5x72x128xbf16, #tpu.memory_space<vmem>>, vector<1x72x128xbf16>
    %104 = vector.shape_cast %103 : vector<1x72x128xbf16> to vector<72x128xbf16>
    %cst_47 = arith.constant dense<0.000000e+00> : vector<128x128xf32>
    %105 = tpu.matmul %102, %104, %cst_47 {dimension_numbers = #tpu.dot_dimension_numbers<[1], [0], [0], [1], [0, 0, 1, 1], [], []>} : vector<128x72xbf16>, vector<72x128xbf16>, vector<128x128xf32> -> vector<128x128xf32>
    %106 = arith.addf %101, %105 : vector<128x128xf32>
    %107 = vector.extract_strided_slice %2 {offsets = [1, 0], sizes = [1, 128], strides = [1, 1]} : vector<5x144xf32> to vector<1x128xf32>
    %108 = vector.broadcast %107 : vector<1x128xf32> to vector<128x128xf32>
    %109 = arith.addf %106, %108 : vector<128x128xf32>
    %cst_48 = arith.constant 0.000000e+00 : f32
    %110 = vector.broadcast %cst_48 : f32 to vector<128x128xf32>
    %111 = arith.maximumf %109, %110 : vector<128x128xf32>
    %112 = vector.extract_strided_slice %111 {offsets = [0, 0], sizes = [16, 128], strides = [1, 1]} : vector<128x128xf32> to vector<16x128xf32>
    %113 = vector.extract_strided_slice %111 {offsets = [16, 0], sizes = [16, 128], strides = [1, 1]} : vector<128x128xf32> to vector<16x128xf32>
    %114 = arith.maximumf %112, %113 : vector<16x128xf32>
    %115 = vector.extract_strided_slice %111 {offsets = [32, 0], sizes = [16, 128], strides = [1, 1]} : vector<128x128xf32> to vector<16x128xf32>
    %116 = vector.extract_strided_slice %111 {offsets = [48, 0], sizes = [16, 128], strides = [1, 1]} : vector<128x128xf32> to vector<16x128xf32>
    %117 = arith.maximumf %115, %116 : vector<16x128xf32>
    %118 = vector.extract_strided_slice %111 {offsets = [64, 0], sizes = [16, 128], strides = [1, 1]} : vector<128x128xf32> to vector<16x128xf32>
    %119 = vector.extract_strided_slice %111 {offsets = [80, 0], sizes = [16, 128], strides = [1, 1]} : vector<128x128xf32> to vector<16x128xf32>
    %120 = arith.maximumf %118, %119 : vector<16x128xf32>
    %121 = vector.extract_strided_slice %111 {offsets = [96, 0], sizes = [16, 128], strides = [1, 1]} : vector<128x128xf32> to vector<16x128xf32>
    %122 = vector.extract_strided_slice %111 {offsets = [112, 0], sizes = [16, 128], strides = [1, 1]} : vector<128x128xf32> to vector<16x128xf32>
    %123 = arith.maximumf %121, %122 : vector<16x128xf32>
    %124 = tpu.concatenate %114, %117, %120, %123 in 0 : vector<16x128xf32>, vector<16x128xf32>, vector<16x128xf32>, vector<16x128xf32> -> vector<64x128xf32>
    %125 = arith.truncf %124 : vector<64x128xf32> to vector<64x128xbf16>
    %c0_49 = arith.constant 0 : index
    %c0_50 = arith.constant 0 : index
    %c0_51 = arith.constant 0 : index
    %126 = vector.load %arg5[%c0_49, %c0_50, %c0_51] : memref<2x128x64xbf16, #tpu.memory_space<vmem>>, vector<1x128x64xbf16>
    %127 = vector.shape_cast %126 : vector<1x128x64xbf16> to vector<128x64xbf16>
    %cst_52 = arith.constant dense<0.000000e+00> : vector<64x64xf32>
    %128 = tpu.matmul %125, %127, %cst_52 {dimension_numbers = #tpu.dot_dimension_numbers<[1], [0], [0], [1], [0, 0, 1, 1], [], []>} : vector<64x128xbf16>, vector<128x64xbf16>, vector<64x64xf32> -> vector<64x64xf32>
    %c1_53 = arith.constant 1 : index
    %c0_54 = arith.constant 0 : index
    %c0_55 = arith.constant 0 : index
    %129 = vector.load %arg5[%c1_53, %c0_54, %c0_55] : memref<2x128x64xbf16, #tpu.memory_space<vmem>>, vector<1x128x64xbf16>
    %130 = vector.shape_cast %129 : vector<1x128x64xbf16> to vector<128x64xbf16>
    %cst_56 = arith.constant dense<0.000000e+00> : vector<64x64xf32>
    %131 = tpu.matmul %125, %130, %cst_56 {dimension_numbers = #tpu.dot_dimension_numbers<[1], [0], [0], [1], [0, 0, 1, 1], [], []>} : vector<64x128xbf16>, vector<128x64xbf16>, vector<64x64xf32> -> vector<64x64xf32>
    %132 = arith.maximumf %128, %131 : vector<64x64xf32>
    %133 = vector.extract_strided_slice %132 {offsets = [0, 0], sizes = [16, 64], strides = [1, 1]} : vector<64x64xf32> to vector<16x64xf32>
    %134 = arith.truncf %133 : vector<16x64xf32> to vector<16x64xbf16>
    %c0_57 = arith.constant 0 : index
    %c0_58 = arith.constant 0 : index
    %c0_59 = arith.constant 0 : index
    %135 = vector.load %arg6[%c0_57, %c0_58, %c0_59] : memref<4x64x128xbf16, #tpu.memory_space<vmem>>, vector<1x64x128xbf16>
    %136 = vector.shape_cast %135 : vector<1x64x128xbf16> to vector<64x128xbf16>
    %cst_60 = arith.constant dense<0.000000e+00> : vector<16x128xf32>
    %137 = tpu.matmul %134, %136, %cst_60 {dimension_numbers = #tpu.dot_dimension_numbers<[1], [0], [0], [1], [0, 0, 1, 1], [], []>} : vector<16x64xbf16>, vector<64x128xbf16>, vector<16x128xf32> -> vector<16x128xf32>
    %138 = vector.extract_strided_slice %132 {offsets = [16, 0], sizes = [16, 64], strides = [1, 1]} : vector<64x64xf32> to vector<16x64xf32>
    %139 = arith.truncf %138 : vector<16x64xf32> to vector<16x64xbf16>
    %c1_61 = arith.constant 1 : index
    %c0_62 = arith.constant 0 : index
    %c0_63 = arith.constant 0 : index
    %140 = vector.load %arg6[%c1_61, %c0_62, %c0_63] : memref<4x64x128xbf16, #tpu.memory_space<vmem>>, vector<1x64x128xbf16>
    %141 = vector.shape_cast %140 : vector<1x64x128xbf16> to vector<64x128xbf16>
    %cst_64 = arith.constant dense<0.000000e+00> : vector<16x128xf32>
    %142 = tpu.matmul %139, %141, %cst_64 {dimension_numbers = #tpu.dot_dimension_numbers<[1], [0], [0], [1], [0, 0, 1, 1], [], []>} : vector<16x64xbf16>, vector<64x128xbf16>, vector<16x128xf32> -> vector<16x128xf32>
    %143 = arith.addf %137, %142 : vector<16x128xf32>
    %144 = vector.extract_strided_slice %132 {offsets = [32, 0], sizes = [16, 64], strides = [1, 1]} : vector<64x64xf32> to vector<16x64xf32>
    %145 = arith.truncf %144 : vector<16x64xf32> to vector<16x64xbf16>
    %c2_65 = arith.constant 2 : index
    %c0_66 = arith.constant 0 : index
    %c0_67 = arith.constant 0 : index
    %146 = vector.load %arg6[%c2_65, %c0_66, %c0_67] : memref<4x64x128xbf16, #tpu.memory_space<vmem>>, vector<1x64x128xbf16>
    %147 = vector.shape_cast %146 : vector<1x64x128xbf16> to vector<64x128xbf16>
    %cst_68 = arith.constant dense<0.000000e+00> : vector<16x128xf32>
    %148 = tpu.matmul %145, %147, %cst_68 {dimension_numbers = #tpu.dot_dimension_numbers<[1], [0], [0], [1], [0, 0, 1, 1], [], []>} : vector<16x64xbf16>, vector<64x128xbf16>, vector<16x128xf32> -> vector<16x128xf32>
    %149 = arith.addf %143, %148 : vector<16x128xf32>
    %150 = vector.extract_strided_slice %132 {offsets = [48, 0], sizes = [16, 64], strides = [1, 1]} : vector<64x64xf32> to vector<16x64xf32>
    %151 = arith.truncf %150 : vector<16x64xf32> to vector<16x64xbf16>
    %c3_69 = arith.constant 3 : index
    %c0_70 = arith.constant 0 : index
    %c0_71 = arith.constant 0 : index
    %152 = vector.load %arg6[%c3_69, %c0_70, %c0_71] : memref<4x64x128xbf16, #tpu.memory_space<vmem>>, vector<1x64x128xbf16>
    %153 = vector.shape_cast %152 : vector<1x64x128xbf16> to vector<64x128xbf16>
    %cst_72 = arith.constant dense<0.000000e+00> : vector<16x128xf32>
    %154 = tpu.matmul %151, %153, %cst_72 {dimension_numbers = #tpu.dot_dimension_numbers<[1], [0], [0], [1], [0, 0, 1, 1], [], []>} : vector<16x64xbf16>, vector<64x128xbf16>, vector<16x128xf32> -> vector<16x128xf32>
    %155 = arith.addf %149, %154 : vector<16x128xf32>
    %156 = vector.extract_strided_slice %2 {offsets = [2, 0], sizes = [1, 128], strides = [1, 1]} : vector<5x144xf32> to vector<1x128xf32>
    %157 = vector.broadcast %156 : vector<1x128xf32> to vector<16x128xf32>
    %158 = arith.addf %155, %157 : vector<16x128xf32>
    %cst_73 = arith.constant 0.000000e+00 : f32
    %159 = vector.broadcast %cst_73 : f32 to vector<16x128xf32>
    %160 = arith.maximumf %158, %159 : vector<16x128xf32>
    %161 = arith.truncf %160 : vector<16x128xf32> to vector<16x128xbf16>
    %c0_74 = arith.constant 0 : index
    %c0_75 = arith.constant 0 : index
    %162 = vector.load %arg7[%c0_74, %c0_75] : memref<128x128xbf16, #tpu.memory_space<vmem>>, vector<128x128xbf16>
    %cst_76 = arith.constant dense<0.000000e+00> : vector<16x128xf32>
    %163 = tpu.matmul %161, %162, %cst_76 {dimension_numbers = #tpu.dot_dimension_numbers<[1], [0], [0], [1], [0, 0, 1, 1], [], []>} : vector<16x128xbf16>, vector<128x128xbf16>, vector<16x128xf32> -> vector<16x128xf32>
    %164 = vector.extract_strided_slice %2 {offsets = [3, 0], sizes = [1, 128], strides = [1, 1]} : vector<5x144xf32> to vector<1x128xf32>
    %165 = vector.broadcast %164 : vector<1x128xf32> to vector<16x128xf32>
    %166 = arith.addf %163, %165 : vector<16x128xf32>
    %cst_77 = arith.constant 0.000000e+00 : f32
    %167 = vector.broadcast %cst_77 : f32 to vector<16x128xf32>
    %168 = arith.maximumf %166, %167 : vector<16x128xf32>
    %169 = arith.truncf %168 : vector<16x128xf32> to vector<16x128xbf16>
    %c0_78 = arith.constant 0 : index
    %c0_79 = arith.constant 0 : index
    %170 = vector.load %arg8[%c0_78, %c0_79] : memref<128x128xbf16, #tpu.memory_space<vmem>>, vector<128x128xbf16>
    %cst_80 = arith.constant dense<0.000000e+00> : vector<16x128xf32>
    %171 = tpu.matmul %169, %170, %cst_80 {dimension_numbers = #tpu.dot_dimension_numbers<[1], [0], [0], [1], [0, 0, 1, 1], [], []>} : vector<16x128xbf16>, vector<128x128xbf16>, vector<16x128xf32> -> vector<16x128xf32>
    %172 = vector.extract_strided_slice %2 {offsets = [4, 0], sizes = [1, 128], strides = [1, 1]} : vector<5x144xf32> to vector<1x128xf32>
    %173 = vector.broadcast %172 : vector<1x128xf32> to vector<16x128xf32>
    %174 = arith.addf %171, %173 : vector<16x128xf32>
    %c0_81 = arith.constant 0 : index
    %c0_82 = arith.constant 0 : index
    %175 = vector.load %arg10[%c0_81, %c0_82] : memref<16x128xf32, #tpu.memory_space<vmem>>, vector<16x128xf32>
    tpu.vector_store %arg10[%c0_81, %c0_82], %174 {strides = array<i32>} : memref<16x128xf32, #tpu.memory_space<vmem>>, vector<16x128xf32>,
    return
  }
  func.func @transform_0(%arg0: i32) -> (i32, i32, i32) {
    %c0_i32 = arith.constant 0 : i32
    %c0_i32_0 = arith.constant 0 : i32
    %c0_i32_1 = arith.constant 0 : i32
    return %arg0, %c0_i32, %c0_i32_0 : i32, i32, i32
  }
  func.func @transform_1(%arg0: i32) -> (i32, i32, i32) {
    %c0_i32 = arith.constant 0 : i32
    %c0_i32_0 = arith.constant 0 : i32
    %c0_i32_1 = arith.constant 0 : i32
    %c0_i32_2 = arith.constant 0 : i32
    return %c0_i32, %c0_i32_0, %c0_i32_1 : i32, i32, i32
  }
  func.func @transform_2(%arg0: i32) -> (i32, i32, i32) {
    %c0_i32 = arith.constant 0 : i32
    %c0_i32_0 = arith.constant 0 : i32
    %c0_i32_1 = arith.constant 0 : i32
    %c0_i32_2 = arith.constant 0 : i32
    return %c0_i32, %c0_i32_0, %c0_i32_1 : i32, i32, i32
  }
  func.func @transform_3(%arg0: i32) -> (i32, i32, i32) {
    %c0_i32 = arith.constant 0 : i32
    %c0_i32_0 = arith.constant 0 : i32
    %c0_i32_1 = arith.constant 0 : i32
    %c0_i32_2 = arith.constant 0 : i32
    return %c0_i32, %c0_i32_0, %c0_i32_1 : i32, i32, i32
  }
  func.func @transform_4(%arg0: i32) -> (i32, i32, i32) {
    %c0_i32 = arith.constant 0 : i32
    %c0_i32_0 = arith.constant 0 : i32
    %c0_i32_1 = arith.constant 0 : i32
    %c0_i32_2 = arith.constant 0 : i32
    return %c0_i32, %c0_i32_0, %c0_i32_1 : i32, i32, i32
  }
  func.func @transform_5(%arg0: i32) -> (i32, i32, i32) {
    %c0_i32 = arith.constant 0 : i32
    %c0_i32_0 = arith.constant 0 : i32
    %c0_i32_1 = arith.constant 0 : i32
    %c0_i32_2 = arith.constant 0 : i32
    return %c0_i32, %c0_i32_0, %c0_i32_1 : i32, i32, i32
  }
  func.func @transform_6(%arg0: i32) -> (i32, i32) {
    %c0_i32 = arith.constant 0 : i32
    %c0_i32_0 = arith.constant 0 : i32
    %c0_i32_1 = arith.constant 0 : i32
    return %c0_i32, %c0_i32_0 : i32, i32
  }
  func.func @transform_7(%arg0: i32) -> (i32, i32) {
    %c0_i32 = arith.constant 0 : i32
    %c0_i32_0 = arith.constant 0 : i32
    %c0_i32_1 = arith.constant 0 : i32
    return %c0_i32, %c0_i32_0 : i32, i32
  }
  func.func @transform_8(%arg0: i32) -> (i32, i32) {
    %c0_i32 = arith.constant 0 : i32
    %c0_i32_0 = arith.constant 0 : i32
    %c0_i32_1 = arith.constant 0 : i32
    return %c0_i32, %c0_i32_0 : i32, i32
  }
  func.func @transform_9(%arg0: i32) -> (i32, i32) {
    %c0_i32 = arith.constant 0 : i32
    %c0_i32_0 = arith.constant 0 : i32
    return %arg0, %c0_i32 : i32, i32
  }
}

</mosaic_0001>

<bundles_post_ra>
// kernel: net_forward.1
= control target key start
LH: loop header
LB: loop body
LE: loop exit
PB: predicated region body
PF: predicated region fallthrough
CT: control target
= control target key end

     0   :  { %14 = vsyncpa [#allocation3], 0  ;;  %s5814_s30 = smov [#allocation2]   ;;  %s7577_s0 = inlined_call_operand.vmem [shape: f32[1,448,28], index: 0, kind: input, shape index: {}]   ;;  %s7578_s1 = inlined_call_operand.vmem [shape: bf16[5,28,144], index: 1, kind: input, shape index: {}]   ;;  %s7579_s2 = inlined_call_operand.vmem [shape: bf16[5,72,128], index: 2, kind: input, shape index: {}]   ;;  %s7580_s3 = inlined_call_operand.vmem [shape: bf16[2,144,72], index: 3, kind: input, shape index: {}]   ;;  %s7581_s4 = inlined_call_operand.vmem [shape: bf16[2,128,64], index: 4, kind: input, shape index: {}]   ;;  %s7582_s5 = inlined_call_operand.vmem [shape: bf16[4,64,128], index: 5, kind: input, shape index: {}]   ;;  %s7583_s6 = inlined_call_operand.vmem [shape: bf16[128,128], index: 6, kind: input, shape index: {}]   ;;  %s7584_s7 = inlined_call_operand.hbm [shape: bf16[128,128], index: 7, kind: input, shape index: {}]   ;;  %s7585_s8 = inlined_call_operand.vmem [shape: f32[5,144], index: 8, kind: input, shape index: {}]   ;;  %s7586_s9 = inlined_call_operand.vmem [shape: f32[16,128], index: 9, kind: output, shape index: {}]  }
   0x1   :  { %s34_s10 = sshll.u32 %s5814_s30, 4  ;;  %s5790_s13 = scalar_lea.hbm %s7584_s7, 1024  ;;  %s35_s10 = int_to_ptr.vmem [resolvable:$true] %s34_s10 }
   0x2   :  { %p5791_p0 = scmp.ne.s32.totalorder %s7584_s7, %s5790_s13  ;;  %p5794_p1 = scmp.lt.u32.totalorder %s5790_s13, %s7584_s7 }
   0x4   :  { %p5796_p2 = pnand %p5794_p1, %p5791_p0 }
   0x6   :  { %5799 = shalt.err (!%p5796_p2)
}
   0x7   :  { %s5800_s18 = scalar_lea.vmem %s35_s10, 1024  ;;  %p5805_p4 = scmp.lt.s32.totalorder %s35_s10, %s35_s10 }
   0x8   :  { %p5801_p3 = scmp.ne.s32.totalorder %s35_s10, %s5800_s18  ;;  %p5806_p5 = scmp.lt.s32.totalorder %s5800_s18, %s5800_s18 }
   0xa   :  { %p5807_p6 = por %p5806_p5, %p5805_p4 }
   0xc   :  { %p5808_p7 = pnand %p5807_p6, %p5801_p3 }
   0xe   :  { %5811 = shalt.err (!%p5808_p7)
}
   0xf   :  { %s5815_s19 = smov 64   ;;  %s5816_s20 = smov 4  }
  0x10   :  { %40 = dma.hbm_to_vmem [thread:$0]  %s7584_s7, 1024, %s35_s10, [#allocation3], %s5815_s19, %s5815_s19, %s5816_s20  }
  0x11   :  { %5812 = dma.done.wait [#allocation3], 1024  }
  0x12   :  { %5813 = vsyncadd [#allocation3], 4294966272  ;;  %v7587_v0 = vmov 0   ;;  %v5668_v1 = vld [vmem:[%s7578_s1 + $0x4] ss:$8 sps:$4 sm:$0xff]   ;;  %vm230_vm0 = vcmask 1045504  }
  0x13   :  { %569 = vmatprep.mubr.bf16.mxu0 %v7587_v0  ;;  %269 = vmatprep.mubr.bf16.mxu1 %v7587_v0  ;;  %v5670_v2 = vld [vmem:[%s7578_s1] ss:$8 sps:$4 sm:$0xff]   ;;  %v5671_v3 = vld [vmem:[%s7578_s1 + $0x14] ss:$8 sps:$4 sm:$0x3f]   ;;  %vm157_vm1 = vcmask 228352  }
  0x14   :  { %537 = vmatprep.subr.bf16.mxu0 %v5668_v1  ;;  %v5673_v4 = vld [vmem:[%s7578_s1 + $0x10] ss:$8 sps:$4 sm:$0x3f]   ;;  %v47_v5 = vld [vmem:[%s7577_s0] sm:$0xff]  ;;  %v48_v6 = vld [vmem:[%s7577_s0 + $0x8] sm:$0xff]  ;;  %vm2360_vm2 = vcmask 130048  }
  0x15   :  { %538 = vmatpush1.bf16.msra.mxu0 %v5670_v2  ;;  %v532_v7 = vsel %vm230_vm0, %v5673_v4, 0  ;;  %v5676_v8 = vld [vmem:[%s7578_s1 + $0x44] ss:$8 sps:$4 sm:$0xff]   ;;  %v105_v9 = vpack.c.bf16 %v48_v6, %v47_v5  ;;  %v5674_v10 = vld [vmem:[%s7578_s1 + $0x40] ss:$8 sps:$4 sm:$0xff]   ;;  %v49_v11 = vld [vmem:[%s7577_s0 + $0x10] sm:$0xff] }
  0x16   :  { %4439 = vmatprep.subr.msk.bf16.mxu0 %vm230_vm0, %v5671_v3  ;;  %v50_v12 = vld [vmem:[%s7577_s0 + $0x18] sm:$0xff]  ;;  %v51_v17 = vld [vmem:[%s7577_s0 + $0x20] sm:$0xff]  ;;  %v52_v18 = vld [vmem:[%s7577_s0 + $0x28] sm:$0xff]  ;;  %vm2835_vm3 = vcmask 1043456   ;;  %vm2810_vm4 = vcmask 588800   ;;  %vm5819_vm5 = vmmov 0  }
  0x17   :  { %v5677_v13 = vld [vmem:[%s7578_s1 + $0x54] ss:$8 sps:$4 sm:$0x3f]   ;;  %v5921_v14 = vpack.c.bf16 %v50_v12, %v49_v11  ;;  %v5679_v15 = vld [vmem:[%s7578_s1 + $0x50] ss:$8 sps:$4 sm:$0x3f]   ;;  %v5937_v19 = vpack.c.bf16 %v52_v18, %v51_v17 }
  0x18   :  { %v838_v16 = vsel %vm230_vm0, %v5679_v15, 0  ;;  %v53_v20 = vld [vmem:[%s7577_s0 + $0x30] sm:$0xff]  ;;  %v54_v21 = vld [vmem:[%s7577_s0 + $0x38] sm:$0xff]  ;;  %v55_v23 = vld [vmem:[%s7577_s0 + $0x40] sm:$0xff]  ;;  %vm3892_vm6 = vcmask 523264  }
  0x19   :  { %540 = vmatpush1.bf16.msra.mxu0 %v532_v7  ;;  %v5948_v22 = vpack.c.bf16 %v54_v21, %v53_v20  ;;  %v56_v24 = vld [vmem:[%s7577_s0 + $0x48] sm:$0xff]  ;;  %v57_v26 = vld [vmem:[%s7577_s0 + $0x50] sm:$0xff]  ;;  %v58_v27 = vld [vmem:[%s7577_s0 + $0x58] sm:$0xff] }
  0x1a   :  { %843 = vmatprep.subr.bf16.mxu0 %v5676_v8  ;;  %v5959_v25 = vpack.c.bf16 %v56_v24, %v55_v23  ;;  %v5970_v28 = vpack.c.bf16 %v58_v27, %v57_v26  ;;  %v59_v29 = vld [vmem:[%s7577_s0 + $0x60] sm:$0xff]  ;;  %v60_v30 = vld [vmem:[%s7577_s0 + $0x68] sm:$0xff]  ;;  %v61_v32 = vld [vmem:[%s7577_s0 + $0x70] sm:$0xff] }
  0x1b   :  { %v5981_v31 = vpack.c.bf16 %v60_v30, %v59_v29  ;;  %v62_v33 = vld [vmem:[%s7577_s0 + $0x78] sm:$0xff]  ;;  %v63_v35 = vld [vmem:[%s7577_s0 + $0x80] sm:$0xff]  ;;  %v64_v36 = vld [vmem:[%s7577_s0 + $0x88] sm:$0xff] }
  0x1c   :  { %4440 = vmatmul.mubr.msk.bf16.vlgmr.msra.gmra.mrb[0].mxu0 %vm157_vm1, %v105_v9  ;;  %v5992_v34 = vpack.c.bf16 %v62_v33, %v61_v32  ;;  %v6003_v37 = vpack.c.bf16 %v64_v36, %v63_v35  ;;  %v65_v38 = vld [vmem:[%s7577_s0 + $0x90] sm:$0xff]  ;;  %v66_v39 = vld [vmem:[%s7577_s0 + $0x98] sm:$0xff]  ;;  %v5682_v40 = vld [vmem:[%s7578_s1 + $0x64] ss:$8 sps:$4 sm:$0xff]  }
  0x1d   :  { %844 = vmatpush1.bf16.msra.mxu0 %v5674_v10  ;;  %579 = vmatprep.mubr.bf16.mxu0 %v7587_v0  ;;  %v6017_v41 = vpack.c.bf16 %v66_v39, %v65_v38  ;;  %v67_v42 = vld [vmem:[%s7577_s0 + $0xa0] sm:$0xff]  ;;  %v68_v43 = vld [vmem:[%s7577_s0 + $0xa8] sm:$0xff]  ;;  %v69_v45 = vld [vmem:[%s7577_s0 + $0xb0] sm:$0xff] }
  0x1e   :  { %4472 = vmatprep.subr.msk.bf16.mxu0 %vm230_vm0, %v5677_v13  ;;  %v6028_v44 = vpack.c.bf16 %v68_v43, %v67_v42  ;;  %v70_v46 = vld [vmem:[%s7577_s0 + $0xb8] sm:$0xff]  ;;  %v71_v48 = vld [vmem:[%s7577_s0 + $0xc0] sm:$0xff]  ;;  %v72_v49 = vld [vmem:[%s7577_s0 + $0xc8] sm:$0xff] }
  0x1f   :  { %v6039_v47 = vpack.c.bf16 %v70_v46, %v69_v45  ;;  %v6050_v50 = vpack.c.bf16 %v72_v49, %v71_v48  ;;  %v73_v51 = vld [vmem:[%s7577_s0 + $0xd0] sm:$0xff]  ;;  %v74_v52 = vld [vmem:[%s7577_s0 + $0xd8] sm:$0xff]  ;;  %v75_v54 = vld [vmem:[%s7577_s0 + $0xe0] sm:$0xff] }
  0x20   :  { %v6061_v53 = vpack.c.bf16 %v74_v52, %v73_v51  ;;  %v76_v55 = vld [vmem:[%s7577_s0 + $0xe8] sm:$0xff]  ;;  %v77_v57 = vld [vmem:[%s7577_s0 + $0xf0] sm:$0xff]  ;;  %v78_v58 = vld [vmem:[%s7577_s0 + $0xf8] sm:$0xff] }
  0x21   :  { %846 = vmatpush1.bf16.msra.mxu0 %v838_v16  ;;  %v6072_v56 = vpack.c.bf16 %v76_v55, %v75_v54  ;;  %v6083_v59 = vpack.c.bf16 %v78_v58, %v77_v57  ;;  %v79_v60 = vld [vmem:[%s7577_s0 + $0x100] sm:$0xff]  ;;  %v80_v61 = vld [vmem:[%s7577_s0 + $0x108] sm:$0xff]  ;;  %v81_v63 = vld [vmem:[%s7577_s0 + $0x110] sm:$0xff] }
  0x22   :  { %1245 = vmatprep.subr.bf16.mxu0 %v5682_v40  ;;  %v6094_v62 = vpack.c.bf16 %v80_v61, %v79_v60  ;;  %v82_v1 = vld [vmem:[%s7577_s0 + $0x118] sm:$0xff]  ;;  %v83_v3 = vld [vmem:[%s7577_s0 + $0x120] sm:$0xff]  ;;  %v84_v4 = vld [vmem:[%s7577_s0 + $0x128] sm:$0xff] }
  0x23   :  { %v6105_v2 = vpack.c.bf16 %v82_v1, %v81_v63  ;;  %v6116_v5 = vpack.c.bf16 %v84_v4, %v83_v3  ;;  %v85_v6 = vld [vmem:[%s7577_s0 + $0x130] sm:$0xff]  ;;  %v86_v7 = vld [vmem:[%s7577_s0 + $0x138] sm:$0xff]  ;;  %v87_v9 = vld [vmem:[%s7577_s0 + $0x140] sm:$0xff] }
  0x24   :  { %4441 = vmatmul.mubr.msk.bf16.gmra.mrb[4].mxu0 %vm157_vm1, %v5921_v14  ;;  %v6127_v8 = vpack.c.bf16 %v86_v7, %v85_v6  ;;  %v88_v10 = vld [vmem:[%s7577_s0 + $0x148] sm:$0xff]  ;;  %v89_v12 = vld [vmem:[%s7577_s0 + $0x150] sm:$0xff]  ;;  %v90_v13 = vld [vmem:[%s7577_s0 + $0x158] sm:$0xff] }
  0x25   :  { %589 = vmatprep.mubr.bf16.mxu0 %v7587_v0  ;;  %v6138_v11 = vpack.c.bf16 %v88_v10, %v87_v9  ;;  %v6149_v15 = vpack.c.bf16 %v90_v13, %v89_v12  ;;  %v91_v16 = vld [vmem:[%s7577_s0 + $0x160] sm:$0xff]  ;;  %v92_v17 = vld [vmem:[%s7577_s0 + $0x168] sm:$0xff]  ;;  %v93_v20 = vld [vmem:[%s7577_s0 + $0x170] sm:$0xff] }
  0x26   :  { %v6160_v18 = vpack.c.bf16 %v92_v17, %v91_v16  ;;  %v94_v21 = vld [vmem:[%s7577_s0 + $0x178] sm:$0xff]  ;;  %v5680_v24 = vld [vmem:[%s7578_s1 + $0x60] ss:$8 sps:$4 sm:$0xff]   ;;  %v5688_v30 = vld [vmem:[%s7578_s1 + $0x84] ss:$8 sps:$4 sm:$0xff]  }
  0x27   :  { %v6171_v23 = vpack.c.bf16 %v94_v21, %v93_v20  ;;  %v5683_v26 = vld [vmem:[%s7578_s1 + $0x74] ss:$8 sps:$4 sm:$0x3f]   ;;  %v5685_v27 = vld [vmem:[%s7578_s1 + $0x70] ss:$8 sps:$4 sm:$0x3f]  }
  0x28   :  { %v1240_v29 = vsel %vm230_vm0, %v5685_v27, 0  ;;  %v95_v32 = vld [vmem:[%s7577_s0 + $0x180] sm:$0xff]  ;;  %v96_v33 = vld [vmem:[%s7577_s0 + $0x188] sm:$0xff]  ;;  %v97_v36 = vld [vmem:[%s7577_s0 + $0x190] sm:$0xff] }
  0x29   :  { %v6262_v35 = vpack.c.bf16 %v96_v33, %v95_v32  ;;  %v98_v38 = vld [vmem:[%s7577_s0 + $0x198] sm:$0xff]  ;;  %v5686_v40 = vld [vmem:[%s7578_s1 + $0x80] ss:$8 sps:$4 sm:$0xff]   ;;  %v5692_v46 = vld [vmem:[%s7578_s1 + $0x24] ss:$8 sps:$4 sm:$0xff]  }
  0x2a   :  { %v6273_v39 = vpack.c.bf16 %v98_v38, %v97_v36  ;;  %v5689_v42 = vld [vmem:[%s7578_s1 + $0x94] ss:$8 sps:$4 sm:$0x3f]   ;;  %v5691_v43 = vld [vmem:[%s7578_s1 + $0x90] ss:$8 sps:$4 sm:$0x3f]   ;;  %237 = vmatprep.subr.bf16.mxu1 %v5692_v46 }
  0x2b   :  { %v1642_v45 = vsel %vm230_vm0, %v5691_v43, 0  ;;  %v5694_v48 = vld [vmem:[%s7578_s1 + $0x20] ss:$8 sps:$4 sm:$0xff]   ;;  %v5695_v49 = vld [vmem:[%s7578_s1 + $0x34] ss:$8 sps:$4 sm:$0x3f]  }
  0x2c   :  { %4442 = vmatmul.mubr.msk.bf16.gmra.mrb[8].mxu0 %vm157_vm1, %v5937_v19  ;;  %238 = vmatpush1.bf16.msra.mxu1 %v5694_v48  ;;  %v5697_v51 = vld [vmem:[%s7578_s1 + $0x30] ss:$8 sps:$4 sm:$0x3f]   ;;  %v5698_v54 = vld [vmem:[%s7580_s3] sm:$0xff]   ;;  %v5703_v55 = vld [vmem:[%s7580_s3 + $0x28] sm:$0xff]  }
  0x2d   :  { %599 = vmatprep.mubr.bf16.mxu0 %v7587_v0  ;;  %4410 = vmatprep.subr.msk.bf16.mxu1 %vm230_vm0, %v5695_v49  ;;  %v232_v52 = vsel %vm230_vm0, %v5697_v51, 0  ;;  %v5704_v58 = vld [vmem:[%s7580_s3 + $0x30] sm:$0xff]   ;;  %v5705_v61 = vld [vmem:[%s7580_s3 + $0x38] sm:$0xff]  }
  0x30   :  { %240 = vmatpush1.bf16.msra.mxu1 %v232_v52  ;;  %v102_v52 = vld [vmem:[%s7577_s0 + $0x1b8] sm:$0xff] }
  0x31   :  { %2397 = vmatprep.subr.bf16.mxu1 %v7587_v0 }
  0x33   :  { %4411 = vmatmul.mubr.msk.bf16.vlgmr.msra.gmra.mrb[0].mxu1 %vm157_vm1, %v5921_v14  ;;  %v99_v14 = vld [vmem:[%s7577_s0 + $0x1a0] sm:$0xff] }
  0x34   :  { %4443 = vmatmul.mubr.msk.bf16.gmra.mrb[12].mxu0 %vm157_vm1, %v5948_v22  ;;  %279 = vmatprep.mubr.bf16.mxu1 %v7587_v0 }
  0x35   :  { %609 = vmatprep.mubr.bf16.mxu0 %v7587_v0  ;;  %2398 = vmatpush1.bf16.msra.mxu1 %v5698_v54 }
  0x36   :  { %2399 = vmatprep.subr.bf16.mxu1 %v7587_v0 }
  0x3b   :  { %4412 = vmatmul.mubr.msk.bf16.gmra.mrb[4].mxu1 %vm157_vm1, %v5937_v19 }
  0x3c   :  { %4444 = vmatmul.mubr.msk.bf16.gmra.mrb[16].mxu0 %vm157_vm1, %v5959_v25  ;;  %289 = vmatprep.mubr.bf16.mxu1 %v7587_v0 }
  0x3d   :  { %619 = vmatprep.mubr.bf16.mxu0 %v7587_v0 }
  0x43   :  { %4413 = vmatmul.mubr.msk.bf16.gmra.mrb[8].mxu1 %vm157_vm1, %v5948_v22 }
  0x44   :  { %4445 = vmatmul.mubr.msk.bf16.gmra.mrb[20].mxu0 %vm157_vm1, %v5970_v28  ;;  %299 = vmatprep.mubr.bf16.mxu1 %v7587_v0 }
  0x45   :  { %629 = vmatprep.mubr.bf16.mxu0 %v7587_v0 }
  0x4b   :  { %4414 = vmatmul.mubr.msk.bf16.gmra.mrb[12].mxu1 %vm157_vm1, %v5959_v25 }
  0x4c   :  { %4446 = vmatmul.mubr.msk.bf16.gmra.mrb[24].mxu0 %vm157_vm1, %v5981_v31  ;;  %309 = vmatprep.mubr.bf16.mxu1 %v7587_v0 }
  0x4d   :  { %639 = vmatprep.mubr.bf16.mxu0 %v7587_v0 }
  0x53   :  { %4415 = vmatmul.mubr.msk.bf16.gmra.mrb[16].mxu1 %vm157_vm1, %v5970_v28 }
  0x54   :  { %4447 = vmatmul.mubr.msk.bf16.gmra.mrb[28].mxu0 %vm157_vm1, %v5992_v34  ;;  %319 = vmatprep.mubr.bf16.mxu1 %v7587_v0 }
  0x55   :  { %649 = vmatprep.mubr.bf16.mxu0 %v7587_v0 }
  0x5b   :  { %4416 = vmatmul.mubr.msk.bf16.gmra.mrb[20].mxu1 %vm157_vm1, %v5981_v31 }
  0x5c   :  { %4448 = vmatmul.mubr.msk.bf16.gmra.mrb[32].mxu0 %vm157_vm1, %v6003_v37  ;;  %329 = vmatprep.mubr.bf16.mxu1 %v7587_v0 }
  0x5d   :  { %659 = vmatprep.mubr.bf16.mxu0 %v7587_v0 }
  0x63   :  { %4417 = vmatmul.mubr.msk.bf16.gmra.mrb[24].mxu1 %vm157_vm1, %v5992_v34 }
  0x64   :  { %4449 = vmatmul.mubr.msk.bf16.gmra.mrb[36].mxu0 %vm157_vm1, %v6017_v41  ;;  %339 = vmatprep.mubr.bf16.mxu1 %v7587_v0 }
  0x65   :  { %669 = vmatprep.mubr.bf16.mxu0 %v7587_v0 }
  0x6b   :  { %4418 = vmatmul.mubr.msk.bf16.gmra.mrb[28].mxu1 %vm157_vm1, %v6003_v37 }
  0x6c   :  { %4450 = vmatmul.mubr.msk.bf16.gmra.mrb[40].mxu0 %vm157_vm1, %v6028_v44  ;;  %349 = vmatprep.mubr.bf16.mxu1 %v7587_v0 }
  0x6d   :  { %679 = vmatprep.mubr.bf16.mxu0 %v7587_v0 }
  0x73   :  { %4419 = vmatmul.mubr.msk.bf16.gmra.mrb[32].mxu1 %vm157_vm1, %v6017_v41 }
  0x74   :  { %4451 = vmatmul.mubr.msk.bf16.gmra.mrb[44].mxu0 %vm157_vm1, %v6039_v47  ;;  %359 = vmatprep.mubr.bf16.mxu1 %v7587_v0 }
  0x75   :  { %689 = vmatprep.mubr.bf16.mxu0 %v7587_v0 }
  0x7b   :  { %4420 = vmatmul.mubr.msk.bf16.gmra.mrb[36].mxu1 %vm157_vm1, %v6028_v44 }
  0x7c   :  { %4452 = vmatmul.mubr.msk.bf16.gmra.mrb[48].mxu0 %vm157_vm1, %v6050_v50  ;;  %369 = vmatprep.mubr.bf16.mxu1 %v7587_v0 }
  0x7d   :  { %699 = vmatprep.mubr.bf16.mxu0 %v7587_v0 }
  0x83   :  { %4421 = vmatmul.mubr.msk.bf16.gmra.mrb[40].mxu1 %vm157_vm1, %v6039_v47 }
  0x84   :  { %4453 = vmatmul.mubr.msk.bf16.gmra.mrb[52].mxu0 %vm157_vm1, %v6061_v53  ;;  %379 = vmatprep.mubr.bf16.mxu1 %v7587_v0 }
  0x85   :  { %709 = vmatprep.mubr.bf16.mxu0 %v7587_v0 }
  0x8b   :  { %4422 = vmatmul.mubr.msk.bf16.gmra.mrb[44].mxu1 %vm157_vm1, %v6050_v50 }
  0x8c   :  { %4454 = vmatmul.mubr.msk.bf16.gmra.mrb[56].mxu0 %vm157_vm1, %v6072_v56  ;;  %389 = vmatprep.mubr.bf16.mxu1 %v7587_v0 }
  0x8d   :  { %719 = vmatprep.mubr.bf16.mxu0 %v7587_v0 }
  0x93   :  { %4423 = vmatmul.mubr.msk.bf16.gmra.mrb[48].mxu1 %vm157_vm1, %v6061_v53 }
  0x94   :  { %4455 = vmatmul.mubr.msk.bf16.gmra.mrb[60].mxu0 %vm157_vm1, %v6083_v59  ;;  %399 = vmatprep.mubr.bf16.mxu1 %v7587_v0 }
  0x95   :  { %729 = vmatprep.mubr.bf16.mxu0 %v7587_v0 }
  0x9b   :  { %4424 = vmatmul.mubr.msk.bf16.gmra.mrb[52].mxu1 %vm157_vm1, %v6072_v56 }
  0x9c   :  { %4456 = vmatmul.mubr.msk.bf16.gmra.mrb[64].mxu0 %vm157_vm1, %v6094_v62  ;;  %409 = vmatprep.mubr.bf16.mxu1 %v7587_v0 }
  0x9d   :  { %739 = vmatprep.mubr.bf16.mxu0 %v7587_v0 }
  0xa3   :  { %4425 = vmatmul.mubr.msk.bf16.gmra.mrb[56].mxu1 %vm157_vm1, %v6083_v59 }
  0xa4   :  { %4457 = vmatmul.mubr.msk.bf16.gmra.mrb[68].mxu0 %vm157_vm1, %v6105_v2  ;;  %419 = vmatprep.mubr.bf16.mxu1 %v7587_v0 }
  0xa5   :  { %749 = vmatprep.mubr.bf16.mxu0 %v7587_v0 }
  0xab   :  { %4426 = vmatmul.mubr.msk.bf16.gmra.mrb[60].mxu1 %vm157_vm1, %v6094_v62 }
  0xac   :  { %4458 = vmatmul.mubr.msk.bf16.gmra.mrb[72].mxu0 %vm157_vm1, %v6116_v5  ;;  %429 = vmatprep.mubr.bf16.mxu1 %v7587_v0 }
  0xad   :  { %759 = vmatprep.mubr.bf16.mxu0 %v7587_v0 }
  0xb3   :  { %4427 = vmatmul.mubr.msk.bf16.gmra.mrb[64].mxu1 %vm157_vm1, %v6105_v2 }
  0xb4   :  { %4459 = vmatmul.mubr.msk.bf16.gmra.mrb[76].mxu0 %vm157_vm1, %v6127_v8  ;;  %439 = vmatprep.mubr.bf16.mxu1 %v7587_v0 }
  0xb5   :  { %769 = vmatprep.mubr.bf16.mxu0 %v7587_v0 }
  0xbb   :  { %4428 = vmatmul.mubr.msk.bf16.gmra.mrb[68].mxu1 %vm157_vm1, %v6116_v5 }
  0xbc   :  { %4460 = vmatmul.mubr.msk.bf16.gmra.mrb[80].mxu0 %vm157_vm1, %v6138_v11  ;;  %449 = vmatprep.mubr.bf16.mxu1 %v7587_v0 }
  0xbd   :  { %779 = vmatprep.mubr.bf16.mxu0 %v7587_v0 }
  0xc3   :  { %4429 = vmatmul.mubr.msk.bf16.gmra.mrb[72].mxu1 %vm157_vm1, %v6127_v8 }
  0xc4   :  { %4461 = vmatmul.mubr.msk.bf16.gmra.mrb[84].mxu0 %vm157_vm1, %v6149_v15  ;;  %459 = vmatprep.mubr.bf16.mxu1 %v7587_v0 }
  0xc5   :  { %789 = vmatprep.mubr.bf16.mxu0 %v7587_v0 }
  0xcb   :  { %4430 = vmatmul.mubr.msk.bf16.gmra.mrb[76].mxu1 %vm157_vm1, %v6138_v11 }
  0xcc   :  { %4462 = vmatmul.mubr.msk.bf16.gmra.mrb[88].mxu0 %vm157_vm1, %v6160_v18  ;;  %469 = vmatprep.mubr.bf16.mxu1 %v7587_v0 }
  0xcd   :  { %799 = vmatprep.mubr.bf16.mxu0 %v7587_v0 }
  0xd3   :  { %4431 = vmatmul.mubr.msk.bf16.gmra.mrb[80].mxu1 %vm157_vm1, %v6149_v15 }
  0xd4   :  { %4463 = vmatmul.mubr.msk.bf16.gmra.mrb[92].mxu0 %vm157_vm1, %v6171_v23  ;;  %479 = vmatprep.mubr.bf16.mxu1 %v7587_v0 }
  0xd5   :  { %875 = vmatprep.mubr.bf16.mxu0 %v7587_v0 }
  0xdb   :  { %4432 = vmatmul.mubr.msk.bf16.gmra.mrb[84].mxu1 %vm157_vm1, %v6160_v18 }
  0xdc   :  { %4473 = vmatmul.mubr.msk.bf16.vlgmr.msra.gmra.mrb[0].mxu0 %vm157_vm1, %v5937_v19  ;;  %v100_v19 = vld [vmem:[%s7577_s0 + $0x1a8] sm:$0xff]  ;;  %489 = vmatprep.mubr.bf16.mxu1 %v7587_v0 }
  0xdd   :  { %1246 = vmatpush1.bf16.msra.mxu0 %v5680_v24  ;;  %885 = vmatprep.mubr.bf16.mxu0 %v7587_v0 }
  0xde   :  { %4505 = vmatprep.subr.msk.bf16.mxu0 %vm230_vm0, %v5683_v26 }
  0xe1   :  { %1248 = vmatpush1.bf16.msra.mxu0 %v1240_v29 }
  0xe2   :  { %1647 = vmatprep.subr.bf16.mxu0 %v5688_v30 }
  0xe3   :  { %4433 = vmatmul.mubr.msk.bf16.gmra.mrb[88].mxu1 %vm157_vm1, %v6171_v23 }
  0xe4   :  { %4474 = vmatmul.mubr.msk.bf16.gmra.mrb[4].mxu0 %vm157_vm1, %v5948_v22  ;;  %499 = vmatprep.mubr.bf16.mxu1 %v7587_v0 }
  0xe5   :  { %895 = vmatprep.mubr.bf16.mxu0 %v7587_v0 }
  0xeb   :  { %4434 = vmatmul.mubr.msk.bf16.gmra.mrb[92].mxu1 %vm157_vm1, %v6262_v35 }
  0xec   :  { %4475 = vmatmul.mubr.msk.bf16.gmra.mrb[8].mxu0 %vm157_vm1, %v5959_v25 }
  0xed   :  { %905 = vmatprep.mubr.bf16.mxu0 %v7587_v0 }
  0xf4   :  { %4476 = vmatmul.mubr.msk.bf16.gmra.mrb[12].mxu0 %vm157_vm1, %v5970_v28 }
  0xf5   :  { %915 = vmatprep.mubr.bf16.mxu0 %v7587_v0 }
  0xfc   :  { %4477 = vmatmul.mubr.msk.bf16.gmra.mrb[16].mxu0 %vm157_vm1, %v5981_v31 }
  0xfd   :  { %925 = vmatprep.mubr.bf16.mxu0 %v7587_v0 }
 0x104   :  { %4478 = vmatmul.mubr.msk.bf16.gmra.mrb[20].mxu0 %vm157_vm1, %v5992_v34 }
 0x105   :  { %935 = vmatprep.mubr.bf16.mxu0 %v7587_v0 }
 0x10c   :  { %4479 = vmatmul.mubr.msk.bf16.gmra.mrb[24].mxu0 %vm157_vm1, %v6003_v37 }
 0x10d   :  { %945 = vmatprep.mubr.bf16.mxu0 %v7587_v0 }
 0x114   :  { %4480 = vmatmul.mubr.msk.bf16.gmra.mrb[28].mxu0 %vm157_vm1, %v6017_v41 }
 0x115   :  { %955 = vmatprep.mubr.bf16.mxu0 %v7587_v0 }
 0x11c   :  { %4481 = vmatmul.mubr.msk.bf16.gmra.mrb[32].mxu0 %vm157_vm1, %v6028_v44 }
 0x11d   :  { %965 = vmatprep.mubr.bf16.mxu0 %v7587_v0 }
 0x124   :  { %4482 = vmatmul.mubr.msk.bf16.gmra.mrb[36].mxu0 %vm157_vm1, %v6039_v47 }
 0x125   :  { %975 = vmatprep.mubr.bf16.mxu0 %v7587_v0 }
 0x12c   :  { %4483 = vmatmul.mubr.msk.bf16.gmra.mrb[40].mxu0 %vm157_vm1, %v6050_v50 }
 0x12d   :  { %985 = vmatprep.mubr.bf16.mxu0 %v7587_v0 }
 0x134   :  { %4484 = vmatmul.mubr.msk.bf16.gmra.mrb[44].mxu0 %vm157_vm1, %v6061_v53 }
 0x135   :  { %995 = vmatprep.mubr.bf16.mxu0 %v7587_v0 }
 0x13c   :  { %4485 = vmatmul.mubr.msk.bf16.gmra.mrb[48].mxu0 %vm157_vm1, %v6072_v56 }
 0x13d   :  { %1005 = vmatprep.mubr.bf16.mxu0 %v7587_v0 }
 0x144   :  { %4486 = vmatmul.mubr.msk.bf16.gmra.mrb[52].mxu0 %vm157_vm1, %v6083_v59 }
 0x145   :  { %1015 = vmatprep.mubr.bf16.mxu0 %v7587_v0 }
 0x14c   :  { %4487 = vmatmul.mubr.msk.bf16.gmra.mrb[56].mxu0 %vm157_vm1, %v6094_v62 }
 0x14d   :  { %1025 = vmatprep.mubr.bf16.mxu0 %v7587_v0 }
 0x154   :  { %4488 = vmatmul.mubr.msk.bf16.gmra.mrb[60].mxu0 %vm157_vm1, %v6105_v2 }
 0x155   :  { %1035 = vmatprep.mubr.bf16.mxu0 %v7587_v0 }
 0x15c   :  { %4489 = vmatmul.mubr.msk.bf16.gmra.mrb[64].mxu0 %vm157_vm1, %v6116_v5 }
 0x15d   :  { %1045 = vmatprep.mubr.bf16.mxu0 %v7587_v0 }
 0x164   :  { %4490 = vmatmul.mubr.msk.bf16.gmra.mrb[68].mxu0 %vm157_vm1, %v6127_v8 }
 0x165   :  { %1055 = vmatprep.mubr.bf16.mxu0 %v7587_v0 }
 0x16c   :  { %4491 = vmatmul.mubr.msk.bf16.gmra.mrb[72].mxu0 %vm157_vm1, %v6138_v11 }
 0x16d   :  { %1065 = vmatprep.mubr.bf16.mxu0 %v7587_v0 }
 0x174   :  { %4492 = vmatmul.mubr.msk.bf16.gmra.mrb[76].mxu0 %vm157_vm1, %v6149_v15 }
 0x175   :  { %1075 = vmatprep.mubr.bf16.mxu0 %v7587_v0 }
 0x17c   :  { %4493 = vmatmul.mubr.msk.bf16.gmra.mrb[80].mxu0 %vm157_vm1, %v6160_v18 }
 0x17d   :  { %1085 = vmatprep.mubr.bf16.mxu0 %v7587_v0 }
 0x184   :  { %4494 = vmatmul.mubr.msk.bf16.gmra.mrb[84].mxu0 %vm157_vm1, %v6171_v23 }
 0x185   :  { %1095 = vmatprep.mubr.bf16.mxu0 %v7587_v0 }
 0x18c   :  { %4495 = vmatmul.mubr.msk.bf16.gmra.mrb[88].mxu0 %vm157_vm1, %v6262_v35 }
 0x18d   :  { %1105 = vmatprep.mubr.bf16.mxu0 %v7587_v0 }
 0x194   :  { %4496 = vmatmul.mubr.msk.bf16.gmra.mrb[92].mxu0 %vm157_vm1, %v6273_v39 }
 0x195   :  { %1277 = vmatprep.mubr.bf16.mxu0 %v7587_v0 }
 0x19c   :  { %4506 = vmatmul.mubr.msk.bf16.vlgmr.msra.gmra.mrb[0].mxu0 %vm157_vm1, %v5948_v22  ;;  %v6424_v22 = vpack.c.bf16 %v100_v19, %v99_v14 }
 0x19d   :  { %1648 = vmatpush1.bf16.msra.mxu0 %v5686_v40  ;;  %1287 = vmatprep.mubr.bf16.mxu0 %v7587_v0 }
 0x19e   :  { %4538 = vmatprep.subr.msk.bf16.mxu0 %vm230_vm0, %v5689_v42 }
 0x1a1   :  { %1650 = vmatpush1.bf16.msra.mxu0 %v1642_v45 }
 0x1a4   :  { %4507 = vmatmul.mubr.msk.bf16.gmra.mrb[4].mxu0 %vm157_vm1, %v5959_v25 }
 0x1a5   :  { %1297 = vmatprep.mubr.bf16.mxu0 %v7587_v0 }
 0x1ac   :  { %4508 = vmatmul.mubr.msk.bf16.gmra.mrb[8].mxu0 %vm157_vm1, %v5970_v28 }
 0x1ad   :  { %1307 = vmatprep.mubr.bf16.mxu0 %v7587_v0 }
 0x1b4   :  { %4509 = vmatmul.mubr.msk.bf16.gmra.mrb[12].mxu0 %vm157_vm1, %v5981_v31 }
 0x1b5   :  { %1317 = vmatprep.mubr.bf16.mxu0 %v7587_v0 }
 0x1bc   :  { %4510 = vmatmul.mubr.msk.bf16.gmra.mrb[16].mxu0 %vm157_vm1, %v5992_v34 }
 0x1bd   :  { %1327 = vmatprep.mubr.bf16.mxu0 %v7587_v0 }
 0x1c4   :  { %4511 = vmatmul.mubr.msk.bf16.gmra.mrb[20].mxu0 %vm157_vm1, %v6003_v37 }
 0x1c5   :  { %1337 = vmatprep.mubr.bf16.mxu0 %v7587_v0 }
 0x1cc   :  { %4512 = vmatmul.mubr.msk.bf16.gmra.mrb[24].mxu0 %vm157_vm1, %v6017_v41 }
 0x1cd   :  { %1347 = vmatprep.mubr.bf16.mxu0 %v7587_v0 }
 0x1d4   :  { %4513 = vmatmul.mubr.msk.bf16.gmra.mrb[28].mxu0 %vm157_vm1, %v6028_v44 }
 0x1d5   :  { %1357 = vmatprep.mubr.bf16.mxu0 %v7587_v0 }
 0x1dc   :  { %4514 = vmatmul.mubr.msk.bf16.gmra.mrb[32].mxu0 %vm157_vm1, %v6039_v47 }
 0x1dd   :  { %1367 = vmatprep.mubr.bf16.mxu0 %v7587_v0 }
 0x1e4   :  { %4515 = vmatmul.mubr.msk.bf16.gmra.mrb[36].mxu0 %vm157_vm1, %v6050_v50 }
 0x1e5   :  { %1377 = vmatprep.mubr.bf16.mxu0 %v7587_v0 }
 0x1ec   :  { %4516 = vmatmul.mubr.msk.bf16.gmra.mrb[40].mxu0 %vm157_vm1, %v6061_v53 }
 0x1ed   :  { %1387 = vmatprep.mubr.bf16.mxu0 %v7587_v0 }
 0x1f4   :  { %4517 = vmatmul.mubr.msk.bf16.gmra.mrb[44].mxu0 %vm157_vm1, %v6072_v56 }
 0x1f5   :  { %1397 = vmatprep.mubr.bf16.mxu0 %v7587_v0 }
 0x1fc   :  { %4518 = vmatmul.mubr.msk.bf16.gmra.mrb[48].mxu0 %vm157_vm1, %v6083_v59 }
 0x1fd   :  { %1407 = vmatprep.mubr.bf16.mxu0 %v7587_v0 }
 0x204   :  { %4519 = vmatmul.mubr.msk.bf16.gmra.mrb[52].mxu0 %vm157_vm1, %v6094_v62 }
 0x205   :  { %1417 = vmatprep.mubr.bf16.mxu0 %v7587_v0 }
 0x20c   :  { %4520 = vmatmul.mubr.msk.bf16.gmra.mrb[56].mxu0 %vm157_vm1, %v6105_v2 }
 0x20d   :  { %1427 = vmatprep.mubr.bf16.mxu0 %v7587_v0 }
 0x214   :  { %4521 = vmatmul.mubr.msk.bf16.gmra.mrb[60].mxu0 %vm157_vm1, %v6116_v5 }
 0x215   :  { %1437 = vmatprep.mubr.bf16.mxu0 %v7587_v0 }
 0x21c   :  { %4522 = vmatmul.mubr.msk.bf16.gmra.mrb[64].mxu0 %vm157_vm1, %v6127_v8 }
 0x21d   :  { %1447 = vmatprep.mubr.bf16.mxu0 %v7587_v0 }
 0x224   :  { %4523 = vmatmul.mubr.msk.bf16.gmra.mrb[68].mxu0 %vm157_vm1, %v6138_v11 }
 0x225   :  { %1457 = vmatprep.mubr.bf16.mxu0 %v7587_v0 }
 0x22c   :  { %4524 = vmatmul.mubr.msk.bf16.gmra.mrb[72].mxu0 %vm157_vm1, %v6149_v15 }
 0x22d   :  { %1467 = vmatprep.mubr.bf16.mxu0 %v7587_v0 }
 0x234   :  { %4525 = vmatmul.mubr.msk.bf16.gmra.mrb[76].mxu0 %vm157_vm1, %v6160_v18 }
 0x235   :  { %1477 = vmatprep.mubr.bf16.mxu0 %v7587_v0 }
 0x23c   :  { %4526 = vmatmul.mubr.msk.bf16.gmra.mrb[80].mxu0 %vm157_vm1, %v6171_v23 }
 0x23d   :  { %1487 = vmatprep.mubr.bf16.mxu0 %v7587_v0 }
 0x244   :  { %4527 = vmatmul.mubr.msk.bf16.gmra.mrb[84].mxu0 %vm157_vm1, %v6262_v35 }
 0x245   :  { %1497 = vmatprep.mubr.bf16.mxu0 %v7587_v0 }
 0x24c   :  { %4528 = vmatmul.mubr.msk.bf16.gmra.mrb[88].mxu0 %vm157_vm1, %v6273_v39 }
 0x24d   :  { %1507 = vmatprep.mubr.bf16.mxu0 %v7587_v0 }
 0x254   :  { %4529 = vmatmul.mubr.msk.bf16.gmra.mrb[92].mxu0 %vm157_vm1, %v6424_v22 }
 0x255   :  { %1679 = vmatprep.mubr.bf16.mxu0 %v7587_v0 }
 0x25c   :  { %4539 = vmatmul.mubr.msk.bf16.vlgmr.msra.gmra.mrb[0].mxu0 %vm157_vm1, %v5959_v25  ;;  %v5699_v25 = vld [vmem:[%s7580_s3 + $0x8] sm:$0xff]  }
 0x25d   :  { %1689 = vmatprep.mubr.bf16.mxu0 %v7587_v0  ;;  %2400 = vmatpush1.bf16.msra.mxu1 %v5699_v25 }
 0x25e   :  { %2401 = vmatprep.subr.bf16.mxu1 %v7587_v0 }
 0x264   :  { %4540 = vmatmul.mubr.msk.bf16.gmra.mrb[4].mxu0 %vm157_vm1, %v5970_v28  ;;  %v5700_v28 = vld [vmem:[%s7580_s3 + $0x10] sm:$0xff]  }
 0x265   :  { %1699 = vmatprep.mubr.bf16.mxu0 %v7587_v0  ;;  %2402 = vmatpush1.bf16.msra.mxu1 %v5700_v28 }
 0x266   :  { %2403 = vmatprep.subr.bf16.mxu1 %v7587_v0 }
 0x26c   :  { %4541 = vmatmul.mubr.msk.bf16.gmra.mrb[8].mxu0 %vm157_vm1, %v5981_v31  ;;  %v5701_v31 = vld [vmem:[%s7580_s3 + $0x18] sm:$0xff]  }
 0x26d   :  { %1709 = vmatprep.mubr.bf16.mxu0 %v7587_v0  ;;  %2404 = vmatpush1.bf16.msra.mxu1 %v5701_v31 }
 0x26e   :  { %2405 = vmatprep.subr.bf16.mxu1 %v7587_v0 }
 0x274   :  { %4542 = vmatmul.mubr.msk.bf16.gmra.mrb[12].mxu0 %vm157_vm1, %v5992_v34  ;;  %v6503_v34 = vpop.f32.mrb[0].mxu1 }
 0x275   :  { %1719 = vmatprep.mubr.bf16.mxu0 %v7587_v0 }
 0x27c   :  { %4543 = vmatmul.mubr.msk.bf16.gmra.mrb[16].mxu0 %vm157_vm1, %v6003_v37  ;;  %v6506_v37 = vpop.f32.mrb[1].mxu1 }
 0x27d   :  { %1729 = vmatprep.mubr.bf16.mxu0 %v7587_v0 }
 0x284   :  { %4544 = vmatmul.mubr.msk.bf16.gmra.mrb[20].mxu0 %vm157_vm1, %v6017_v41  ;;  %v6508_v41 = vpop.f32.mrb[2].mxu1 }
 0x285   :  { %1739 = vmatprep.mubr.bf16.mxu0 %v7587_v0 }
 0x28c   :  { %4545 = vmatmul.mubr.msk.bf16.gmra.mrb[24].mxu0 %vm157_vm1, %v6028_v44  ;;  %v6510_v44 = vpop.f32.mrb[3].mxu1 }
 0x28d   :  { %1749 = vmatprep.mubr.bf16.mxu0 %v7587_v0 }
 0x294   :  { %4546 = vmatmul.mubr.msk.bf16.gmra.mrb[28].mxu0 %vm157_vm1, %v6039_v47  ;;  %v5702_v47 = vld [vmem:[%s7580_s3 + $0x20] sm:$0xff]  }
 0x295   :  { %1759 = vmatprep.mubr.bf16.mxu0 %v7587_v0  ;;  %2406 = vmatpush1.bf16.msra.mxu1 %v5702_v47 }
 0x296   :  { %2407 = vmatprep.subr.bf16.mxu1 %v7587_v0 }
 0x299   :  { %2408 = vmatpush1.bf16.msra.mxu1 %v5703_v55 }
 0x29a   :  { %2409 = vmatprep.subr.bf16.mxu1 %v7587_v0 }
 0x29c   :  { %4547 = vmatmul.mubr.msk.bf16.gmra.mrb[32].mxu0 %vm157_vm1, %v6050_v50  ;;  %v6517_v50 = vpop.f32.mrb[4].mxu1 }
 0x29d   :  { %1769 = vmatprep.mubr.bf16.mxu0 %v7587_v0  ;;  %2410 = vmatpush1.bf16.msra.mxu1 %v5704_v58 }
 0x29e   :  { %2411 = vmatprep.subr.bf16.mxu1 %v7587_v0 }
 0x2a1   :  { %2412 = vmatpush1.bf16.msra.mxu1 %v5705_v61 }
 0x2a2   :  { %2413 = vmatprep.subr.bf16.mxu1 %v7587_v0 }
 0x2a4   :  { %4548 = vmatmul.mubr.msk.bf16.gmra.mrb[36].mxu0 %vm157_vm1, %v6061_v53  ;;  %v6521_v53 = vpop.f32.mrb[5].mxu1 }
 0x2a5   :  { %1779 = vmatprep.mubr.bf16.mxu0 %v7587_v0 }
 0x2ac   :  { %4549 = vmatmul.mubr.msk.bf16.gmra.mrb[40].mxu0 %vm157_vm1, %v6072_v56  ;;  %v6526_v56 = vpop.f32.mrb[6].mxu1 }
 0x2ad   :  { %1789 = vmatprep.mubr.bf16.mxu0 %v7587_v0  ;;  %v6528_v57 = vpop.f32.mrb[7].mxu1 }
 0x2b4   :  { %4550 = vmatmul.mubr.msk.bf16.gmra.mrb[44].mxu0 %vm157_vm1, %v6083_v59  ;;  %v6536_v59 = vpop.f32.mrb[8].mxu1 }
 0x2b5   :  { %1799 = vmatprep.mubr.bf16.mxu0 %v7587_v0  ;;  %v6540_v60 = vpop.f32.mrb[9].mxu1 }
 0x2b6   :  { %v6545_v63 = vpop.f32.mrb[10].mxu1 }
 0x2b7   :  { %v6547_v1 = vpop.f32.mrb[11].mxu1 }
 0x2b8   :  { %v6555_v3 = vpop.f32.mrb[12].mxu1 }
 0x2b9   :  { %v6559_v4 = vpop.f32.mrb[13].mxu1 }
 0x2ba   :  { %v6561_v6 = vpop.f32.mrb[14].mxu1 }
 0x2bb   :  { %v6563_v7 = vpop.f32.mrb[15].mxu1 }
 0x2bc   :  { %4551 = vmatmul.mubr.msk.bf16.gmra.mrb[48].mxu0 %vm157_vm1, %v6094_v62  ;;  %v5706_v62 = vld [vmem:[%s7580_s3 + $0x40] sm:$0xff]   ;;  %v6567_v9 = vpop.f32.mrb[16].mxu1 }
 0x2bd   :  { %1809 = vmatprep.mubr.bf16.mxu0 %v7587_v0  ;;  %2414 = vmatpush1.bf16.msra.mxu1 %v5706_v62 }
 0x2be   :  { %2599 = vmatprep.subr.bf16.mxu1 %v7587_v0 }
 0x2c4   :  { %4552 = vmatmul.mubr.msk.bf16.gmra.mrb[52].mxu0 %vm157_vm1, %v6105_v2  ;;  %v6570_v2 = vpop.f32.mrb[17].mxu1 }
 0x2c5   :  { %1819 = vmatprep.mubr.bf16.mxu0 %v7587_v0  ;;  %v6572_v10 = vpop.f32.mrb[18].mxu1 }
 0x2c6   :  { %v6574_v12 = vpop.f32.mrb[19].mxu1 }
 0x2c7   :  { %v6578_v13 = vpop.f32.mrb[20].mxu1 }
 0x2c8   :  { %v6581_v16 = vpop.f32.mrb[21].mxu1 }
 0x2cc   :  { %4553 = vmatmul.mubr.msk.bf16.gmra.mrb[56].mxu0 %vm157_vm1, %v6116_v5  ;;  %v6583_v5 = vpop.f32.mrb[22].mxu1 }
 0x2cd   :  { %1829 = vmatprep.mubr.bf16.mxu0 %v7587_v0  ;;  %v6585_v17 = vpop.f32.mrb[23].mxu1 }
 0x2ce   :  { %v6589_v20 = vpop.f32.mrb[24].mxu1 }
 0x2cf   :  { %v6592_v21 = vpop.f32.mrb[25].mxu1 }
 0x2d4   :  { %4554 = vmatmul.mubr.msk.bf16.gmra.mrb[60].mxu0 %vm157_vm1, %v6127_v8  ;;  %v6594_v8 = vpop.f32.mrb[26].mxu1 }
 0x2d5   :  { %1839 = vmatprep.mubr.bf16.mxu0 %v7587_v0  ;;  %v6596_v24 = vpop.f32.mrb[27].mxu1 }
 0x2d6   :  { %v6600_v26 = vpop.f32.mrb[28].mxu1 }
 0x2d7   :  { %v6603_v27 = vpop.f32.mrb[29].mxu1 }
 0x2dc   :  { %4555 = vmatmul.mubr.msk.bf16.gmra.mrb[64].mxu0 %vm157_vm1, %v6138_v11  ;;  %v6605_v11 = vpop.f32.mrb[30].mxu1 }
 0x2dd   :  { %1849 = vmatprep.mubr.bf16.mxu0 %v7587_v0  ;;  %v6607_v29 = vpop.f32.mrb[31].mxu1 }
 0x2de   :  { %v6611_v30 = vpop.f32.mrb[32].mxu1 }
 0x2df   :  { %v6614_v32 = vpop.f32.mrb[33].mxu1 }
 0x2e4   :  { %4556 = vmatmul.mubr.msk.bf16.gmra.mrb[68].mxu0 %vm157_vm1, %v6149_v15  ;;  %v6616_v15 = vpop.f32.mrb[34].mxu1 }
 0x2e5   :  { %1859 = vmatprep.mubr.bf16.mxu0 %v7587_v0  ;;  %v6618_v33 = vpop.f32.mrb[35].mxu1 }
 0x2e6   :  { %v6622_v36 = vpop.f32.mrb[36].mxu1 }
 0x2e7   :  { %v6625_v38 = vpop.f32.mrb[37].mxu1 }
 0x2ec   :  { %4557 = vmatmul.mubr.msk.bf16.gmra.mrb[72].mxu0 %vm157_vm1, %v6160_v18  ;;  %v6627_v18 = vpop.f32.mrb[38].mxu1 }
 0x2ed   :  { %1869 = vmatprep.mubr.bf16.mxu0 %v7587_v0  ;;  %v6629_v40 = vpop.f32.mrb[39].mxu1 }
 0x2ee   :  { %v6633_v42 = vpop.f32.mrb[40].mxu1 }
 0x2ef   :  { %v6636_v43 = vpop.f32.mrb[41].mxu1 }
 0x2f4   :  { %4558 = vmatmul.mubr.msk.bf16.gmra.mrb[76].mxu0 %vm157_vm1, %v6171_v23  ;;  %v6638_v23 = vpop.f32.mrb[42].mxu1 }
 0x2f5   :  { %1879 = vmatprep.mubr.bf16.mxu0 %v7587_v0  ;;  %v6640_v45 = vpop.f32.mrb[43].mxu1 }
 0x2f6   :  { %v6644_v46 = vpop.f32.mrb[44].mxu1 }
 0x2f7   :  { %v6647_v48 = vpop.f32.mrb[45].mxu1 }
 0x2fc   :  { %4559 = vmatmul.mubr.msk.bf16.gmra.mrb[80].mxu0 %vm157_vm1, %v6262_v35  ;;  %v6649_v35 = vpop.f32.mrb[46].mxu1 }
 0x2fd   :  { %1889 = vmatprep.mubr.bf16.mxu0 %v7587_v0  ;;  %7597 = vst [vmem:[#allocation5_spill] sm:$0xff] %v6649_v35  ;;  %v6651_v49 = vpop.f32.mrb[47].mxu1 }
 0x2fe   :  { %7598 = vst [vmem:[#allocation6_spill] sm:$0xff] %v6651_v49  ;;  %v6655_v51 = vpop.f32.mrb[48].mxu1 }
 0x2ff   :  { %7599 = vst [vmem:[#allocation7_spill] sm:$0xff] %v6655_v51  ;;  %v6664_v14 = vpop.f32.mrb[49].mxu1 }
 0x300   :  { %7600 = vst [vmem:[#allocation8_spill] sm:$0xff] %v6664_v14  ;;  %v6666_v19 = vpop.f32.mrb[50].mxu1 }
 0x301   :  { %7601 = vst [vmem:[#allocation9_spill] sm:$0xff] %v6666_v19  ;;  %v6668_v54 = vpop.f32.mrb[51].mxu1 }
 0x302   :  { %7602 = vst [vmem:[#allocation10_spill] sm:$0xff] %v6668_v54 }
 0x304   :  { %4560 = vmatmul.mubr.msk.bf16.gmra.mrb[84].mxu0 %vm157_vm1, %v6273_v39  ;;  %v101_v39 = vld [vmem:[%s7577_s0 + $0x1b0] sm:$0xff] }
 0x305   :  { %1899 = vmatprep.mubr.bf16.mxu0 %v7587_v0  ;;  %v1614_v25 = vpack.c.bf16 %v102_v52, %v101_v39 }
 0x30c   :  { %4561 = vmatmul.mubr.msk.bf16.gmra.mrb[88].mxu0 %vm157_vm1, %v6424_v22  ;;  %v6671_v22 = vpop.f32.mrb[52].mxu1 }
 0x30d   :  { %1909 = vmatprep.mubr.bf16.mxu0 %v7587_v0  ;;  %7603 = vst [vmem:[#allocation11_spill] sm:$0xff] %v6671_v22  ;;  %v6673_v28 = vpop.f32.mrb[53].mxu1 }
 0x30e   :  { %7604 = vst [vmem:[#allocation12_spill] sm:$0xff] %v6673_v28  ;;  %v6675_v31 = vpop.f32.mrb[54].mxu1  ;;  %v2016_v28 = vlaneseq }
 0x30f   :  { %7605 = vst [vmem:[#allocation13_spill] sm:$0xff] %v6675_v31  ;;  %v6677_v47 = vpop.f32.mrb[55].mxu1 }
 0x310   :  { %7606 = vst [vmem:[#allocation14_spill] sm:$0xff] %v6677_v47  ;;  %v6679_v55 = vpop.f32.mrb[56].mxu1  ;;  %v6695_v31 = vshrl.u32 %v2016_v28, 7 }
 0x311   :  { %7607 = vst [vmem:[#allocation15_spill] sm:$0xff] %v6679_v55  ;;  %v6681_v58 = vpop.f32.mrb[57].mxu1 }
 0x312   :  { %7608 = vst [vmem:[#allocation16_spill] sm:$0xff] %v6681_v58  ;;  %v6683_v61 = vpop.f32.mrb[58].mxu1  ;;  %7615 = vst [vmem:[#allocation23_spill] sm:$0xff] %v6695_v31 }
 0x313   :  { %7609 = vst [vmem:[#allocation17_spill] sm:$0xff] %v6683_v61  ;;  %v6685_v62 = vpop.f32.mrb[59].mxu1 }
 0x314   :  { %4562 = vmatmul.mubr.msk.bf16.gmra.mrb[92].mxu0 %vm157_vm1, %v1614_v25  ;;  %7610 = vst [vmem:[#allocation18_spill] sm:$0xff] %v6685_v62  ;;  %v6687_v0 = vpop.f32.mrb[60].mxu1 }
 0x315   :  { %7611 = vst [vmem:[#allocation19_spill] sm:$0xff] %v6687_v0  ;;  %v6689_v39 = vpop.f32.mrb[61].mxu1 }
 0x316   :  { %7612 = vst [vmem:[#allocation20_spill] sm:$0xff] %v6689_v39  ;;  %v6691_v52 = vpop.f32.mrb[62].mxu1  ;;  %v2018_v39 = vsub.s32 0, %v6695_v31 }
 0x317   :  { %7613 = vst [vmem:[#allocation21_spill] sm:$0xff] %v6691_v52  ;;  %v6693_v25 = vpop.f32.mrb[63].mxu1 }
 0x318   :  { %7614 = vst [vmem:[#allocation22_spill] sm:$0xff] %v6693_v25  ;;  %v6697_v47 = vpop.f32.mrb[64].mxu1  ;;  %v103_v25 = vld [vmem:[%s7585_s8] sm:$0x1f] }
 0x319   :  { %7616 = vst [vmem:[#allocation24_spill] sm:$0xff] %v6697_v47  ;;  %v6699_v55 = vpop.f32.mrb[65].mxu1 }
 0x31a   :  { %7617 = vst [vmem:[#allocation25_spill] sm:$0xff] %v6699_v55  ;;  %v6701_v58 = vpop.f32.mrb[66].mxu1  ;;  %v104_v55 = vld [vmem:[%s7585_s8 + $0x8] sm:$0x1f] }
 0x31b   :  { %7618 = vst [vmem:[#allocation26_spill] sm:$0xff] %v6701_v58  ;;  %v6703_v22 = vpop.f32.mrb[67].mxu1  ;;  %v6720_v31 = vrot.slane %v104_v55, %v2018_v39 }
 0x31c   :  { %7619 = vst [vmem:[#allocation27_spill] sm:$0xff] %v6703_v22 }
 0x32f   :  { %v1681_v61 = vpop.f32.mrb[0].mxu0 }
 0x330   :  { %v5209_v0 = vadd.f32 %v1681_v61, %v6503_v34  ;;  %v1683_v62 = vpop.f32.mrb[1].mxu0  ;;  %v6716_v34 = vrot.slane %v103_v25, %v2018_v39  ;;  %v6718_v61 = vpop.f32.mrb[68].mxu1 }
 0x331   :  { %v5210_v28 = vadd.f32 %v1683_v62, %v6506_v37  ;;  %v1685_v52 = vpop.f32.mrb[2].mxu0  ;;  %7620 = vst [vmem:[#allocation28_spill] sm:$0xff] %v6718_v61  ;;  %v6722_v54 = vpop.f32.mrb[69].mxu1 }
 0x332   :  { %v5211_v58 = vadd.f32 %v1685_v52, %v6508_v41  ;;  %v1687_v47 = vpop.f32.mrb[3].mxu0  ;;  %7621 = vst [vmem:[#allocation29_spill] sm:$0xff] %v6722_v54  ;;  %v6724_v19 = vpop.f32.mrb[70].mxu1  ;;  %v2024_v14 = vadd.f32 %v5209_v0, %v6716_v34 }
 0x333   :  { %v5212_v22 = vadd.f32 %v1687_v47, %v6510_v44  ;;  %7622 = vst [vmem:[#allocation30_spill] sm:$0xff] %v6724_v19  ;;  %v6726_v62 = vpop.f32.mrb[71].mxu1  ;;  %v2025_v44 = vadd.f32 %v5210_v28, %v6720_v31 }
 0x334   :  { %7623 = vst [vmem:[#allocation31_spill] sm:$0xff] %v6726_v62  ;;  %v2026_v55 = vadd.f32 %v5211_v58, %v6716_v34  ;;  %v6739_v51 = vpop.f32.mrb[72].mxu1 }
 0x335   :  { %v2027_v61 = vadd.f32 %v5212_v22, %v6720_v31  ;;  %7624 = vst [vmem:[#allocation32_spill] sm:$0xff] %v6739_v51 }
 0x337   :  { %v1691_v37 = vpop.f32.mrb[4].mxu0 }
 0x338   :  { %v5213_v41 = vadd.f32 %v1691_v37, %v6517_v50  ;;  %v1693_v52 = vpop.f32.mrb[5].mxu0  ;;  %v2120_v50 = vmax.f32 %v2024_v14, 0.0 }
 0x339   :  { %v5214_v47 = vadd.f32 %v1693_v52, %v6521_v53  ;;  %v1695_v25 = vpop.f32.mrb[6].mxu0  ;;  %v2121_v53 = vmax.f32 %v2025_v44, 0.0 }
 0x33a   :  { %v2028_v39 = vadd.f32 %v5213_v41, %v6716_v34  ;;  %v5215_v54 = vadd.f32 %v1695_v25, %v6526_v56  ;;  %v1697_v19 = vpop.f32.mrb[7].mxu0  ;;  %v6742_v41 = vpop.f32.mrb[73].mxu1  ;;  %v2122_v56 = vmax.f32 %v2026_v55, 0.0 }
 0x33b   :  { %v2029_v62 = vadd.f32 %v5214_v47, %v6720_v31  ;;  %v5216_v0 = vadd.f32 %v1697_v19, %v6528_v57  ;;  %7625 = vst [vmem:[#allocation33_spill] sm:$0xff] %v6742_v41  ;;  %v6744_v22 = vpop.f32.mrb[74].mxu1  ;;  %v2123_v47 = vmax.f32 %v2027_v61, 0.0 }
 0x33c   :  { %v2124_v37 = vmax.f32 %v2028_v39, 0.0  ;;  %v2030_v28 = vadd.f32 %v5215_v54, %v6716_v34  ;;  %v6746_v19 = vpop.f32.mrb[75].mxu1 }
 0x33d   :  { %v2125_v52 = vmax.f32 %v2029_v62, 0.0  ;;  %v2031_v58 = vadd.f32 %v5216_v0, %v6720_v31 }
 0x33e   :  { %v2216_v25 = vmax.f32 %v2120_v50, %v2124_v37  ;;  %v2126_v49 = vmax.f32 %v2030_v28, 0.0 }
 0x33f   :  { %v2217_v35 = vmax.f32 %v2121_v53, %v2125_v52  ;;  %v2127_v57 = vmax.f32 %v2031_v58, 0.0  ;;  %v1701_v14 = vpop.f32.mrb[8].mxu0  ;;  %v7628_v58 = vmov 0  }
 0x340   :  { %v2218_v54 = vmax.f32 %v2122_v56, %v2126_v49  ;;  %v5217_v39 = vadd.f32 %v1701_v14, %v6536_v59  ;;  %v1703_v44 = vpop.f32.mrb[9].mxu0  ;;  %v5707_v49 = vld [vmem:[%s7580_s3 + $0x48] sm:$0xff]   ;;  %v6759_v59 = vpop.f32.mrb[76].mxu1 }
 0x341   :  { %v2219_v62 = vmax.f32 %v2123_v47, %v2127_v57  ;;  %v5218_v0 = vadd.f32 %v1703_v44, %v6540_v60  ;;  %v1705_v51 = vpop.f32.mrb[10].mxu0  ;;  %v6763_v60 = vpop.f32.mrb[77].mxu1 }
 0x342   :  { %v6750_v41 = vpack.c.bf16 %v2218_v54, %v2216_v25  ;;  %v5219_v55 = vadd.f32 %v1705_v51, %v6545_v63  ;;  %v1707_v50 = vpop.f32.mrb[11].mxu0  ;;  %v6766_v63 = vpop.f32.mrb[78].mxu1  ;;  %v2032_v28 = vadd.f32 %v5217_v39, %v6716_v34 }
 0x343   :  { %v6753_v61 = vpack.c.bf16 %v2219_v62, %v2217_v35  ;;  %v5220_v37 = vadd.f32 %v1707_v50, %v6547_v1  ;;  %v5708_v1 = vld [vmem:[%s7580_s3 + $0x50] sm:$0xff]   ;;  %v6771_v35 = vpop.f32.mrb[79].mxu1  ;;  %v2033_v56 = vadd.f32 %v5218_v0, %v6720_v31  ;;  %v5709_v0 = vld [vmem:[%s7580_s3 + $0x58] sm:$0xff]  }
 0x344   :  { %7626 = vst [vmem:[#allocation34_spill] sm:$0xff] %v6750_v41  ;;  %v2034_v57 = vadd.f32 %v5219_v55, %v6716_v34 }
 0x345   :  { %7627 = vst [vmem:[#allocation35_spill] sm:$0xff] %v6753_v61  ;;  %4572 = vmatprep.mubr.msk.bf16.mxu1 %vm2360_vm2, %v6753_v61  ;;  %v2035_v62 = vadd.f32 %v5220_v37, %v6720_v31 }
 0x346   :  { %2430 = vmatmul.mubr.bf16.vlgmr.msra.gmra.mrb[96].mxu1 %v6750_v41 }
 0x347   :  { %v1711_v51 = vpop.f32.mrb[12].mxu0  ;;  %2600 = vmatpush1.bf16.msra.mxu1 %v5707_v49  ;;  %v6789_v49 = vpop.f32.mrb[80].mxu1 }
 0x348   :  { %v5221_v53 = vadd.f32 %v1711_v51, %v6555_v3  ;;  %v1713_v52 = vpop.f32.mrb[13].mxu0  ;;  %2601 = vmatprep.subr.bf16.mxu1 %v7628_v58 }
 0x349   :  { %v5222_v25 = vadd.f32 %v1713_v52, %v6559_v4  ;;  %v1715_v47 = vpop.f32.mrb[14].mxu0  ;;  %v2128_v4 = vmax.f32 %v2032_v28, 0.0 }
 0x34a   :  { %v2036_v14 = vadd.f32 %v5221_v53, %v6716_v34  ;;  %v5223_v54 = vadd.f32 %v1715_v47, %v6561_v6  ;;  %v1717_v44 = vpop.f32.mrb[15].mxu0  ;;  %v2129_v6 = vmax.f32 %v2033_v56, 0.0  ;;  %v6792_v53 = vpop.f32.mrb[81].mxu1  ;;  %v2131_v47 = vmax.f32 %v2035_v62, 0.0 }
 0x34b   :  { %v2037_v39 = vadd.f32 %v5222_v25, %v6720_v31  ;;  %v5224_v3 = vadd.f32 %v1717_v44, %v6563_v7  ;;  %2602 = vmatpush1.bf16.msra.mxu1 %v5708_v1  ;;  %v2130_v7 = vmax.f32 %v2034_v57, 0.0  ;;  %v6794_v25 = vpop.f32.mrb[82].mxu1 }
 0x34c   :  { %v2132_v50 = vmax.f32 %v2036_v14, 0.0  ;;  %v2038_v55 = vadd.f32 %v5223_v54, %v6716_v34  ;;  %2603 = vmatprep.subr.bf16.mxu1 %v7628_v58  ;;  %v5710_v54 = vld [vmem:[%s7580_s3 + $0x60] sm:$0xff]   ;;  %v6799_v56 = vpop.f32.mrb[83].mxu1 }
 0x34d   :  { %v2133_v51 = vmax.f32 %v2037_v39, 0.0  ;;  %v2039_v37 = vadd.f32 %v5224_v3, %v6720_v31 }
 0x34e   :  { %v2220_v1 = vmax.f32 %v2128_v4, %v2132_v50  ;;  %v2134_v52 = vmax.f32 %v2038_v55, 0.0 }
 0x34f   :  { %v2221_v28 = vmax.f32 %v2129_v6, %v2133_v51  ;;  %v2135_v14 = vmax.f32 %v2039_v37, 0.0  ;;  %v1721_v44 = vpop.f32.mrb[16].mxu0  ;;  %2604 = vmatpush1.bf16.msra.mxu1 %v5709_v0  ;;  %v6814_v37 = vpop.f32.mrb[84].mxu1 }
 0x350   :  { %v2222_v39 = vmax.f32 %v2130_v7, %v2134_v52  ;;  %v5225_v3 = vadd.f32 %v1721_v44, %v6567_v9  ;;  %v1723_v41 = vpop.f32.mrb[17].mxu0  ;;  %2605 = vmatprep.subr.bf16.mxu1 %v7628_v58  ;;  %v5711_v9 = vld [vmem:[%s7580_s3 + $0x68] sm:$0xff]  }
 0x351   :  { %v2223_v57 = vmax.f32 %v2131_v47, %v2135_v14  ;;  %v5226_v4 = vadd.f32 %v1723_v41, %v6570_v2  ;;  %v1725_v62 = vpop.f32.mrb[18].mxu0  ;;  %v6818_v2 = vpop.f32.mrb[85].mxu1 }
 0x352   :  { %v5227_v50 = vadd.f32 %v1725_v62, %v6572_v10  ;;  %v1727_v55 = vpop.f32.mrb[19].mxu0  ;;  %v6805_v0 = vpack.c.bf16 %v2222_v39, %v2220_v1  ;;  %v6821_v10 = vpop.f32.mrb[86].mxu1  ;;  %v2040_v1 = vadd.f32 %v5225_v3, %v6716_v34 }
 0x353   :  { %v6807_v6 = vpack.c.bf16 %v2223_v57, %v2221_v28  ;;  %v5228_v51 = vadd.f32 %v1727_v55, %v6574_v12  ;;  %2606 = vmatpush1.bf16.msra.mxu1 %v5710_v54  ;;  %v5712_v12 = vld [vmem:[%s7580_s3 + $0x70] sm:$0xff]   ;;  %v6826_v7 = vpop.f32.mrb[87].mxu1  ;;  %v2041_v28 = vadd.f32 %v5226_v4, %v6720_v31 }
 0x354   :  { %7629 = vst [vmem:[#allocation36_spill] sm:$0xff] %v6805_v0  ;;  %2607 = vmatprep.subr.bf16.mxu1 %v7628_v58  ;;  %v2042_v54 = vadd.f32 %v5227_v50, %v6716_v34 }
 0x355   :  { %7630 = vst [vmem:[#allocation37_spill] sm:$0xff] %v6807_v6  ;;  %4573 = vmatprep.mubr.msk.bf16.mxu1 %vm2360_vm2, %v6807_v6  ;;  %v2043_v55 = vadd.f32 %v5228_v51, %v6720_v31  ;;  %v2137_v50 = vmax.f32 %v2041_v28, 0.0 }
 0x356   :  { %2438 = vmatmul.mubr.bf16.gmra.mrb[100].mxu1 %v6805_v0  ;;  %v2138_v51 = vmax.f32 %v2042_v54, 0.0 }
 0x357   :  { %v1731_v41 = vpop.f32.mrb[20].mxu0  ;;  %2608 = vmatpush1.bf16.msra.mxu1 %v5711_v9  ;;  %v2136_v9 = vmax.f32 %v2040_v1, 0.0 }
 0x358   :  { %v5229_v52 = vadd.f32 %v1731_v41, %v6578_v13  ;;  %v1733_v47 = vpop.f32.mrb[21].mxu0  ;;  %2609 = vmatprep.subr.bf16.mxu1 %v7628_v58 }
 0x359   :  { %v5230_v14 = vadd.f32 %v1733_v47, %v6581_v16  ;;  %v1735_v44 = vpop.f32.mrb[22].mxu0  ;;  %v6840_v16 = vpop.f32.mrb[88].mxu1 }
 0x35a   :  { %v2044_v39 = vadd.f32 %v5229_v52, %v6716_v34  ;;  %v5231_v57 = vadd.f32 %v1735_v44, %v6583_v5  ;;  %v1737_v62 = vpop.f32.mrb[23].mxu0  ;;  %v6844_v47 = vpop.f32.mrb[89].mxu1 }
 0x35b   :  { %v2045_v3 = vadd.f32 %v5230_v14, %v6720_v31  ;;  %v5232_v13 = vadd.f32 %v1737_v62, %v6585_v17  ;;  %2610 = vmatpush1.bf16.msra.mxu1 %v5712_v12  ;;  %v6846_v0 = vpop.f32.mrb[90].mxu1  ;;  %v2139_v17 = vmax.f32 %v2043_v55, 0.0 }
 0x35c   :  { %v2140_v41 = vmax.f32 %v2044_v39, 0.0  ;;  %v2046_v4 = vadd.f32 %v5231_v57, %v6716_v34  ;;  %2611 = vmatprep.subr.bf16.mxu1 %v7628_v58  ;;  %v6848_v57 = vpop.f32.mrb[91].mxu1 }
 0x35d   :  { %v2141_v52 = vmax.f32 %v2045_v3, 0.0  ;;  %v2047_v5 = vadd.f32 %v5232_v13, %v6720_v31 }
 0x35e   :  { %v2224_v44 = vmax.f32 %v2136_v9, %v2140_v41  ;;  %v2142_v14 = vmax.f32 %v2046_v4, 0.0 }
 0x35f   :  { %v2225_v12 = vmax.f32 %v2137_v50, %v2141_v52  ;;  %v2143_v1 = vmax.f32 %v2047_v5, 0.0  ;;  %v1741_v39 = vpop.f32.mrb[24].mxu0  ;;  %v5713_v50 = vld [vmem:[%s7580_s3 + $0x78] sm:$0xff]   ;;  %v6861_v52 = vpop.f32.mrb[92].mxu1 }
 0x360   :  { %v2226_v62 = vmax.f32 %v2138_v51, %v2142_v14  ;;  %v5233_v6 = vadd.f32 %v1741_v39, %v6589_v20  ;;  %v1743_v28 = vpop.f32.mrb[25].mxu0  ;;  %v6865_v20 = vpop.f32.mrb[93].mxu1  ;;  %2612 = vmatpush1.bf16.msra.mxu1 %v5713_v50 }
 0x361   :  { %v2227_v3 = vmax.f32 %v2139_v17, %v2143_v1  ;;  %v5234_v13 = vadd.f32 %v1743_v28, %v6592_v21  ;;  %v1745_v61 = vpop.f32.mrb[26].mxu0  ;;  %v6868_v21 = vpop.f32.mrb[94].mxu1  ;;  %2613 = vmatprep.subr.bf16.mxu1 %v7628_v58 }
 0x362   :  { %v5235_v54 = vadd.f32 %v1745_v61, %v6594_v8  ;;  %v1747_v9 = vpop.f32.mrb[27].mxu0  ;;  %v6853_v41 = vpack.c.bf16 %v2226_v62, %v2224_v44  ;;  %v6870_v61 = vpop.f32.mrb[95].mxu1 }
 0x363   :  { %v6855_v4 = vpack.c.bf16 %v2227_v3, %v2225_v12  ;;  %v5236_v55 = vadd.f32 %v1747_v9, %v6596_v24  ;;  %7633 = vst [vmem:[#allocation40_spill] sm:$0xff] %v6870_v61  ;;  %v2048_v24 = vadd.f32 %v5233_v6, %v6716_v34  ;;  %v2049_v44 = vadd.f32 %v5234_v13, %v6720_v31 }
 0x364   :  { %7631 = vst [vmem:[#allocation38_spill] sm:$0xff] %v6853_v41  ;;  %v2050_v12 = vadd.f32 %v5235_v54, %v6716_v34 }
 0x365   :  { %7632 = vst [vmem:[#allocation39_spill] sm:$0xff] %v6855_v4  ;;  %4574 = vmatprep.mubr.msk.bf16.mxu1 %vm2360_vm2, %v6855_v4  ;;  %v2051_v28 = vadd.f32 %v5236_v55, %v6720_v31  ;;  %v2144_v3 = vmax.f32 %v2048_v24, 0.0  ;;  %v2145_v50 = vmax.f32 %v2049_v44, 0.0 }
 0x366   :  { %2446 = vmatmul.mubr.bf16.gmra.mrb[104].mxu1 %v6853_v41  ;;  %v2146_v54 = vmax.f32 %v2050_v12, 0.0 }
 0x367   :  { %v1751_v8 = vpop.f32.mrb[28].mxu0  ;;  %v2147_v41 = vmax.f32 %v2051_v28, 0.0 }
 0x368   :  { %v5237_v5 = vadd.f32 %v1751_v8, %v6600_v26  ;;  %v1753_v51 = vpop.f32.mrb[29].mxu0 }
 0x369   :  { %v5238_v14 = vadd.f32 %v1753_v51, %v6603_v27  ;;  %v1755_v17 = vpop.f32.mrb[30].mxu0 }
 0x36a   :  { %v2052_v1 = vadd.f32 %v5237_v5, %v6716_v34  ;;  %v5239_v39 = vadd.f32 %v1755_v17, %v6605_v11  ;;  %v1757_v62 = vpop.f32.mrb[31].mxu0 }
 0x36b   :  { %v2053_v6 = vadd.f32 %v5238_v14, %v6720_v31  ;;  %v5240_v26 = vadd.f32 %v1757_v62, %v6607_v29 }
 0x36c   :  { %v2148_v9 = vmax.f32 %v2052_v1, 0.0  ;;  %v2054_v13 = vadd.f32 %v5239_v39, %v6716_v34 }
 0x36d   :  { %v2149_v27 = vmax.f32 %v2053_v6, 0.0  ;;  %v2055_v8 = vadd.f32 %v5240_v26, %v6720_v31  ;;  %v5714_v6 = vld [vmem:[%s7580_s3 + $0x80] sm:$0xff]  }
 0x36e   :  { %v2228_v51 = vmax.f32 %v2144_v3, %v2148_v9  ;;  %v2150_v5 = vmax.f32 %v2054_v13, 0.0  ;;  %2614 = vmatpush1.bf16.msra.mxu1 %v5714_v6 }
 0x36f   :  { %v2229_v11 = vmax.f32 %v2145_v50, %v2149_v27  ;;  %v2151_v17 = vmax.f32 %v2055_v8, 0.0  ;;  %v1761_v4 = vpop.f32.mrb[32].mxu0  ;;  %2615 = vmatprep.subr.bf16.mxu1 %v7628_v58 }
 0x370   :  { %v2230_v55 = vmax.f32 %v2146_v54, %v2150_v5  ;;  %v5241_v14 = vadd.f32 %v1761_v4, %v6611_v30  ;;  %v1763_v61 = vpop.f32.mrb[33].mxu0  ;;  %v5715_v30 = vld [vmem:[%s7580_s3 + $0x88] sm:$0xff]  }
 0x371   :  { %v2231_v29 = vmax.f32 %v2147_v41, %v2151_v17  ;;  %v5242_v24 = vadd.f32 %v1763_v61, %v6614_v32  ;;  %v1765_v1 = vpop.f32.mrb[34].mxu0 }
 0x372   :  { %v5243_v44 = vadd.f32 %v1765_v1, %v6616_v15  ;;  %v1767_v39 = vpop.f32.mrb[35].mxu0  ;;  %v6888_v62 = vpack.c.bf16 %v2230_v55, %v2228_v51  ;;  %v2056_v15 = vadd.f32 %v5241_v14, %v6716_v34  ;;  %2616 = vmatpush1.bf16.msra.mxu1 %v5715_v30 }
 0x373   :  { %v6890_v12 = vpack.c.bf16 %v2231_v29, %v2229_v11  ;;  %v5244_v28 = vadd.f32 %v1767_v39, %v6618_v33  ;;  %v2057_v4 = vadd.f32 %v5242_v24, %v6720_v31 }
 0x374   :  { %v2058_v3 = vadd.f32 %v5243_v44, %v6716_v34  ;;  %v2152_v8 = vmax.f32 %v2056_v15, 0.0 }
 0x375   :  { %4575 = vmatprep.mubr.msk.bf16.mxu1 %vm2360_vm2, %v6890_v12  ;;  %v2059_v58 = vadd.f32 %v5244_v28, %v6720_v31 }
 0x376   :  { %2454 = vmatmul.mubr.bf16.gmra.mrb[108].mxu1 %v6888_v62  ;;  %v2154_v17 = vmax.f32 %v2058_v3, 0.0 }
 0x377   :  { %v1771_v32 = vpop.f32.mrb[36].mxu0  ;;  %v2155_v29 = vmax.f32 %v2059_v58, 0.0 }
 0x378   :  { %v5245_v33 = vadd.f32 %v1771_v32, %v6622_v36  ;;  %v1773_v41 = vpop.f32.mrb[37].mxu0 }
 0x379   :  { %v5246_v61 = vadd.f32 %v1773_v41, %v6625_v38  ;;  %v1775_v26 = vpop.f32.mrb[38].mxu0  ;;  %v2153_v38 = vmax.f32 %v2057_v4, 0.0 }
 0x37a   :  { %v2060_v9 = vadd.f32 %v5245_v33, %v6716_v34  ;;  %v5247_v13 = vadd.f32 %v1775_v26, %v6627_v18  ;;  %v1777_v50 = vpop.f32.mrb[39].mxu0 }
 0x37b   :  { %v2061_v27 = vadd.f32 %v5246_v61, %v6720_v31  ;;  %v5248_v36 = vadd.f32 %v1777_v50, %v6629_v40  ;;  %v7634_v50 = vld [vmem:[#allocation5_spill] sm:$0xff] }
 0x37c   :  { %v2156_v54 = vmax.f32 %v2060_v9, 0.0  ;;  %v2062_v51 = vadd.f32 %v5247_v13, %v6716_v34 }
 0x37d   :  { %v2157_v5 = vmax.f32 %v2061_v27, 0.0  ;;  %v2063_v11 = vadd.f32 %v5248_v36, %v6720_v31 }
 0x37e   :  { %v2232_v55 = vmax.f32 %v2152_v8, %v2156_v54  ;;  %v2158_v14 = vmax.f32 %v2062_v51, 0.0  ;;  %v7635_v54 = vld [vmem:[#allocation6_spill] sm:$0xff] }
 0x37f   :  { %v2233_v18 = vmax.f32 %v2153_v38, %v2157_v5  ;;  %v2159_v24 = vmax.f32 %v2063_v11, 0.0  ;;  %v1781_v1 = vpop.f32.mrb[40].mxu0 }
 0x380   :  { %v2234_v44 = vmax.f32 %v2154_v17, %v2158_v14  ;;  %v5249_v39 = vadd.f32 %v1781_v1, %v6633_v42  ;;  %v1783_v28 = vpop.f32.mrb[41].mxu0 }
 0x381   :  { %v2235_v40 = vmax.f32 %v2155_v29, %v2159_v24  ;;  %v5250_v6 = vadd.f32 %v1783_v28, %v6636_v43  ;;  %v1785_v30 = vpop.f32.mrb[42].mxu0  ;;  %v7636_v28 = vld [vmem:[#allocation7_spill] sm:$0xff] }
 0x382   :  { %v5251_v32 = vadd.f32 %v1785_v30, %v6638_v23  ;;  %v1787_v15 = vpop.f32.mrb[43].mxu0  ;;  %v6918_v33 = vpack.c.bf16 %v2234_v44, %v2232_v55  ;;  %v2064_v61 = vadd.f32 %v5249_v39, %v6716_v34 }
 0x383   :  { %v6920_v41 = vpack.c.bf16 %v2235_v40, %v2233_v18  ;;  %v5252_v4 = vadd.f32 %v1787_v15, %v6640_v45  ;;  %v2065_v23 = vadd.f32 %v5250_v6, %v6720_v31 }
 0x384   :  { %v2066_v13 = vadd.f32 %v5251_v32, %v6716_v34  ;;  %v7637_v32 = vld [vmem:[#allocation8_spill] sm:$0xff] }
 0x385   :  { %4576 = vmatprep.mubr.msk.bf16.mxu1 %vm2360_vm2, %v6920_v41  ;;  %v2067_v36 = vadd.f32 %v5252_v4, %v6720_v31  ;;  %v2161_v11 = vmax.f32 %v2065_v23, 0.0 }
 0x386   :  { %2462 = vmatmul.mubr.bf16.gmra.mrb[112].mxu1 %v6918_v33  ;;  %v2162_v55 = vmax.f32 %v2066_v13, 0.0 }
 0x387   :  { %v1791_v42 = vpop.f32.mrb[44].mxu0  ;;  %v2163_v18 = vmax.f32 %v2067_v36, 0.0 }
 0x388   :  { %v5253_v43 = vadd.f32 %v1791_v42, %v6644_v46  ;;  %v1793_v26 = vpop.f32.mrb[45].mxu0  ;;  %v2160_v46 = vmax.f32 %v2064_v61, 0.0  ;;  %v7638_v42 = vld [vmem:[#allocation9_spill] sm:$0xff] }
 0x389   :  { %v5254_v3 = vadd.f32 %v1793_v26, %v6647_v48  ;;  %v1795_v9 = vpop.f32.mrb[46].mxu0 }
 0x38a   :  { %v2068_v45 = vadd.f32 %v5253_v43, %v6716_v34  ;;  %v5255_v58 = vadd.f32 %v1795_v9, %v7634_v50  ;;  %v1797_v27 = vpop.f32.mrb[47].mxu0  ;;  %v7640_v50 = vld [vmem:[#allocation11_spill] sm:$0xff] }
 0x38b   :  { %v2069_v8 = vadd.f32 %v5254_v3, %v6720_v31  ;;  %v5256_v51 = vadd.f32 %v1797_v27, %v7635_v54  ;;  %v7639_v3 = vld [vmem:[#allocation10_spill] sm:$0xff] }
 0x38c   :  { %v2164_v38 = vmax.f32 %v2068_v45, 0.0  ;;  %v2070_v5 = vadd.f32 %v5255_v58, %v6716_v34 }
 0x38d   :  { %v2165_v48 = vmax.f32 %v2069_v8, 0.0  ;;  %v2071_v17 = vadd.f32 %v5256_v51, %v6720_v31  ;;  %v7641_v8 = vld [vmem:[#allocation12_spill] sm:$0xff] }
 0x38e   :  { %v2236_v14 = vmax.f32 %v2160_v46, %v2164_v38  ;;  %v2166_v29 = vmax.f32 %v2070_v5, 0.0  ;;  %v7642_v5 = vld [vmem:[#allocation13_spill] sm:$0xff] }
 0x38f   :  { %v2237_v24 = vmax.f32 %v2161_v11, %v2165_v48  ;;  %v2167_v1 = vmax.f32 %v2071_v17, 0.0  ;;  %v1801_v44 = vpop.f32.mrb[48].mxu0 }
 0x390   :  { %v2238_v39 = vmax.f32 %v2162_v55, %v2166_v29  ;;  %v5257_v40 = vadd.f32 %v1801_v44, %v7636_v28  ;;  %v1803_v6 = vpop.f32.mrb[49].mxu0 }
 0x391   :  { %v2239_v30 = vmax.f32 %v2163_v18, %v2167_v1  ;;  %v5258_v15 = vadd.f32 %v1803_v6, %v7637_v32  ;;  %v1805_v4 = vpop.f32.mrb[50].mxu0 }
 0x392   :  { %v5259_v61 = vadd.f32 %v1805_v4, %v7638_v42  ;;  %v1807_v43 = vpop.f32.mrb[51].mxu0  ;;  %v6941_v26 = vpack.c.bf16 %v2238_v39, %v2236_v14  ;;  %v2072_v45 = vadd.f32 %v5257_v40, %v6716_v34  ;;  %v7643_v14 = vld [vmem:[#allocation14_spill] sm:$0xff] }
 0x393   :  { %v6943_v23 = vpack.c.bf16 %v2239_v30, %v2237_v24  ;;  %v5260_v9 = vadd.f32 %v1807_v43, %v7639_v3  ;;  %v2073_v36 = vadd.f32 %v5258_v15, %v6720_v31  ;;  %v7644_v43 = vld [vmem:[#allocation15_spill] sm:$0xff] }
 0x394   :  { %v2074_v46 = vadd.f32 %v5259_v61, %v6716_v34  ;;  %v2168_v18 = vmax.f32 %v2072_v45, 0.0  ;;  %v7645_v45 = vld [vmem:[#allocation16_spill] sm:$0xff] }
 0x395   :  { %4577 = vmatprep.mubr.msk.bf16.mxu1 %vm2360_vm2, %v6943_v23  ;;  %v2075_v17 = vadd.f32 %v5260_v9, %v6720_v31  ;;  %v2169_v44 = vmax.f32 %v2073_v36, 0.0 }
 0x396   :  { %2470 = vmatmul.mubr.bf16.gmra.mrb[116].mxu1 %v6941_v26  ;;  %v2170_v40 = vmax.f32 %v2074_v46, 0.0  ;;  %v7647_v46 = vld [vmem:[#allocation18_spill] sm:$0xff] }
 0x397   :  { %v1811_v13 = vpop.f32.mrb[52].mxu0  ;;  %v2171_v32 = vmax.f32 %v2075_v17, 0.0 }
 0x398   :  { %v5261_v58 = vadd.f32 %v1811_v13, %v7640_v50  ;;  %v1813_v27 = vpop.f32.mrb[53].mxu0 }
 0x399   :  { %v5262_v54 = vadd.f32 %v1813_v27, %v7641_v8  ;;  %v1815_v51 = vpop.f32.mrb[54].mxu0  ;;  %v7646_v27 = vld [vmem:[#allocation17_spill] sm:$0xff] }
 0x39a   :  { %v2076_v38 = vadd.f32 %v5261_v58, %v6716_v34  ;;  %v5263_v11 = vadd.f32 %v1815_v51, %v7642_v5  ;;  %v1817_v48 = vpop.f32.mrb[55].mxu0 }
 0x39b   :  { %v2077_v55 = vadd.f32 %v5262_v54, %v6720_v31  ;;  %v5264_v29 = vadd.f32 %v1817_v48, %v7643_v14  ;;  %v7648_v48 = vld [vmem:[#allocation19_spill] sm:$0xff] }
 0x39c   :  { %v2172_v24 = vmax.f32 %v2076_v38, 0.0  ;;  %v2078_v1 = vadd.f32 %v5263_v11, %v6716_v34 }
 0x39d   :  { %v2173_v39 = vmax.f32 %v2077_v55, 0.0  ;;  %v2079_v28 = vadd.f32 %v5264_v29, %v6720_v31  ;;  %v7649_v29 = vld [vmem:[#allocation20_spill] sm:$0xff] }
 0x39e   :  { %v2240_v6 = vmax.f32 %v2168_v18, %v2172_v24  ;;  %v2174_v30 = vmax.f32 %v2078_v1, 0.0 }
 0x39f   :  { %v2241_v15 = vmax.f32 %v2169_v44, %v2173_v39  ;;  %v2175_v4 = vmax.f32 %v2079_v28, 0.0  ;;  %v1821_v42 = vpop.f32.mrb[56].mxu0  ;;  %v7650_v39 = vld [vmem:[#allocation21_spill] sm:$0xff] }
 0x3a0   :  { %v2242_v61 = vmax.f32 %v2170_v40, %v2174_v30  ;;  %v5265_v3 = vadd.f32 %v1821_v42, %v7644_v43  ;;  %v1823_v9 = vpop.f32.mrb[57].mxu0 }
 0x3a1   :  { %v2243_v13 = vmax.f32 %v2171_v32, %v2175_v4  ;;  %v5266_v50 = vadd.f32 %v1823_v9, %v7645_v45  ;;  %v1825_v58 = vpop.f32.mrb[58].mxu0  ;;  %v7651_v32 = vld [vmem:[#allocation22_spill] sm:$0xff] }
 0x3a2   :  { %v5267_v36 = vadd.f32 %v1825_v58, %v7646_v27  ;;  %v1827_v8 = vpop.f32.mrb[59].mxu0  ;;  %v6964_v54 = vpack.c.bf16 %v2242_v61, %v2240_v6  ;;  %v2080_v11 = vadd.f32 %v5265_v3, %v6716_v34 }
 0x3a3   :  { %v6966_v51 = vpack.c.bf16 %v2243_v13, %v2241_v15  ;;  %v5268_v38 = vadd.f32 %v1827_v8, %v7647_v46  ;;  %v2081_v14 = vadd.f32 %v5266_v50, %v6720_v31 }
 0x3a4   :  { %v2082_v1 = vadd.f32 %v5267_v36, %v6716_v34  ;;  %v2176_v4 = vmax.f32 %v2080_v11, 0.0  ;;  %v7653_v11 = vld [vmem:[#allocation25_spill] sm:$0xff] }
 0x3a5   :  { %4578 = vmatprep.mubr.msk.bf16.mxu1 %vm2360_vm2, %v6966_v51  ;;  %v2083_v6 = vadd.f32 %v5268_v38, %v6720_v31  ;;  %v2177_v43 = vmax.f32 %v2081_v14, 0.0  ;;  %v7652_v38 = vld [vmem:[#allocation24_spill] sm:$0xff] }
 0x3a6   :  { %2478 = vmatmul.mubr.bf16.gmra.mrb[120].mxu1 %v6964_v54  ;;  %v2178_v13 = vmax.f32 %v2082_v1, 0.0 }
 0x3a7   :  { %v1831_v5 = vpop.f32.mrb[60].mxu0  ;;  %v2179_v58 = vmax.f32 %v2083_v6, 0.0 }
 0x3a8   :  { %v5269_v17 = vadd.f32 %v1831_v5, %v7648_v48  ;;  %v1833_v55 = vpop.f32.mrb[61].mxu0 }
 0x3a9   :  { %v5270_v18 = vadd.f32 %v1833_v55, %v7649_v29  ;;  %v1835_v24 = vpop.f32.mrb[62].mxu0 }
 0x3aa   :  { %v2084_v44 = vadd.f32 %v5269_v17, %v6716_v34  ;;  %v5271_v28 = vadd.f32 %v1835_v24, %v7650_v39  ;;  %v1837_v40 = vpop.f32.mrb[63].mxu0  ;;  %v7655_v39 = vld [vmem:[#allocation27_spill] sm:$0xff] }
 0x3ab   :  { %v2085_v30 = vadd.f32 %v5270_v18, %v6720_v31  ;;  %v5272_v15 = vadd.f32 %v1837_v40, %v7651_v32  ;;  %v7654_v18 = vld [vmem:[#allocation26_spill] sm:$0xff] }
 0x3ac   :  { %v2180_v42 = vmax.f32 %v2084_v44, 0.0  ;;  %v2086_v61 = vadd.f32 %v5271_v28, %v6716_v34 }
 0x3ad   :  { %v2181_v3 = vmax.f32 %v2085_v30, 0.0  ;;  %v2087_v9 = vadd.f32 %v5272_v15, %v6720_v31  ;;  %v7656_v30 = vld [vmem:[#allocation28_spill] sm:$0xff] }
 0x3ae   :  { %v2244_v45 = vmax.f32 %v2176_v4, %v2180_v42  ;;  %v2182_v50 = vmax.f32 %v2086_v61, 0.0  ;;  %v7657_v42 = vld [vmem:[#allocation29_spill] sm:$0xff] }
 0x3af   :  { %v2245_v27 = vmax.f32 %v2177_v43, %v2181_v3  ;;  %v2183_v36 = vmax.f32 %v2087_v9, 0.0  ;;  %v1841_v8 = vpop.f32.mrb[64].mxu0 }
 0x3b0   :  { %v2246_v46 = vmax.f32 %v2178_v13, %v2182_v50  ;;  %v5273_v5 = vadd.f32 %v1841_v8, %v7652_v38  ;;  %v1843_v48 = vpop.f32.mrb[65].mxu0  ;;  %v7658_v13 = vld [vmem:[#allocation30_spill] sm:$0xff] }
 0x3b1   :  { %v2247_v17 = vmax.f32 %v2179_v58, %v2183_v36  ;;  %v5274_v55 = vadd.f32 %v1843_v48, %v7653_v11  ;;  %v1845_v29 = vpop.f32.mrb[66].mxu0  ;;  %v7659_v36 = vld [vmem:[#allocation31_spill] sm:$0xff] }
 0x3b2   :  { %v5275_v14 = vadd.f32 %v1845_v29, %v7654_v18  ;;  %v1847_v24 = vpop.f32.mrb[67].mxu0  ;;  %v6987_v44 = vpack.c.bf16 %v2246_v46, %v2244_v45  ;;  %v2088_v6 = vadd.f32 %v5273_v5, %v6716_v34 }
 0x3b3   :  { %v6989_v1 = vpack.c.bf16 %v2247_v17, %v2245_v27  ;;  %v5276_v28 = vadd.f32 %v1847_v24, %v7655_v39  ;;  %v2089_v4 = vadd.f32 %v5274_v55, %v6720_v31 }
 0x3b4   :  { %v2090_v3 = vadd.f32 %v5275_v14, %v6716_v34  ;;  %v2184_v46 = vmax.f32 %v2088_v6, 0.0  ;;  %v7661_v6 = vld [vmem:[#allocation33_spill] sm:$0xff] }
 0x3b5   :  { %4579 = vmatprep.mubr.msk.bf16.mxu1 %vm2360_vm2, %v6989_v1  ;;  %v2091_v58 = vadd.f32 %v5276_v28, %v6720_v31  ;;  %v2185_v48 = vmax.f32 %v2089_v4, 0.0 }
 0x3b6   :  { %2486 = vmatmul.mubr.bf16.gmra.mrb[124].mxu1 %v6987_v44  ;;  %v2186_v55 = vmax.f32 %v2090_v3, 0.0 }
 0x3b7   :  { %v1851_v40 = vpop.f32.mrb[68].mxu0  ;;  %v2187_v14 = vmax.f32 %v2091_v58, 0.0 }
 0x3b8   :  { %v5277_v32 = vadd.f32 %v1851_v40, %v7656_v30  ;;  %v1853_v15 = vpop.f32.mrb[69].mxu0  ;;  %v7660_v30 = vld [vmem:[#allocation32_spill] sm:$0xff] }
 0x3b9   :  { %v5278_v61 = vadd.f32 %v1853_v15, %v7657_v42  ;;  %v1855_v43 = vpop.f32.mrb[70].mxu0 }
 0x3ba   :  { %v2092_v9 = vadd.f32 %v5277_v32, %v6716_v34  ;;  %v5279_v45 = vadd.f32 %v1855_v43, %v7658_v13  ;;  %v1857_v50 = vpop.f32.mrb[71].mxu0 }
 0x3bb   :  { %v2093_v27 = vadd.f32 %v5278_v61, %v6720_v31  ;;  %v5280_v8 = vadd.f32 %v1857_v50, %v7659_v36 }
 0x3bc   :  { %v2188_v38 = vmax.f32 %v2092_v9, 0.0  ;;  %v2094_v5 = vadd.f32 %v5279_v45, %v6716_v34 }
 0x3bd   :  { %v2189_v17 = vmax.f32 %v2093_v27, 0.0  ;;  %v2095_v11 = vadd.f32 %v5280_v8, %v6720_v31 }
 0x3be   :  { %v2248_v29 = vmax.f32 %v2184_v46, %v2188_v38  ;;  %v2190_v18 = vmax.f32 %v2094_v5, 0.0 }
 0x3bf   :  { %v2249_v24 = vmax.f32 %v2185_v48, %v2189_v17  ;;  %v2191_v39 = vmax.f32 %v2095_v11, 0.0  ;;  %v1861_v40 = vpop.f32.mrb[72].mxu0 }
 0x3c0   :  { %v2250_v28 = vmax.f32 %v2186_v55, %v2190_v18  ;;  %v5281_v32 = vadd.f32 %v1861_v40, %v7660_v30  ;;  %v1863_v15 = vpop.f32.mrb[73].mxu0 }
 0x3c1   :  { %v2251_v42 = vmax.f32 %v2187_v14, %v2191_v39  ;;  %v5282_v61 = vadd.f32 %v1863_v15, %v7661_v6  ;;  %v1865_v43 = vpop.f32.mrb[74].mxu0 }
 0x3c2   :  { %v5283_v4 = vadd.f32 %v1865_v43, %v6744_v22  ;;  %v1867_v9 = vpop.f32.mrb[75].mxu0  ;;  %v7010_v13 = vpack.c.bf16 %v2250_v28, %v2248_v29  ;;  %v2096_v58 = vadd.f32 %v5281_v32, %v6716_v34 }
 0x3c3   :  { %v7012_v3 = vpack.c.bf16 %v2251_v42, %v2249_v24  ;;  %v5284_v45 = vadd.f32 %v1867_v9, %v6746_v19  ;;  %v2097_v22 = vadd.f32 %v5282_v61, %v6720_v31 }
 0x3c4   :  { %v2098_v38 = vadd.f32 %v5283_v4, %v6716_v34 }
 0x3c5   :  { %4580 = vmatprep.mubr.msk.bf16.mxu1 %vm2360_vm2, %v7012_v3  ;;  %v2099_v17 = vadd.f32 %v5284_v45, %v6720_v31  ;;  %v2193_v14 = vmax.f32 %v2097_v22, 0.0 }
 0x3c6   :  { %2494 = vmatmul.mubr.bf16.gmra.mrb[128].mxu1 %v7010_v13  ;;  %v2194_v39 = vmax.f32 %v2098_v38, 0.0 }
 0x3c7   :  { %v1871_v50 = vpop.f32.mrb[76].mxu0  ;;  %v2195_v30 = vmax.f32 %v2099_v17, 0.0 }
 0x3c8   :  { %v5285_v27 = vadd.f32 %v1871_v50, %v6759_v59  ;;  %v1873_v36 = vpop.f32.mrb[77].mxu0  ;;  %v2192_v59 = vmax.f32 %v2096_v58, 0.0 }
 0x3c9   :  { %v5286_v8 = vadd.f32 %v1873_v36, %v6763_v60  ;;  %v1875_v46 = vpop.f32.mrb[78].mxu0 }
 0x3ca   :  { %v2100_v19 = vadd.f32 %v5285_v27, %v6716_v34  ;;  %v5287_v5 = vadd.f32 %v1875_v46, %v6766_v63  ;;  %v1877_v48 = vpop.f32.mrb[79].mxu0 }
 0x3cb   :  { %v2101_v11 = vadd.f32 %v5286_v8, %v6720_v31  ;;  %v5288_v55 = vadd.f32 %v1877_v48, %v6771_v35 }
 0x3cc   :  { %v2196_v29 = vmax.f32 %v2100_v19, 0.0  ;;  %v2102_v18 = vadd.f32 %v5287_v5, %v6716_v34 }
 0x3cd   :  { %v2197_v60 = vmax.f32 %v2101_v11, 0.0  ;;  %v2103_v24 = vadd.f32 %v5288_v55, %v6720_v31 }
 0x3ce   :  { %v2252_v40 = vmax.f32 %v2192_v59, %v2196_v29  ;;  %v2198_v28 = vmax.f32 %v2102_v18, 0.0 }
 0x3cf   :  { %v2253_v63 = vmax.f32 %v2193_v14, %v2197_v60  ;;  %v2199_v32 = vmax.f32 %v2103_v24, 0.0  ;;  %v1881_v15 = vpop.f32.mrb[80].mxu0 }
 0x3d0   :  { %v2254_v42 = vmax.f32 %v2194_v39, %v2198_v28  ;;  %v5289_v6 = vadd.f32 %v1881_v15, %v6789_v49  ;;  %v1883_v61 = vpop.f32.mrb[81].mxu0 }
 0x3d1   :  { %v2255_v35 = vmax.f32 %v2195_v30, %v2199_v32  ;;  %v5290_v43 = vadd.f32 %v1883_v61, %v6792_v53  ;;  %v1885_v4 = vpop.f32.mrb[82].mxu0 }
 0x3d2   :  { %v5291_v9 = vadd.f32 %v1885_v4, %v6794_v25  ;;  %v1887_v45 = vpop.f32.mrb[83].mxu0  ;;  %v7033_v50 = vpack.c.bf16 %v2254_v42, %v2252_v40  ;;  %v2104_v36 = vadd.f32 %v5289_v6, %v6716_v34 }
 0x3d3   :  { %v7035_v58 = vpack.c.bf16 %v2255_v35, %v2253_v63  ;;  %v5292_v27 = vadd.f32 %v1887_v45, %v6799_v56  ;;  %v2105_v25 = vadd.f32 %v5290_v43, %v6720_v31 }
 0x3d4   :  { %v2106_v38 = vadd.f32 %v5291_v9, %v6716_v34 }
 0x3d5   :  { %4581 = vmatprep.mubr.msk.bf16.mxu1 %vm2360_vm2, %v7035_v58  ;;  %v2107_v48 = vadd.f32 %v5292_v27, %v6720_v31  ;;  %v2201_v29 = vmax.f32 %v2105_v25, 0.0 }
 0x3d6   :  { %2502 = vmatmul.mubr.bf16.gmra.mrb[132].mxu1 %v7033_v50  ;;  %v2202_v14 = vmax.f32 %v2106_v38, 0.0 }
 0x3d7   :  { %v1891_v49 = vpop.f32.mrb[84].mxu0  ;;  %v2203_v39 = vmax.f32 %v2107_v48, 0.0 }
 0x3d8   :  { %v5293_v53 = vadd.f32 %v1891_v49, %v6814_v37  ;;  %v1893_v22 = vpop.f32.mrb[85].mxu0  ;;  %v2200_v37 = vmax.f32 %v2104_v36, 0.0 }
 0x3d9   :  { %v5294_v8 = vadd.f32 %v1893_v22, %v6818_v2  ;;  %v1895_v46 = vpop.f32.mrb[86].mxu0 }
 0x3da   :  { %v2108_v56 = vadd.f32 %v5293_v53, %v6716_v34  ;;  %v5295_v19 = vadd.f32 %v1895_v46, %v6821_v10  ;;  %v1897_v5 = vpop.f32.mrb[87].mxu0  ;;  %v7662_v46 = vld [vmem:[#allocation40_spill] sm:$0xff] }
 0x3db   :  { %v2109_v17 = vadd.f32 %v5294_v8, %v6720_v31  ;;  %v5296_v11 = vadd.f32 %v1897_v5, %v6826_v7 }
 0x3dc   :  { %v2204_v55 = vmax.f32 %v2108_v56, 0.0  ;;  %v2110_v59 = vadd.f32 %v5295_v19, %v6716_v34 }
 0x3dd   :  { %v2205_v2 = vmax.f32 %v2109_v17, 0.0  ;;  %v2111_v18 = vadd.f32 %v5296_v11, %v6720_v31 }
 0x3de   :  { %v2256_v60 = vmax.f32 %v2200_v37, %v2204_v55  ;;  %v2206_v24 = vmax.f32 %v2110_v59, 0.0 }
 0x3df   :  { %v2257_v10 = vmax.f32 %v2201_v29, %v2205_v2  ;;  %v2207_v40 = vmax.f32 %v2111_v18, 0.0  ;;  %v1901_v28 = vpop.f32.mrb[88].mxu0 }
 0x3e0   :  { %v2258_v30 = vmax.f32 %v2202_v14, %v2206_v24  ;;  %v5297_v63 = vadd.f32 %v1901_v28, %v6840_v16  ;;  %v1903_v32 = vpop.f32.mrb[89].mxu0  ;;  %v7665_v24 = vld [vmem:[#allocation37_spill] sm:$0xff] }
 0x3e1   :  { %v2259_v7 = vmax.f32 %v2203_v39, %v2207_v40  ;;  %v5298_v15 = vadd.f32 %v1903_v32, %v6844_v47  ;;  %v1905_v42 = vpop.f32.mrb[90].mxu0  ;;  %v7667_v39 = vld [vmem:[#allocation39_spill] sm:$0xff]  ;;  %v5716_v32 = vld [vmem:[%s7579_s2 + $0x24] sm:$0xff]  }
 0x3e2   :  { %v5299_v6 = vadd.f32 %v1905_v42, %v6846_v0  ;;  %v1907_v61 = vpop.f32.mrb[91].mxu0  ;;  %v7056_v35 = vpack.c.bf16 %v2258_v30, %v2256_v60  ;;  %v2112_v9 = vadd.f32 %v5297_v63, %v6716_v34  ;;  %v7663_v60 = vld [vmem:[#allocation35_spill] sm:$0xff]  ;;  %4943 = vmatprep.subr.bf16.mxu1 %v5716_v32 }
 0x3e3   :  { %v7058_v43 = vpack.c.bf16 %v2259_v7, %v2257_v10  ;;  %v5300_v4 = vadd.f32 %v1907_v61, %v6848_v57  ;;  %v2113_v0 = vadd.f32 %v5298_v15, %v6720_v31  ;;  %v7668_v10 = vld [vmem:[#allocation38_spill] sm:$0xff] }
 0x3e4   :  { %v2114_v36 = vadd.f32 %v5299_v6, %v6716_v34 }
 0x3e5   :  { %4582 = vmatprep.mubr.msk.bf16.mxu1 %vm2360_vm2, %v7058_v43  ;;  %v2115_v25 = vadd.f32 %v5300_v4, %v6720_v31  ;;  %v2209_v5 = vmax.f32 %v2113_v0, 0.0 }
 0x3e6   :  { %2510 = vmatmul.mubr.bf16.gmra.mrb[136].mxu1 %v7056_v35  ;;  %v2210_v17 = vmax.f32 %v2114_v36, 0.0  ;;  %v5721_v36 = vld [vmem:[%s7579_s2] sm:$0xff]  }
 0x3e7   :  { %v1911_v16 = vpop.f32.mrb[92].mxu0  ;;  %v2211_v55 = vmax.f32 %v2115_v25, 0.0 }
 0x3e8   :  { %v5301_v47 = vadd.f32 %v1911_v16, %v6861_v52  ;;  %v1913_v45 = vpop.f32.mrb[93].mxu0  ;;  %v2208_v52 = vmax.f32 %v2112_v9, 0.0 }
 0x3e9   :  { %v5302_v27 = vadd.f32 %v1913_v45, %v6865_v20  ;;  %v1915_v49 = vpop.f32.mrb[94].mxu0 }
 0x3ea   :  { %v2116_v57 = vadd.f32 %v5301_v47, %v6716_v34  ;;  %v5303_v53 = vadd.f32 %v1915_v49, %v6868_v21  ;;  %v1917_v22 = vpop.f32.mrb[95].mxu0 }
 0x3eb   :  { %v2117_v8 = vadd.f32 %v5302_v27, %v6720_v31  ;;  %v5304_v38 = vadd.f32 %v1917_v22, %v7662_v46 }
 0x3ec   :  { %v2212_v56 = vmax.f32 %v2116_v57, 0.0  ;;  %v2118_v19 = vadd.f32 %v5303_v53, %v6716_v34  ;;  %v7664_v34 = vld [vmem:[#allocation34_spill] sm:$0xff] }
 0x3ed   :  { %v2213_v20 = vmax.f32 %v2117_v8, 0.0  ;;  %v2119_v48 = vadd.f32 %v5304_v38, %v6720_v31  ;;  %v7666_v31 = vld [vmem:[#allocation36_spill] sm:$0xff] }
 0x3ee   :  { %v2260_v11 = vmax.f32 %v2208_v52, %v2212_v56  ;;  %v2214_v37 = vmax.f32 %v2118_v19, 0.0 }
 0x3ef   :  { %v2261_v21 = vmax.f32 %v2209_v5, %v2213_v20  ;;  %v2215_v59 = vmax.f32 %v2119_v48, 0.0 }
 0x3f0   :  { %v2262_v29 = vmax.f32 %v2210_v17, %v2214_v37 }
 0x3f1   :  { %v2263_v2 = vmax.f32 %v2211_v55, %v2215_v59 }
 0x3f2   :  { %v2286_v18 = vpack.c.bf16 %v2262_v29, %v2260_v11 }
 0x3f3   :  { %v2287_v14 = vpack.c.bf16 %v2263_v2, %v2261_v21 }
 0x3f5   :  { %4583 = vmatprep.mubr.msk.bf16.mxu1 %vm2360_vm2, %v2287_v14 }
 0x3f6   :  { %2518 = vmatmul.mubr.bf16.gmra.mrb[140].mxu1 %v2286_v18 }
 0x3f7   :  { %4611 = vmatprep.mubr.msk.bf16.mxu1 %vm2360_vm2, %v7663_v60 }
 0x3fe   :  { %2632 = vmatmul.mubr.bf16.vlgmr.msra.gmra.mrb[144].mxu1 %v7664_v34 }
 0x3ff   :  { %4612 = vmatprep.mubr.msk.bf16.mxu1 %vm2360_vm2, %v7665_v24  ;;  %4944 = vmatpush3.bf16.msra.mxu1 %v5716_v32 }
 0x406   :  { %2640 = vmatmul.mubr.bf16.gmra.mrb[148].mxu1 %v7666_v31 }
 0x407   :  { %4613 = vmatprep.mubr.msk.bf16.mxu1 %vm2360_vm2, %v7667_v39 }
 0x40e   :  { %2648 = vmatmul.mubr.bf16.gmra.mrb[152].mxu1 %v7668_v10 }
 0x40f   :  { %4614 = vmatprep.mubr.msk.bf16.mxu1 %vm2360_vm2, %v6890_v12 }
 0x416   :  { %2656 = vmatmul.mubr.bf16.gmra.mrb[156].mxu1 %v6888_v62 }
 0x417   :  { %4615 = vmatprep.mubr.msk.bf16.mxu1 %vm2360_vm2, %v6920_v41 }
 0x419   :  { %v7091_v40 = vpop.f32.mrb[96].mxu1 }
 0x41a   :  { %v2433_v28 = vpop.f32.mrb[97].mxu1 }
 0x41b   :  { %v7093_v30 = vpop.f32.mrb[98].mxu1 }
 0x41c   :  { %v2436_v63 = vpop.f32.mrb[99].mxu1 }
 0x41e   :  { %2664 = vmatmul.mubr.bf16.gmra.mrb[160].mxu1 %v6918_v33  ;;  %v5717_v33 = vld [vmem:[%s7579_s2 + $0x2c] sm:$0xff]  }
 0x41f   :  { %4616 = vmatprep.mubr.msk.bf16.mxu1 %vm2360_vm2, %v6943_v23  ;;  %4945 = vmatprep.subr.bf16.mxu1 %v5717_v33 }
 0x420   :  { %4946 = vmatpush3.bf16.msra.mxu1 %v5717_v33 }
 0x426   :  { %2672 = vmatmul.mubr.bf16.gmra.mrb[164].mxu1 %v6941_v26 }
 0x427   :  { %4617 = vmatprep.mubr.msk.bf16.mxu1 %vm2360_vm2, %v6966_v51 }
 0x429   :  { %v7104_v62 = vpop.f32.mrb[100].mxu1 }
 0x42a   :  { %v2441_v12 = vpop.f32.mrb[101].mxu1 }
 0x42b   :  { %v7106_v41 = vpop.f32.mrb[102].mxu1 }
 0x42c   :  { %v2444_v7 = vpop.f32.mrb[103].mxu1 }
 0x42e   :  { %2680 = vmatmul.mubr.bf16.gmra.mrb[168].mxu1 %v6964_v54  ;;  %v5718_v54 = vld [vmem:[%s7579_s2 + $0x34] sm:$0xff]  }
 0x42f   :  { %4618 = vmatprep.mubr.msk.bf16.mxu1 %vm2360_vm2, %v6989_v1  ;;  %4947 = vmatprep.subr.bf16.mxu1 %v5718_v54 }
 0x430   :  { %4948 = vmatpush3.bf16.msra.mxu1 %v5718_v54 }
 0x436   :  { %2688 = vmatmul.mubr.bf16.gmra.mrb[172].mxu1 %v6987_v44 }
 0x437   :  { %4619 = vmatprep.mubr.msk.bf16.mxu1 %vm2360_vm2, %v7012_v3 }
 0x439   :  { %v7117_v26 = vpop.f32.mrb[104].mxu1 }
 0x43a   :  { %v2449_v23 = vpop.f32.mrb[105].mxu1 }
 0x43b   :  { %v7119_v51 = vpop.f32.mrb[106].mxu1 }
 0x43c   :  { %v2452_v15 = vpop.f32.mrb[107].mxu1 }
 0x43e   :  { %2696 = vmatmul.mubr.bf16.gmra.mrb[176].mxu1 %v7010_v13 }
 0x43f   :  { %4620 = vmatprep.mubr.msk.bf16.mxu1 %vm2360_vm2, %v7035_v58 }
 0x446   :  { %2704 = vmatmul.mubr.bf16.gmra.mrb[180].mxu1 %v7033_v50  ;;  %v5719_v50 = vld [vmem:[%s7579_s2 + $0x3c] sm:$0xff]  }
 0x447   :  { %4621 = vmatprep.mubr.msk.bf16.mxu1 %vm2360_vm2, %v7058_v43  ;;  %4949 = vmatprep.subr.bf16.mxu1 %v5719_v50  ;;  %v5720_v43 = vld [vmem:[%s7579_s2 + $0x44] ss:$0 sps:$4 sm:$0xff]  }
 0x448   :  { %4950 = vmatpush3.bf16.msra.mxu1 %v5719_v50 }
 0x449   :  { %v7130_v44 = vpop.f32.mrb[108].mxu1  ;;  %5657 = vmatprep.subr.msk.bf16.mxu1 %vm2835_vm3, %v5720_v43 }
 0x44a   :  { %v2457_v1 = vpop.f32.mrb[109].mxu1 }
 0x44b   :  { %v7132_v3 = vpop.f32.mrb[110].mxu1 }
 0x44c   :  { %v2460_v42 = vpop.f32.mrb[111].mxu1 }
 0x44e   :  { %2712 = vmatmul.mubr.bf16.gmra.mrb[184].mxu1 %v7056_v35  ;;  %v2837_v35 = vsel %vm2835_vm3, %v5720_v43, 0 }
 0x44f   :  { %4622 = vmatprep.mubr.msk.bf16.mxu1 %vm2360_vm2, %v2287_v14  ;;  %4952 = vmatpush3.bf16.msra.mxu1 %v2837_v35  ;;  %v5724_v35 = vld [vmem:[%s7579_s2 + $0x18] sm:$0xff]  }
 0x450   :  { %4969 = vmatprep.subr.bf16.mxu1 %v5721_v36 }
 0x456   :  { %2720 = vmatmul.mubr.bf16.gmra.mrb[188].mxu1 %v2286_v18 }
 0x459   :  { %v7136_v13 = vpop.f32.mrb[112].mxu1 }
 0x45a   :  { %v2465_v58 = vpop.f32.mrb[113].mxu1 }
 0x45b   :  { %v7141_v6 = vpop.f32.mrb[114].mxu1 }
 0x45c   :  { %v2468_v61 = vpop.f32.mrb[115].mxu1 }
 0x469   :  { %v7148_v4 = vpop.f32.mrb[116].mxu1 }
 0x46a   :  { %v2473_v16 = vpop.f32.mrb[117].mxu1 }
 0x46b   :  { %v7150_v9 = vpop.f32.mrb[118].mxu1 }
 0x46c   :  { %v2476_v47 = vpop.f32.mrb[119].mxu1 }
 0x479   :  { %v7152_v45 = vpop.f32.mrb[120].mxu1 }
 0x47a   :  { %v2481_v0 = vpop.f32.mrb[121].mxu1 }
 0x47b   :  { %v7154_v27 = vpop.f32.mrb[122].mxu1 }
 0x47c   :  { %v2484_v49 = vpop.f32.mrb[123].mxu1 }
 0x489   :  { %v7159_v57 = vpop.f32.mrb[124].mxu1 }
 0x48a   :  { %v2489_v53 = vpop.f32.mrb[125].mxu1 }
 0x48b   :  { %v7161_v22 = vpop.f32.mrb[126].mxu1 }
 0x48c   :  { %v2492_v25 = vpop.f32.mrb[127].mxu1 }
 0x499   :  { %v7163_v8 = vpop.f32.mrb[128].mxu1 }
 0x49a   :  { %v2497_v46 = vpop.f32.mrb[129].mxu1 }
 0x49b   :  { %v7165_v38 = vpop.f32.mrb[130].mxu1 }
 0x49c   :  { %v2500_v52 = vpop.f32.mrb[131].mxu1 }
 0x4a9   :  { %v7167_v56 = vpop.f32.mrb[132].mxu1 }
 0x4aa   :  { %v2505_v19 = vpop.f32.mrb[133].mxu1 }
 0x4ab   :  { %v7169_v5 = vpop.f32.mrb[134].mxu1 }
 0x4ac   :  { %v2508_v20 = vpop.f32.mrb[135].mxu1 }
 0x4b9   :  { %v7171_v48 = vpop.f32.mrb[136].mxu1 }
 0x4ba   :  { %v2513_v17 = vpop.f32.mrb[137].mxu1 }
 0x4bb   :  { %v7173_v11 = vpop.f32.mrb[138].mxu1 }
 0x4bc   :  { %v2516_v37 = vpop.f32.mrb[139].mxu1 }
 0x4c9   :  { %v7175_v55 = vpop.f32.mrb[140].mxu1 }
 0x4ca   :  { %v2521_v21 = vpop.f32.mrb[141].mxu1 }
 0x4cb   :  { %v7177_v59 = vpop.f32.mrb[142].mxu1 }
 0x4cc   :  { %v2524_v29 = vpop.f32.mrb[143].mxu1 }
 0x4d1   :  { %v2633_v2 = vpop.f32.mrb[144].mxu1 }
 0x4d2   :  { %v2728_v18 = vmax.f32 %v7091_v40, %v2633_v2  ;;  %v2635_v14 = vpop.f32.mrb[145].mxu1 }
 0x4d3   :  { %v2636_v60 = vpop.f32.mrb[146].mxu1 }
 0x4d4   :  { %v2729_v34 = vmax.f32 %v7093_v30, %v2636_v60  ;;  %v2638_v24 = vpop.f32.mrb[147].mxu1 }
 0x4d6   :  { %v7181_v31 = vpack.c.bf16 %v2729_v34, %v2728_v18 }
 0x4d9   :  { %v2641_v39 = vpop.f32.mrb[148].mxu1 }
 0x4da   :  { %v2730_v10 = vmax.f32 %v7104_v62, %v2641_v39  ;;  %v2643_v28 = vpop.f32.mrb[149].mxu1 }
 0x4db   :  { %v2644_v63 = vpop.f32.mrb[150].mxu1 }
 0x4dc   :  { %v2731_v32 = vmax.f32 %v7106_v41, %v2644_v63  ;;  %v2646_v12 = vpop.f32.mrb[151].mxu1  ;;  %v5722_v41 = vld [vmem:[%s7579_s2 + $0x8] sm:$0xff]  }
 0x4de   :  { %v7185_v7 = vpack.c.bf16 %v2731_v32, %v2730_v10 }
 0x4e0   :  { %4953 = vmatprep.mubr.msk.bf16.mxu1 %vm2810_vm4, %v7185_v7 }
 0x4e1   :  { %v2649_v40 = vpop.f32.mrb[152].mxu1 }
 0x4e2   :  { %v2732_v30 = vmax.f32 %v7117_v26, %v2649_v40  ;;  %v2651_v33 = vpop.f32.mrb[153].mxu1  ;;  %v5723_v26 = vld [vmem:[%s7579_s2 + $0x10] sm:$0xff]  }
 0x4e3   :  { %v2652_v23 = vpop.f32.mrb[154].mxu1 }
 0x4e4   :  { %v2733_v15 = vmax.f32 %v7119_v51, %v2652_v23  ;;  %v2654_v54 = vpop.f32.mrb[155].mxu1 }
 0x4e6   :  { %v7191_v62 = vpack.c.bf16 %v2733_v15, %v2732_v30 }
 0x4e8   :  { %4954 = vmatmul.mubr.msk.bf16.vlgmr.msra.gmra.mrb[192].mxu1 %vm2810_vm4, %v7191_v62 }
 0x4e9   :  { %v2657_v1 = vpop.f32.mrb[156].mxu1  ;;  %4970 = vmatpush3.bf16.msra.mxu1 %v5721_v36 }
 0x4ea   :  { %v2734_v42 = vmax.f32 %v7130_v44, %v2657_v1  ;;  %v2659_v58 = vpop.f32.mrb[157].mxu1  ;;  %4971 = vmatprep.subr.bf16.mxu1 %v5722_v41 }
 0x4eb   :  { %v2660_v51 = vpop.f32.mrb[158].mxu1 }
 0x4ec   :  { %v2735_v50 = vmax.f32 %v7132_v3, %v2660_v51  ;;  %v2662_v61 = vpop.f32.mrb[159].mxu1  ;;  %v5725_v3 = vld [vmem:[%s7579_s2 + $0x20] ss:$0 sps:$4 sm:$0xff]  }
 0x4ed   :  { %4972 = vmatpush3.bf16.msra.mxu1 %v5722_v41  ;;  %v2967_v25 = vsel %vm2835_vm3, %v5725_v3, 0  ;;  %v5730_v61 = vld [vmem:[%s7579_s2 + $0x68] ss:$0 sps:$4 sm:$0xff]  }
 0x4ee   :  { %v7203_v43 = vpack.c.bf16 %v2735_v50, %v2734_v42  ;;  %4973 = vmatprep.subr.bf16.mxu1 %v5723_v26 }
 0x4f0   :  { %4957 = vmatprep.mubr.msk.bf16.mxu1 %vm2810_vm4, %v7203_v43 }
 0x4f1   :  { %v2665_v44 = vpop.f32.mrb[160].mxu1  ;;  %4974 = vmatpush3.bf16.msra.mxu1 %v5723_v26 }
 0x4f2   :  { %v2736_v16 = vmax.f32 %v7136_v13, %v2665_v44  ;;  %v2667_v47 = vpop.f32.mrb[161].mxu1  ;;  %4975 = vmatprep.subr.bf16.mxu1 %v5724_v35  ;;  %v5726_v13 = vld [vmem:[%s7579_s2 + $0x48] sm:$0xff]  }
 0x4f3   :  { %v2668_v0 = vpop.f32.mrb[162].mxu1 }
 0x4f4   :  { %v2737_v49 = vmax.f32 %v7141_v6, %v2668_v0  ;;  %v2670_v36 = vpop.f32.mrb[163].mxu1  ;;  %v5733_v0 = vld [vmem:[%s7579_s2 + $0x7c] sm:$0xff]  }
 0x4f5   :  { %4976 = vmatpush3.bf16.msra.mxu1 %v5724_v35 }
 0x4f6   :  { %v7215_v53 = vpack.c.bf16 %v2737_v49, %v2736_v16  ;;  %5658 = vmatprep.subr.msk.bf16.mxu1 %vm2835_vm3, %v5725_v3  ;;  %v3107_v3 = vsel %vm2835_vm3, %v5730_v61, 0  ;;  %v5735_v49 = vld [vmem:[%s7579_s2 + $0x8c] ss:$0 sps:$4 sm:$0xff]  }
 0x4f7   :  { %v3263_v36 = vsel %vm2835_vm3, %v5735_v49, 0 }
 0x4f8   :  { %4958 = vmatmul.mubr.msk.bf16.gmra.mrb[196].mxu1 %vm2810_vm4, %v7215_v53 }
 0x4f9   :  { %v2673_v46 = vpop.f32.mrb[164].mxu1  ;;  %4978 = vmatpush3.bf16.msra.mxu1 %v2967_v25  ;;  %v5736_v25 = vld [vmem:[%s7579_s2 + $0x90] sm:$0xff]  }
 0x4fa   :  { %v2738_v52 = vmax.f32 %v7148_v4, %v2673_v46  ;;  %v2675_v6 = vpop.f32.mrb[165].mxu1  ;;  %4995 = vmatprep.subr.bf16.mxu1 %v5726_v13  ;;  %v5738_v46 = vld [vmem:[%s7579_s2 + $0xa0] sm:$0xff]  }
 0x4fb   :  { %v2676_v19 = vpop.f32.mrb[166].mxu1 }
 0x4fc   :  { %v2739_v20 = vmax.f32 %v7150_v9, %v2676_v19  ;;  %v2678_v17 = vpop.f32.mrb[167].mxu1  ;;  %v5741_v19 = vld [vmem:[%s7581_s4] sm:$0xff]  }
 0x4fd   :  { %v5743_v17 = vld [vmem:[%s7581_s4 + $0x10] sm:$0xff]  }
 0x4fe   :  { %v7226_v37 = vpack.c.bf16 %v2739_v20, %v2738_v52  ;;  %v5740_v52 = vld [vmem:[%s7579_s2 + $0xb0] ss:$0 sps:$4 sm:$0xff]   ;;  %v5742_v20 = vld [vmem:[%s7581_s4 + $0x8] sm:$0xff]  }
 0x4ff   :  { %v3419_v6 = vsel %vm2835_vm3, %v5740_v52, 0 }
 0x500   :  { %4961 = vmatprep.mubr.msk.bf16.mxu1 %vm2810_vm4, %v7226_v37 }
 0x501   :  { %v2681_v21 = vpop.f32.mrb[168].mxu1 }
 0x502   :  { %v2740_v29 = vmax.f32 %v7152_v45, %v2681_v21  ;;  %v2683_v2 = vpop.f32.mrb[169].mxu1  ;;  %v5746_v21 = vld [vmem:[%s7581_s4 + $0x28] sm:$0xff]  }
 0x503   :  { %v2684_v18 = vpop.f32.mrb[170].mxu1  ;;  %v5748_v2 = vld [vmem:[%s7581_s4 + $0x38] sm:$0xff]  }
 0x504   :  { %v2741_v14 = vmax.f32 %v7154_v27, %v2684_v18  ;;  %v2686_v60 = vpop.f32.mrb[171].mxu1  ;;  %v5749_v18 = vld [vmem:[%s7581_s4 + $0x40] sm:$0xff]  }
 0x506   :  { %v7232_v4 = vpack.c.bf16 %v2741_v14, %v2740_v29  ;;  %v5747_v29 = vld [vmem:[%s7581_s4 + $0x30] sm:$0xff]  }
 0x507   :  { %v7669_v14 = vld [vmem:[#allocation23_spill] sm:$0xff] }
 0x508   :  { %4962 = vmatmul.mubr.msk.bf16.gmra.mrb[200].mxu1 %vm2810_vm4, %v7232_v4  ;;  %v3536_v60 = vsub.s32 1, %v7669_v14 }
 0x509   :  { %v2689_v9 = vpop.f32.mrb[172].mxu1 }
 0x50a   :  { %v2742_v34 = vmax.f32 %v7159_v57, %v2689_v9  ;;  %v2691_v24 = vpop.f32.mrb[173].mxu1 }
 0x50b   :  { %v2692_v39 = vpop.f32.mrb[174].mxu1 }
 0x50c   :  { %v2743_v10 = vmax.f32 %v7161_v22, %v2692_v39  ;;  %v2694_v28 = vpop.f32.mrb[175].mxu1 }
 0x50e   :  { %v7238_v63 = vpack.c.bf16 %v2743_v10, %v2742_v34 }
 0x510   :  { %4965 = vmatprep.mubr.msk.bf16.mxu1 %vm2810_vm4, %v7238_v63 }
 0x511   :  { %v2697_v45 = vpop.f32.mrb[176].mxu1 }
 0x512   :  { %v2744_v27 = vmax.f32 %v7163_v8, %v2697_v45  ;;  %v2699_v32 = vpop.f32.mrb[177].mxu1 }
 0x513   :  { %v2700_v12 = vpop.f32.mrb[178].mxu1 }
 0x514   :  { %v2745_v40 = vmax.f32 %v7165_v38, %v2700_v12  ;;  %v2702_v30 = vpop.f32.mrb[179].mxu1  ;;  %v5727_v38 = vld [vmem:[%s7579_s2 + $0x50] sm:$0xff]  }
 0x516   :  { %v7244_v33 = vpack.c.bf16 %v2745_v40, %v2744_v27 }
 0x518   :  { %4966 = vmatmul.mubr.msk.bf16.gmra.mrb[204].mxu1 %vm2810_vm4, %v7244_v33 }
 0x519   :  { %v2705_v57 = vpop.f32.mrb[180].mxu1  ;;  %4979 = vmatprep.mubr.msk.bf16.mxu1 %vm2810_vm4, %v7181_v31 }
 0x51a   :  { %v2746_v22 = vmax.f32 %v7167_v56, %v2705_v57  ;;  %v2707_v23 = vpop.f32.mrb[181].mxu1 }
 0x51b   :  { %v2708_v15 = vpop.f32.mrb[182].mxu1 }
 0x51c   :  { %v2747_v8 = vmax.f32 %v7169_v5, %v2708_v15  ;;  %v2710_v54 = vpop.f32.mrb[183].mxu1  ;;  %v5728_v5 = vld [vmem:[%s7579_s2 + $0x58] sm:$0xff]  }
 0x51e   :  { %v7252_v41 = vpack.c.bf16 %v2747_v8, %v2746_v22 }
 0x520   :  { %4980 = vmatmul.mubr.msk.bf16.vlgmr.msra.gmra.mrb[192].mxu1 %vm2810_vm4, %v7185_v7  ;;  %v5729_v7 = vld [vmem:[%s7579_s2 + $0x60] sm:$0xff]  }
 0x521   :  { %v2713_v1 = vpop.f32.mrb[184].mxu1  ;;  %4983 = vmatprep.mubr.msk.bf16.mxu1 %vm2810_vm4, %v7191_v62  ;;  %4996 = vmatpush3.bf16.msra.mxu1 %v5726_v13  ;;  %v5737_v13 = vld [vmem:[%s7579_s2 + $0x98] sm:$0xff]  }
 0x522   :  { %v2748_v56 = vmax.f32 %v7171_v48, %v2713_v1  ;;  %v2715_v31 = vpop.f32.mrb[185].mxu1  ;;  %4997 = vmatprep.subr.bf16.mxu1 %v5727_v38 }
 0x523   :  { %v2716_v42 = vpop.f32.mrb[186].mxu1 }
 0x524   :  { %v2749_v58 = vmax.f32 %v7173_v11, %v2716_v42  ;;  %v2718_v26 = vpop.f32.mrb[187].mxu1 }
 0x525   :  { %4998 = vmatpush3.bf16.msra.mxu1 %v5727_v38 }
 0x526   :  { %v7266_v51 = vpack.c.bf16 %v2749_v58, %v2748_v56  ;;  %4999 = vmatprep.subr.bf16.mxu1 %v5728_v5 }
 0x528   :  { %4984 = vmatmul.mubr.msk.bf16.gmra.mrb[196].mxu1 %vm2810_vm4, %v7203_v43 }
 0x529   :  { %v2721_v48 = vpop.f32.mrb[188].mxu1  ;;  %4987 = vmatprep.mubr.msk.bf16.mxu1 %vm2810_vm4, %v7215_v53  ;;  %5000 = vmatpush3.bf16.msra.mxu1 %v5728_v5 }
 0x52a   :  { %v2750_v50 = vmax.f32 %v7175_v55, %v2721_v48  ;;  %v2723_v11 = vpop.f32.mrb[189].mxu1  ;;  %5001 = vmatprep.subr.bf16.mxu1 %v5729_v7  ;;  %v5731_v55 = vld [vmem:[%s7579_s2 + $0x6c] sm:$0xff]  }
 0x52b   :  { %v2724_v35 = vpop.f32.mrb[190].mxu1 }
 0x52c   :  { %v2751_v44 = vmax.f32 %v7177_v59, %v2724_v35  ;;  %v2726_v16 = vpop.f32.mrb[191].mxu1  ;;  %v5732_v59 = vld [vmem:[%s7579_s2 + $0x74] sm:$0xff]  }
 0x52d   :  { %5002 = vmatpush3.bf16.msra.mxu1 %v5729_v7 }
 0x52e   :  { %v7280_v47 = vpack.c.bf16 %v2751_v44, %v2750_v50  ;;  %5659 = vmatprep.subr.msk.bf16.mxu1 %vm2835_vm3, %v5730_v61  ;;  %v5750_v44 = vld [vmem:[%s7581_s4 + $0x48] sm:$0xff]  }
 0x530   :  { %4988 = vmatmul.mubr.msk.bf16.gmra.mrb[200].mxu1 %vm2810_vm4, %v7226_v37 }
 0x531   :  { %4991 = vmatprep.mubr.msk.bf16.mxu1 %vm2810_vm4, %v7232_v4  ;;  %5004 = vmatpush3.bf16.msra.mxu1 %v3107_v3 }
 0x532   :  { %5021 = vmatprep.subr.bf16.mxu1 %v5731_v55 }
 0x538   :  { %4992 = vmatmul.mubr.msk.bf16.gmra.mrb[204].mxu1 %vm2810_vm4, %v7238_v63 }
 0x539   :  { %5005 = vmatprep.mubr.msk.bf16.mxu1 %vm2810_vm4, %v7191_v62  ;;  %v5734_v62 = vld [vmem:[%s7579_s2 + $0x84] sm:$0xff]  }
 0x540   :  { %5006 = vmatmul.mubr.msk.bf16.vlgmr.msra.gmra.mrb[192].mxu1 %vm2810_vm4, %v7203_v43 }
 0x541   :  { %5009 = vmatprep.mubr.msk.bf16.mxu1 %vm2810_vm4, %v7215_v53  ;;  %5022 = vmatpush3.bf16.msra.mxu1 %v5731_v55 }
 0x542   :  { %5023 = vmatprep.subr.bf16.mxu1 %v5732_v59 }
 0x545   :  { %5024 = vmatpush3.bf16.msra.mxu1 %v5732_v59 }
 0x546   :  { %5025 = vmatprep.subr.bf16.mxu1 %v5733_v0 }
 0x548   :  { %5010 = vmatmul.mubr.msk.bf16.gmra.mrb[196].mxu1 %vm2810_vm4, %v7226_v37 }
 0x549   :  { %5013 = vmatprep.mubr.msk.bf16.mxu1 %vm2810_vm4, %v7232_v4  ;;  %5026 = vmatpush3.bf16.msra.mxu1 %v5733_v0 }
 0x54a   :  { %5027 = vmatprep.subr.bf16.mxu1 %v5734_v62 }
 0x54d   :  { %5028 = vmatpush3.bf16.msra.mxu1 %v5734_v62 }
 0x54e   :  { %5660 = vmatprep.subr.msk.bf16.mxu1 %vm2835_vm3, %v5735_v49 }
 0x550   :  { %5014 = vmatmul.mubr.msk.bf16.gmra.mrb[200].mxu1 %vm2810_vm4, %v7238_v63 }
 0x551   :  { %5017 = vmatprep.mubr.msk.bf16.mxu1 %vm2810_vm4, %v7244_v33  ;;  %5030 = vmatpush3.bf16.msra.mxu1 %v3263_v36  ;;  %v5751_v36 = vld [vmem:[%s7581_s4 + $0x50] sm:$0xff]  }
 0x552   :  { %5047 = vmatprep.subr.bf16.mxu1 %v5736_v25 }
 0x558   :  { %5018 = vmatmul.mubr.msk.bf16.gmra.mrb[204].mxu1 %vm2810_vm4, %v7252_v41 }
 0x559   :  { %5031 = vmatprep.mubr.msk.bf16.mxu1 %vm2810_vm4, %v7203_v43  ;;  %v5739_v43 = vld [vmem:[%s7579_s2 + $0xa8] sm:$0xff]  }
 0x560   :  { %5032 = vmatmul.mubr.msk.bf16.vlgmr.msra.gmra.mrb[192].mxu1 %vm2810_vm4, %v7215_v53 }
 0x561   :  { %5035 = vmatprep.mubr.msk.bf16.mxu1 %vm2810_vm4, %v7226_v37  ;;  %5048 = vmatpush3.bf16.msra.mxu1 %v5736_v25 }
 0x562   :  { %5049 = vmatprep.subr.bf16.mxu1 %v5737_v13 }
 0x565   :  { %5050 = vmatpush3.bf16.msra.mxu1 %v5737_v13 }
 0x566   :  { %5051 = vmatprep.subr.bf16.mxu1 %v5738_v46 }
 0x568   :  { %5036 = vmatmul.mubr.msk.bf16.gmra.mrb[196].mxu1 %vm2810_vm4, %v7232_v4 }
 0x569   :  { %5039 = vmatprep.mubr.msk.bf16.mxu1 %vm2810_vm4, %v7238_v63  ;;  %5052 = vmatpush3.bf16.msra.mxu1 %v5738_v46 }
 0x56a   :  { %5053 = vmatprep.subr.bf16.mxu1 %v5739_v43 }
 0x56d   :  { %5054 = vmatpush3.bf16.msra.mxu1 %v5739_v43 }
 0x56e   :  { %5661 = vmatprep.subr.msk.bf16.mxu1 %vm2835_vm3, %v5740_v52 }
 0x570   :  { %5040 = vmatmul.mubr.msk.bf16.gmra.mrb[200].mxu1 %vm2810_vm4, %v7244_v33 }
 0x571   :  { %5043 = vmatprep.mubr.msk.bf16.mxu1 %vm2810_vm4, %v7252_v41  ;;  %5056 = vmatpush3.bf16.msra.mxu1 %v3419_v6 }
 0x572   :  { %5073 = vmatprep.subr.bf16.mxu1 %v5741_v19 }
 0x578   :  { %5044 = vmatmul.mubr.msk.bf16.gmra.mrb[204].mxu1 %vm2810_vm4, %v7266_v51 }
 0x579   :  { %5057 = vmatprep.mubr.msk.bf16.mxu1 %vm2810_vm4, %v7215_v53  ;;  %v5744_v53 = vld [vmem:[%s7581_s4 + $0x18] sm:$0xff]  }
 0x580   :  { %5058 = vmatmul.mubr.msk.bf16.vlgmr.msra.gmra.mrb[192].mxu1 %vm2810_vm4, %v7226_v37  ;;  %v5745_v37 = vld [vmem:[%s7581_s4 + $0x20] sm:$0xff]  }
 0x581   :  { %5061 = vmatprep.mubr.msk.bf16.mxu1 %vm2810_vm4, %v7232_v4  ;;  %5074 = vmatpush3.bf16.msra.mxu1 %v5741_v19  ;;  %v7403_v4 = vld [vmem:[%s7585_s8] sm:$0x1f] }
 0x582   :  { %5075 = vmatprep.subr.bf16.mxu1 %v5742_v20  ;;  %v7406_v9 = vrot.slane %v7403_v4, %v3536_v60 }
 0x585   :  { %5076 = vmatpush3.bf16.msra.mxu1 %v5742_v20  ;;  %v5752_v20 = vld [vmem:[%s7581_s4 + $0x58] sm:$0xff]  }
 0x586   :  { %5077 = vmatprep.subr.bf16.mxu1 %v5743_v17 }
 0x588   :  { %5062 = vmatmul.mubr.msk.bf16.gmra.mrb[196].mxu1 %vm2810_vm4, %v7238_v63 }
 0x589   :  { %5065 = vmatprep.mubr.msk.bf16.mxu1 %vm2810_vm4, %v7244_v33  ;;  %5078 = vmatpush3.bf16.msra.mxu1 %v5743_v17 }
 0x58a   :  { %5079 = vmatprep.subr.bf16.mxu1 %v5744_v53 }
 0x58d   :  { %5080 = vmatpush3.bf16.msra.mxu1 %v5744_v53 }
 0x58e   :  { %5081 = vmatprep.subr.bf16.mxu1 %v5745_v37 }
 0x590   :  { %5066 = vmatmul.mubr.msk.bf16.gmra.mrb[200].mxu1 %vm2810_vm4, %v7252_v41 }
 0x591   :  { %5069 = vmatprep.mubr.msk.bf16.mxu1 %vm2810_vm4, %v7266_v51  ;;  %5082 = vmatpush3.bf16.msra.mxu1 %v5745_v37 }
 0x592   :  { %5083 = vmatprep.subr.bf16.mxu1 %v5746_v21 }
 0x595   :  { %5084 = vmatpush3.bf16.msra.mxu1 %v5746_v21 }
 0x596   :  { %5085 = vmatprep.subr.bf16.mxu1 %v5747_v29 }
 0x598   :  { %5070 = vmatmul.mubr.msk.bf16.gmra.mrb[204].mxu1 %vm2810_vm4, %v7280_v47 }
 0x599   :  { %5086 = vmatpush3.bf16.msra.mxu1 %v5747_v29 }
 0x59a   :  { %5087 = vmatprep.subr.bf16.mxu1 %v5748_v2 }
 0x59d   :  { %5088 = vmatpush3.bf16.msra.mxu1 %v5748_v2 }
 0x59e   :  { %5097 = vmatprep.subr.bf16.mxu1 %v5749_v18 }
 0x653   :  { %v5059_v34 = vpop.f32.mrb[192].mxu1 }
 0x654   :  { %v3540_v24 = vadd.f32 %v5059_v34, %v7406_v9  ;;  %v3455_v39 = vpop.f32.mrb[193].mxu1  ;;  %v5753_v34 = vld [vmem:[%s7581_s4 + $0x60] sm:$0xff]  }
 0x655   :  { %v3538_v10 = vadd.f32 %v7406_v9, %v3455_v39  ;;  %v5060_v28 = vpop.f32.mrb[194].mxu1 }
 0x656   :  { %v3556_v63 = vmax.f32 %v3540_v24, 0.0  ;;  %v3541_v45 = vadd.f32 %v5060_v28, %v7406_v9  ;;  %v3458_v27 = vpop.f32.mrb[195].mxu1  ;;  %v5756_v28 = vld [vmem:[%s7581_s4 + $0x78] sm:$0xff]  }
 0x657   :  { %v3554_v32 = vmax.f32 %v3538_v10, 0.0  ;;  %v3539_v12 = vadd.f32 %v7406_v9, %v3458_v27  ;;  %v5754_v10 = vld [vmem:[%s7581_s4 + $0x68] sm:$0xff]  }
 0x658   :  { %v3557_v40 = vmax.f32 %v3541_v45, 0.0  ;;  %v5818_v45 = vmov 0.0   ;;  %v5758_v27 = vld [vmem:[%s7582_s5 + $0x28] sm:$0xff]  }
 0x659   :  { %v3570_v30 = vmax.f32 %v3554_v32, %v3556_v63  ;;  %v3555_v33 = vmax.f32 %v3539_v12, 0.0  ;;  %v5757_v63 = vld [vmem:[%s7582_s5 + $0x20] sm:$0xff]   ;;  %v5759_v32 = vld [vmem:[%s7582_s5 + $0x30] sm:$0xff]   ;;  %v5760_v12 = vld [vmem:[%s7582_s5 + $0x38] sm:$0xff]  }
 0x65b   :  { %v3571_v57 = vmax.f32 %v3555_v33, %v3557_v40  ;;  %v5063_v22 = vpop.f32.mrb[196].mxu1 }
 0x65c   :  { %v3544_v23 = vadd.f32 %v5063_v22, %v7406_v9  ;;  %v3471_v15 = vpop.f32.mrb[197].mxu1 }
 0x65d   :  { %v3542_v8 = vadd.f32 %v7406_v9, %v3471_v15  ;;  %v5064_v54 = vpop.f32.mrb[198].mxu1  ;;  %v3578_v41 = vpack.c.bf16 %v3571_v57, %v3570_v30 }
 0x65e   :  { %v3560_v38 = vmax.f32 %v3544_v23, 0.0  ;;  %v3545_v1 = vadd.f32 %v5064_v54, %v7406_v9  ;;  %v3474_v56 = vpop.f32.mrb[199].mxu1 }
 0x65f   :  { %v3558_v31 = vmax.f32 %v3542_v8, 0.0  ;;  %v3543_v5 = vadd.f32 %v7406_v9, %v3474_v56  ;;  %5089 = vmatprep.mubr.bf16.mxu1 %v3578_v41 }
 0x660   :  { %v3561_v42 = vmax.f32 %v3545_v1, 0.0 }
 0x661   :  { %v3572_v58 = vmax.f32 %v3558_v31, %v3560_v38  ;;  %v3559_v26 = vmax.f32 %v3543_v5, 0.0 }
 0x663   :  { %v3573_v51 = vmax.f32 %v3559_v26, %v3561_v42  ;;  %v5067_v7 = vpop.f32.mrb[200].mxu1 }
 0x664   :  { %v3548_v48 = vadd.f32 %v5067_v7, %v7406_v9  ;;  %v3487_v50 = vpop.f32.mrb[201].mxu1 }
 0x665   :  { %v3579_v11 = vpack.c.bf16 %v3573_v51, %v3572_v58  ;;  %v3546_v61 = vadd.f32 %v7406_v9, %v3487_v50  ;;  %v5068_v35 = vpop.f32.mrb[202].mxu1  ;;  %v5761_v58 = vld [vmem:[%s7582_s5] sm:$0xff]  }
 0x666   :  { %v3564_v16 = vmax.f32 %v3548_v48, 0.0  ;;  %v3549_v47 = vadd.f32 %v5068_v35, %v7406_v9  ;;  %v3490_v3 = vpop.f32.mrb[203].mxu1  ;;  %v5762_v48 = vld [vmem:[%s7582_s5 + $0x8] sm:$0xff]  }
 0x667   :  { %v3562_v55 = vmax.f32 %v3546_v61, 0.0  ;;  %v3547_v59 = vadd.f32 %v7406_v9, %v3490_v3  ;;  %5090 = vmatmul.mubr.bf16.vlgmr.msra.gmra.mrb[208].mxu1 %v3579_v11  ;;  %v5763_v3 = vld [vmem:[%s7582_s5 + $0x10] sm:$0xff]  }
 0x668   :  { %v3565_v0 = vmax.f32 %v3549_v47, 0.0  ;;  %5098 = vmatpush3.bf16.msra.mxu1 %v5749_v18 }
 0x669   :  { %v3574_v62 = vmax.f32 %v3562_v55, %v3564_v16  ;;  %v3563_v49 = vmax.f32 %v3547_v59, 0.0  ;;  %5099 = vmatprep.subr.bf16.mxu1 %v5750_v44 }
 0x66b   :  { %v3575_v25 = vmax.f32 %v3563_v49, %v3565_v0  ;;  %v5071_v13 = vpop.f32.mrb[204].mxu1  ;;  %v5764_v0 = vld [vmem:[%s7582_s5 + $0x18] sm:$0xff]   ;;  %v5766_v49 = vld [vmem:[%s7582_s5 + $0x48] sm:$0xff]  }
 0x66c   :  { %v3552_v46 = vadd.f32 %v5071_v13, %v7406_v9  ;;  %5100 = vmatpush3.bf16.msra.mxu1 %v5750_v44  ;;  %v3503_v43 = vpop.f32.mrb[205].mxu1  ;;  %v5769_v13 = vld [vmem:[%s7582_s5 + $0x60] sm:$0xff]  }
 0x66d   :  { %v3550_v52 = vadd.f32 %v7406_v9, %v3503_v43  ;;  %v5072_v6 = vpop.f32.mrb[206].mxu1  ;;  %5101 = vmatprep.subr.bf16.mxu1 %v5751_v36  ;;  %v3580_v19 = vpack.c.bf16 %v3575_v25, %v3574_v62  ;;  %v5765_v62 = vld [vmem:[%s7582_s5 + $0x40] sm:$0xff]   ;;  %v5768_v25 = vld [vmem:[%s7582_s5 + $0x58] sm:$0xff]   ;;  %v5771_v43 = vld [vmem:[%s7582_s5 + $0x70] sm:$0xff]  }
 0x66e   :  { %v3568_v17 = vmax.f32 %v3552_v46, 0.0  ;;  %v3553_v53 = vadd.f32 %v5072_v6, %v7406_v9  ;;  %v3506_v37 = vpop.f32.mrb[207].mxu1  ;;  %v5770_v46 = vld [vmem:[%s7582_s5 + $0x68] sm:$0xff]   ;;  %v5773_v6 = vld [vmem:[%s7583_s6] sm:$0xff]  }
 0x66f   :  { %v3566_v21 = vmax.f32 %v3550_v52, 0.0  ;;  %v3551_v29 = vadd.f32 %v7406_v9, %v3506_v37  ;;  %5093 = vmatprep.mubr.bf16.mxu1 %v3580_v19  ;;  %v5755_v9 = vld [vmem:[%s7581_s4 + $0x70] sm:$0xff]   ;;  %v5772_v52 = vld [vmem:[%s7582_s5 + $0x78] sm:$0xff]   ;;  %v5778_v37 = vld [vmem:[%s7583_s6 + $0x28] sm:$0xff]  }
 0x670   :  { %v3569_v2 = vmax.f32 %v3553_v53, 0.0  ;;  %5102 = vmatpush3.bf16.msra.mxu1 %v5751_v36  ;;  %v5767_v36 = vld [vmem:[%s7582_s5 + $0x50] sm:$0xff]   ;;  %v5777_v53 = vld [vmem:[%s7583_s6 + $0x20] sm:$0xff]  }
 0x671   :  { %v3576_v18 = vmax.f32 %v3566_v21, %v3568_v17  ;;  %v3567_v60 = vmax.f32 %v3551_v29, 0.0  ;;  %5103 = vmatprep.subr.bf16.mxu1 %v5752_v20  ;;  %v5776_v17 = vld [vmem:[%s7583_s6 + $0x18] sm:$0xff]   ;;  %v5779_v21 = vld [vmem:[%s7583_s6 + $0x30] sm:$0xff]  }
 0x672   :  { %v5780_v29 = vld [vmem:[%s7583_s6 + $0x38] sm:$0xff]  }
 0x673   :  { %v3577_v24 = vmax.f32 %v3567_v60, %v3569_v2 }
 0x674   :  { %5104 = vmatpush3.bf16.msra.mxu1 %v5752_v20  ;;  %v5775_v20 = vld [vmem:[%s7583_s6 + $0x10] sm:$0xff]  }
 0x675   :  { %5105 = vmatprep.subr.bf16.mxu1 %v5753_v34  ;;  %v3581_v39 = vpack.c.bf16 %v3577_v24, %v3576_v18 }
 0x677   :  { %5094 = vmatmul.mubr.bf16.gmra.mrb[212].mxu1 %v3581_v39 }
 0x678   :  { %5106 = vmatpush3.bf16.msra.mxu1 %v5753_v34  ;;  %5113 = vmatprep.mubr.bf16.mxu1 %v3578_v41 }
 0x679   :  { %5107 = vmatprep.subr.bf16.mxu1 %v5754_v10 }
 0x67c   :  { %5108 = vmatpush3.bf16.msra.mxu1 %v5754_v10 }
 0x67d   :  { %5109 = vmatprep.subr.bf16.mxu1 %v5755_v9 }
 0x680   :  { %5110 = vmatpush3.bf16.msra.mxu1 %v5755_v9 }
 0x681   :  { %5111 = vmatprep.subr.bf16.mxu1 %v5756_v28 }
 0x684   :  { %5112 = vmatpush3.bf16.msra.mxu1 %v5756_v28 }
 0x685   :  { %5121 = vmatprep.subr.bf16.mxu1 %v5818_v45 }
 0x687   :  { %5114 = vmatmul.mubr.bf16.vlgmr.msra.gmra.mrb[216].mxu1 %v3579_v11 }
 0x688   :  { %5117 = vmatprep.mubr.bf16.mxu1 %v3580_v19  ;;  %5122 = vmatpush3.bf16.msra.mxu1 %v5757_v63  ;;  %v5774_v19 = vld [vmem:[%s7583_s6 + $0x8] sm:$0xff]  }
 0x689   :  { %5123 = vmatprep.subr.bf16.mxu1 %v5818_v45 }
 0x68c   :  { %5124 = vmatpush3.bf16.msra.mxu1 %v5758_v27 }
 0x68d   :  { %5125 = vmatprep.subr.bf16.mxu1 %v5818_v45 }
 0x68f   :  { %5118 = vmatmul.mubr.bf16.gmra.mrb[220].mxu1 %v3581_v39 }
 0x690   :  { %5126 = vmatpush3.bf16.msra.mxu1 %v5759_v32  ;;  %5129 = vmatprep.mubr.msk.bf16.mxu1 %vm5819_vm5, %v5818_v45 }
 0x691   :  { %5127 = vmatprep.subr.bf16.mxu1 %v5818_v45 }
 0x694   :  { %5128 = vmatpush3.bf16.msra.mxu1 %v5760_v12 }
 0x695   :  { %5133 = vmatprep.subr.bf16.mxu1 %v5818_v45 }
 0x73a   :  { %v5091_v40 = vpop.f32.mrb[208].mxu1 }
 0x73b   :  { %v3680_v30 = vpop.f32.mrb[209].mxu1 }
 0x73c   :  { %v5092_v33 = vpop.f32.mrb[210].mxu1 }
 0x73d   :  { %v3683_v57 = vpop.f32.mrb[211].mxu1 }
 0x74a   :  { %v5095_v22 = vpop.f32.mrb[212].mxu1 }
 0x74b   :  { %v3696_v23 = vpop.f32.mrb[213].mxu1 }
 0x74c   :  { %v5096_v15 = vpop.f32.mrb[214].mxu1 }
 0x74d   :  { %v3699_v8 = vpop.f32.mrb[215].mxu1 }
 0x75a   :  { %v5115_v54 = vpop.f32.mrb[216].mxu1 }
 0x75b   :  { %v3843_v41 = vmax.f32 %v5091_v40, %v5115_v54  ;;  %v3810_v38 = vpop.f32.mrb[217].mxu1 }
 0x75c   :  { %v3841_v1 = vmax.f32 %v3680_v30, %v3810_v38  ;;  %v5116_v56 = vpop.f32.mrb[218].mxu1 }
 0x75d   :  { %v3844_v31 = vmax.f32 %v5092_v33, %v5116_v56  ;;  %v3813_v5 = vpop.f32.mrb[219].mxu1 }
 0x75e   :  { %v3842_v42 = vmax.f32 %v3683_v57, %v3813_v5  ;;  %v4167_v57 = vsub.s32 2, %v7669_v14 }
 0x75f   :  { %v3858_v26 = vpack.c.bf16 %v3844_v31, %v3843_v41 }
 0x760   :  { %v3849_v51 = vpack.c.bf16 %v3842_v42, %v3841_v1  ;;  %v5781_v42 = vld [vmem:[#allocation2] sm:$0xff]  }
 0x761   :  { %5130 = vmatmul.mubr.msk.bf16.vlgmr.msra.gmra.mrb[224].mxu1 %vm3892_vm6, %v3858_v26  ;;  %v5782_v26 = vld [vmem:[#allocation2 + $0x8] sm:$0xff]  }
 0x762   :  { %5134 = vmatpush3.bf16.msra.mxu1 %v5761_v58  ;;  %v5119_v7 = vpop.f32.mrb[220].mxu1  ;;  %5141 = vmatprep.mubr.msk.bf16.mxu1 %vm5819_vm5, %v5818_v45 }
 0x763   :  { %v3847_v50 = vmax.f32 %v5095_v22, %v5119_v7  ;;  %v3826_v11 = vpop.f32.mrb[221].mxu1  ;;  %5135 = vmatprep.subr.bf16.mxu1 %v5818_v45  ;;  %v4168_v22 = vrot.slane %v7403_v4, %v4167_v57  ;;  %v5784_v7 = vld [vmem:[#allocation2 + $0x18] sm:$0xff]  }
 0x764   :  { %v3845_v61 = vmax.f32 %v3696_v23, %v3826_v11  ;;  %v5120_v35 = vpop.f32.mrb[222].mxu1  ;;  %v5787_v11 = vld [vmem:[#allocation2 + $0x30] sm:$0xff]  }
 0x765   :  { %v3848_v44 = vmax.f32 %v5096_v15, %v5120_v35  ;;  %v3829_v16 = vpop.f32.mrb[223].mxu1  ;;  %v4192_v35 = vsub.s32 3, %v7669_v14 }
 0x766   :  { %v3846_v47 = vmax.f32 %v3699_v8, %v3829_v16  ;;  %5136 = vmatpush3.bf16.msra.mxu1 %v5762_v48  ;;  %v5785_v48 = vld [vmem:[#allocation2 + $0x20] sm:$0xff]  }
 0x767   :  { %v4085_v55 = vpack.c.bf16 %v3848_v44, %v3847_v50  ;;  %5137 = vmatprep.subr.bf16.mxu1 %v5818_v45  ;;  %v5786_v50 = vld [vmem:[#allocation2 + $0x28] sm:$0xff]   ;;  %v4193_v44 = vrot.slane %v7403_v4, %v4192_v35 }
 0x768   :  { %v4005_v59 = vpack.c.bf16 %v3846_v47, %v3845_v61  ;;  %v5788_v61 = vld [vmem:[#allocation2 + $0x38] sm:$0xff]  }
 0x76a   :  { %5138 = vmatpush3.bf16.msra.mxu1 %v5763_v3 }
 0x76b   :  { %5139 = vmatprep.subr.bf16.mxu1 %v5818_v45 }
 0x76e   :  { %5140 = vmatpush3.bf16.msra.mxu1 %v5764_v0 }
 0x76f   :  { %5145 = vmatprep.subr.bf16.mxu1 %v5818_v45 }
 0x771   :  { %5142 = vmatmul.mubr.msk.bf16.vlgmr.msra.gmra.mrb[228].mxu1 %vm3892_vm6, %v3849_v51  ;;  %v5783_v51 = vld [vmem:[#allocation2 + $0x10] sm:$0xff]  }
 0x772   :  { %5146 = vmatpush3.bf16.msra.mxu1 %v5765_v62  ;;  %5153 = vmatprep.mubr.msk.bf16.mxu1 %vm5819_vm5, %v5818_v45 }
 0x773   :  { %5147 = vmatprep.subr.bf16.mxu1 %v5818_v45 }
 0x776   :  { %5148 = vmatpush3.bf16.msra.mxu1 %v5766_v49 }
 0x777   :  { %5149 = vmatprep.subr.bf16.mxu1 %v5818_v45 }
 0x77a   :  { %5150 = vmatpush3.bf16.msra.mxu1 %v5767_v36 }
 0x77b   :  { %5151 = vmatprep.subr.bf16.mxu1 %v5818_v45 }
 0x77e   :  { %5152 = vmatpush3.bf16.msra.mxu1 %v5768_v25  ;;  %v4304_v25 = vsub.s32 4, %v7669_v14 }
 0x77f   :  { %5157 = vmatprep.subr.bf16.mxu1 %v5818_v45 }
 0x781   :  { %5154 = vmatmul.mubr.msk.bf16.vlgmr.msra.gmra.mrb[232].mxu1 %vm3892_vm6, %v4005_v59 }
 0x782   :  { %5158 = vmatpush3.bf16.msra.mxu1 %v5769_v13  ;;  %5165 = vmatprep.mubr.msk.bf16.mxu1 %vm5819_vm5, %v5818_v45 }
 0x783   :  { %5159 = vmatprep.subr.bf16.mxu1 %v5818_v45 }
 0x786   :  { %5160 = vmatpush3.bf16.msra.mxu1 %v5770_v46 }
 0x787   :  { %5161 = vmatprep.subr.bf16.mxu1 %v5818_v45 }
 0x78a   :  { %5162 = vmatpush3.bf16.msra.mxu1 %v5771_v43 }
 0x78b   :  { %5163 = vmatprep.subr.bf16.mxu1 %v5818_v45 }
 0x78e   :  { %5164 = vmatpush3.bf16.msra.mxu1 %v5772_v52 }
 0x78f   :  { %5169 = vmatprep.subr.bf16.mxu1 %v5818_v45 }
 0x791   :  { %5166 = vmatmul.mubr.msk.bf16.vlgmr.msra.gmra.mrb[236].mxu1 %vm3892_vm6, %v4085_v55 }
 0x792   :  { %5185 = vmatprep.mubr.msk.bf16.mxu1 %vm5819_vm5, %v5818_v45  ;;  %5170 = vmatpush3.bf16.msra.mxu1 %v5773_v6 }
 0x793   :  { %5171 = vmatprep.subr.bf16.mxu1 %v5818_v45 }
 0x796   :  { %5172 = vmatpush3.bf16.msra.mxu1 %v5774_v19 }
 0x797   :  { %5173 = vmatprep.subr.bf16.mxu1 %v5818_v45 }
 0x79a   :  { %5174 = vmatpush3.bf16.msra.mxu1 %v5775_v20 }
 0x79b   :  { %5175 = vmatprep.subr.bf16.mxu1 %v5818_v45 }
 0x79e   :  { %5176 = vmatpush3.bf16.msra.mxu1 %v5776_v17 }
 0x79f   :  { %5177 = vmatprep.subr.bf16.mxu1 %v5818_v45 }
 0x7a2   :  { %5178 = vmatpush3.bf16.msra.mxu1 %v5777_v53 }
 0x7a3   :  { %5179 = vmatprep.subr.bf16.mxu1 %v5818_v45 }
 0x7a6   :  { %5180 = vmatpush3.bf16.msra.mxu1 %v5778_v37 }
 0x7a7   :  { %5181 = vmatprep.subr.bf16.mxu1 %v5818_v45 }
 0x7aa   :  { %5182 = vmatpush3.bf16.msra.mxu1 %v5779_v21 }
 0x7ab   :  { %5183 = vmatprep.subr.bf16.mxu1 %v5818_v45 }
 0x7ae   :  { %5184 = vmatpush3.bf16.msra.mxu1 %v5780_v29 }
 0x7af   :  { %5189 = vmatprep.subr.bf16.mxu1 %v5818_v45 }
 0x834   :  { %v3930_v2 = vpop.f32.mrb[224].mxu1 }
 0x835   :  { %v5131_v18 = vpop.f32.mrb[225].mxu1 }
 0x836   :  { %v3933_v60 = vpop.f32.mrb[226].mxu1 }
 0x837   :  { %v5132_v34 = vpop.f32.mrb[227].mxu1 }
 0x844   :  { %v3998_v24 = vpop.f32.mrb[228].mxu1 }
 0x845   :  { %v3999_v39 = vadd.f32 %v3998_v24, %v3930_v2  ;;  %v5143_v10 = vpop.f32.mrb[229].mxu1 }
 0x846   :  { %v4001_v9 = vpop.f32.mrb[230].mxu1 }
 0x847   :  { %v4002_v28 = vadd.f32 %v4001_v9, %v3933_v60  ;;  %v5144_v63 = vpop.f32.mrb[231].mxu1 }
 0x854   :  { %v4076_v27 = vpop.f32.mrb[232].mxu1 }
 0x855   :  { %v4083_v32 = vadd.f32 %v4076_v27, %v3999_v39  ;;  %v5155_v12 = vpop.f32.mrb[233].mxu1 }
 0x856   :  { %v4079_v40 = vpop.f32.mrb[234].mxu1 }
 0x857   :  { %v4084_v30 = vadd.f32 %v4079_v40, %v4002_v28  ;;  %v5156_v33 = vpop.f32.mrb[235].mxu1 }
 0x864   :  { %v4156_v23 = vpop.f32.mrb[236].mxu1 }
 0x865   :  { %v4163_v15 = vadd.f32 %v4156_v23, %v4083_v32  ;;  %v5167_v8 = vpop.f32.mrb[237].mxu1 }
 0x866   :  { %v4159_v54 = vpop.f32.mrb[238].mxu1 }
 0x867   :  { %v4169_v41 = vadd.f32 %v4168_v22, %v4163_v15  ;;  %v4164_v38 = vadd.f32 %v4159_v54, %v4084_v30  ;;  %v5168_v1 = vpop.f32.mrb[239].mxu1 }
 0x869   :  { %v4170_v56 = vadd.f32 %v4168_v22, %v4164_v38  ;;  %v4171_v31 = vmax.f32 %v4169_v41, 0.0 }
 0x86b   :  { %v4172_v5 = vmax.f32 %v4170_v56, 0.0 }
 0x86d   :  { %v4173_v58 = vpack.c.bf16 %v4172_v5, %v4171_v31 }
 0x86f   :  { %5186 = vmatmul.mubr.bf16.vlgmr.msra.gmra.mrb[240].mxu1 %v4173_v58 }
 0x870   :  { %5190 = vmatpush3.bf16.msra.mxu1 %v5781_v42  ;;  %5205 = vmatprep.mubr.msk.bf16.mxu1 %vm5819_vm5, %v5818_v45 }
 0x871   :  { %5191 = vmatprep.subr.bf16.mxu1 %v5818_v45 }
 0x874   :  { %5192 = vmatpush3.bf16.msra.mxu1 %v5782_v26 }
 0x875   :  { %5193 = vmatprep.subr.bf16.mxu1 %v5818_v45 }
 0x878   :  { %5194 = vmatpush3.bf16.msra.mxu1 %v5783_v51 }
 0x879   :  { %5195 = vmatprep.subr.bf16.mxu1 %v5818_v45 }
 0x87c   :  { %5196 = vmatpush3.bf16.msra.mxu1 %v5784_v7 }
 0x87d   :  { %5197 = vmatprep.subr.bf16.mxu1 %v5818_v45 }
 0x880   :  { %5198 = vmatpush3.bf16.msra.mxu1 %v5785_v48 }
 0x881   :  { %5199 = vmatprep.subr.bf16.mxu1 %v5818_v45 }
 0x884   :  { %5200 = vmatpush3.bf16.msra.mxu1 %v5786_v50 }
 0x885   :  { %5201 = vmatprep.subr.bf16.mxu1 %v5818_v45 }
 0x888   :  { %5202 = vmatpush3.bf16.msra.mxu1 %v5787_v11 }
 0x889   :  { %5203 = vmatprep.subr.bf16.mxu1 %v5818_v45  ;;  %v4305_v45 = vrot.slane %v7403_v4, %v4304_v25 }
 0x88c   :  { %5204 = vmatpush3.bf16.msra.mxu1 %v5788_v61 }
 0x942   :  { %v4276_v16 = vpop.f32.mrb[240].mxu1 }
 0x943   :  { %v4277_v47 = vadd.f32 %v4276_v16, %v4193_v44  ;;  %v5187_v3 = vpop.f32.mrb[241].mxu1 }
 0x944   :  { %v4279_v55 = vpop.f32.mrb[242].mxu1 }
 0x945   :  { %v4280_v59 = vadd.f32 %v4279_v55, %v4193_v44  ;;  %v5188_v0 = vpop.f32.mrb[243].mxu1  ;;  %v4283_v62 = vmax.f32 %v4277_v47, 0.0 }
 0x947   :  { %v4284_v49 = vmax.f32 %v4280_v59, 0.0 }
 0x949   :  { %v4285_v36 = vpack.c.bf16 %v4284_v49, %v4283_v62 }
 0x94b   :  { %5206 = vmatmul.mubr.bf16.vlgmr.msra.gmra.mrb[244].mxu1 %v4285_v36 }
 0xa1e   :  { %v4388_v13 = vpop.f32.mrb[244].mxu1 }
 0xa1f   :  { %v4389_v46 = vadd.f32 %v4388_v13, %v4305_v45  ;;  %v5207_v43 = vpop.f32.mrb[245].mxu1 }
 0xa20   :  { %v4391_v52 = vpop.f32.mrb[246].mxu1 }
 0xa21   :  { %4395 = vst [vmem:[%s7586_s9] sm:$0xff] %v4389_v46  ;;  %v4392_v6 = vadd.f32 %v4391_v52, %v4305_v45  ;;  %v5208_v19 = vpop.f32.mrb[247].mxu1 }
 0xa23   :  { %4396 = vst [vmem:[%s7586_s9 + $0x8] sm:$0xff] %v4392_v6 }
 0xa24   :  { %4401 = vsyncpa [#allocation3], 1 }

</bundles_post_ra>
